<compile_context>
chip_gen: v6e
topology: v6e:2x2x1
jax: 0.10.0
libtpu: 0.0.40
codegen_flags: <defaults>
</compile_context>

<pallas_src>
import jax
import jax.numpy as jnp
from jax.experimental import pallas as pl
from jax.experimental.pallas import tpu as pltpu


_BN_EPS = 1e-5
_MAX_TILE = 1024                    # columns (lane dim) per grid step
_VMEM_LIMIT = 32 * 1024 * 1024      # headroom for v7x's 64 MiB VMEM


def _pick_tile(m, max_tile=_MAX_TILE):
    """Largest tile <= max_tile that divides m and is a multiple of 128
    (falls back to the full extent)."""
    if m <= max_tile:
        return m
    for t in range(max_tile, 127, -128):
        if m % t == 0:
            return t
    return m


# ----------------------------------------------------------------------------
# Pallas kernels
# ----------------------------------------------------------------------------
def _conv_stats_kernel(p_ref, w_ref, b_ref, y_ref, s_ref):
    # p_ref: (K, TM) bf16 patches (K = 27*Ci), w_ref: (Co, K) bf16,
    # b_ref: (Co, 1) f32.  Lane-dense output y_ref: (Co, TM) bf16.
    acc = jnp.dot(w_ref[...], p_ref[...], preferred_element_type=jnp.float32)
    acc = acc + b_ref[...]
    y_ref[...] = acc.astype(y_ref.dtype)
    # Per-tile partial BatchNorm statistics in f32 (reduced across tiles in
    # JAX) so batch-norm stays correct under M-tiling.
    ssum = jnp.sum(acc, axis=1, keepdims=True)          # (Co, 1)
    ssq = jnp.sum(acc * acc, axis=1, keepdims=True)     # (Co, 1)
    s_ref[0] = jnp.concatenate([ssum, ssq], axis=1)     # (Co, 2)


def _conv_sigmoid_kernel(p_ref, w_ref, b_ref, y_ref):
    # Final decoder layer: no BatchNorm, so the sigmoid fuses directly into
    # the conv epilogue (single pass).
    acc = jnp.dot(w_ref[...], p_ref[...], preferred_element_type=jnp.float32)
    acc = acc + b_ref[...]
    y_ref[...] = jax.nn.sigmoid(acc).astype(y_ref.dtype)


def _bn_relu_pool_kernel(y_ref, scale_ref, shift_ref, o_ref):
    # y_ref: (Co, window, TM) bf16, window = 8 (fused 2x2x2 max-pool) or 1.
    # BN/ReLU math in f32 (v5e VPU has no bf16 arithmetic).
    y = y_ref[...].astype(jnp.float32)
    y = y * scale_ref[...] + shift_ref[...]
    y = jnp.maximum(y, 0.0)
    o_ref[...] = jnp.max(y, axis=1).astype(o_ref.dtype)


def _bottleneck_kernel(x_ref, w1_ref, b1_ref, w2_ref, b2_ref, o_ref):
    h = jnp.dot(x_ref[...], w1_ref[...],
                preferred_element_type=jnp.float32) + b1_ref[...]
    h = jnp.maximum(h, 0.0)
    o_ref[...] = (jnp.dot(h, w2_ref[...],
                          preferred_element_type=jnp.float32)
                  + b2_ref[...]).astype(o_ref.dtype)


# ----------------------------------------------------------------------------
# Wrappers (JAX glue: padding / im2col / reshapes)
# ----------------------------------------------------------------------------
def _im2col_t(x_cf, pool_major):
    """Transposed im2col: (Ci, N, D, H, W) -> (27*Ci, M), M on lanes.

    TODO(synk): this materializes the 27 shifted activation copies in HBM;
    replace with halo-tile DMA + in-VMEM tap construction.
    """
    ci, n, d, h, w = x_cf.shape
    xp = jnp.pad(x_cf, ((0, 0), (0, 0), (1, 1), (1, 1), (1, 1)))
    cols = []
    for kd in range(3):
        for kh in range(3):
            for kw in range(3):
                s = xp[:, :, kd:kd + d, kh:kh + h, kw:kw + w]
                if pool_major:
                    # Group the 8 members of each 2x2x2 pooling window
                    # (window-element major) so the later max-pool is a plain
                    # sublane reduction over a lane-dense tile.
                    s = s.reshape(ci, n, d // 2, 2, h // 2, 2, w // 2, 2)
                    s = s.transpose(0, 3, 5, 7, 1, 2, 4, 6)
                cols.append(s.reshape(ci, n * d * h * w))
    return jnp.concatenate(cols, axis=0).astype(jnp.bfloat16)


def conv3x3x3(x_cf, w, b, *, pool_major, sigmoid=False):
    """3x3x3 same conv (stride 1, padding 1) as one lane-dense matmul per tile.

    Returns y: (Co, M) and, unless `sigmoid`, per-channel (mean, var) batch
    statistics computed over all M positions.
    """
    ci, n, d, h, w_sp = x_cf.shape
    co = w.shape[0]
    k = 27 * ci
    m = n * d * h * w_sp

    patches = _im2col_t(x_cf, pool_major)                          # (K, M) bf16
    w_t = w.transpose(0, 2, 3, 4, 1).reshape(co, k).astype(jnp.bfloat16)
    b2 = b.reshape(co, 1).astype(jnp.float32)

    tm = _pick_tile(m)
    n_tiles = m // tm
    cparams = pltpu.CompilerParams(dimension_semantics=("parallel",),
                                   vmem_limit_bytes=_VMEM_LIMIT)
    in_specs = [pl.BlockSpec((k, tm), lambda t: (0, t)),
                pl.BlockSpec((co, k), lambda t: (0, 0)),
                pl.BlockSpec((co, 1), lambda t: (0, 0))]

    if sigmoid:
        y = pl.pallas_call(
            _conv_sigmoid_kernel,
            out_shape=jax.ShapeDtypeStruct((co, m), jnp.float32),
            grid_spec=pltpu.PrefetchScalarGridSpec(
                num_scalar_prefetch=0, grid=(n_tiles,),
                in_specs=in_specs,
                out_specs=pl.BlockSpec((co, tm), lambda t: (0, t))),
            compiler_params=cparams,
        )(patches, w_t, b2)
        return y, None

    y, part = pl.pallas_call(
        _conv_stats_kernel,
        out_shape=(jax.ShapeDtypeStruct((co, m), jnp.bfloat16),
                   jax.ShapeDtypeStruct((n_tiles, co, 2), jnp.float32)),
        grid_spec=pltpu.PrefetchScalarGridSpec(
            num_scalar_prefetch=0, grid=(n_tiles,),
            in_specs=in_specs,
            out_specs=[pl.BlockSpec((co, tm), lambda t: (0, t)),
                       pl.BlockSpec((1, co, 2), lambda t: (t, 0, 0))]),
        compiler_params=cparams,
    )(patches, w_t, b2)

    tot = jnp.sum(part, axis=0)                                    # (Co, 2)
    mean = tot[:, 0] / m
    var = jnp.maximum(tot[:, 1] / m - mean * mean, 0.0)            # biased var
    return y, (mean, var)


def bn_relu(y, mean, var, gamma, beta, *, window):
    """Fused BatchNorm(batch stats) + ReLU (+ 2x2x2 max-pool when window=8)."""
    co, m = y.shape
    m_out = m // window
    inv = jax.lax.rsqrt(var + _BN_EPS)
    scale = (gamma * inv).astype(jnp.float32).reshape(co, 1, 1)
    shift = (beta - mean * gamma * inv).astype(jnp.float32).reshape(co, 1, 1)
    yw = y.reshape(co, window, m_out)

    tm = _pick_tile(m_out)
    n_tiles = m_out // tm
    return pl.pallas_call(
        _bn_relu_pool_kernel,
        out_shape=jax.ShapeDtypeStruct((co, m_out), jnp.bfloat16),
        grid_spec=pltpu.PrefetchScalarGridSpec(
            num_scalar_prefetch=0, grid=(n_tiles,),
            in_specs=[pl.BlockSpec((co, window, tm), lambda t: (0, 0, t)),
                      pl.BlockSpec((co, 1, 1), lambda t: (0, 0, 0)),
                      pl.BlockSpec((co, 1, 1), lambda t: (0, 0, 0))],
            out_specs=pl.BlockSpec((co, tm), lambda t: (0, t))),
        compiler_params=pltpu.CompilerParams(
            dimension_semantics=("parallel",),
            vmem_limit_bytes=_VMEM_LIMIT),
    )(yw, scale, shift)


def bottleneck_apply(x, w1, b1, w2, b2):
    """Linear -> ReLU -> Linear, fused (tiny at these sizes)."""
    # TODO(synk): tile the flattened dimension for realistic MRI volumes.
    b_, f = x.shape
    return pl.pallas_call(
        _bottleneck_kernel,
        out_shape=jax.ShapeDtypeStruct((b_, f), jnp.float32),
        compiler_params=pltpu.CompilerParams(vmem_limit_bytes=_VMEM_LIMIT),
    )(x, w1, b1.reshape(1, -1), w2, b2.reshape(1, -1))


def encoder_stage(x_cf, p):
    """Conv3d -> BN -> ReLU -> MaxPool3d(2), channel-first layout."""
    co = p["w"].shape[0]
    _, n, d, h, w = x_cf.shape
    y, (mean, var) = conv3x3x3(x_cf, p["w"], p["b"], pool_major=True)
    pooled = bn_relu(y, mean, var, p["gamma"], p["beta"], window=8)
    return pooled.reshape(co, n, d // 2, h // 2, w // 2)


def decoder_stage(z_cf, p, *, last):
    co = p["w"].shape[0]
    _, n, d, h, w = z_cf.shape
    if last:
        y, _ = conv3x3x3(z_cf, p["w"], p["b"], pool_major=False, sigmoid=True)
        return y.reshape(co, n, d, h, w)
    y, (mean, var) = conv3x3x3(z_cf, p["w"], p["b"], pool_major=False)
    act = bn_relu(y, mean, var, p["gamma"], p["beta"], window=1)
    return act.reshape(co, n, d, h, w)


# ----------------------------------------------------------------------------
# Model: parameters + forward
# ----------------------------------------------------------------------------
def init_params(key, input_channels, channels, encoded_shape):
    enc = []
    cin = input_channels
    for cout in channels:
        key, kw, kb = jax.random.split(key, 3)
        enc.append(dict(
            w=0.1 * jax.random.normal(kw, (cout, cin, 3, 3, 3), jnp.float32),
            b=0.01 * jax.random.normal(kb, (cout,), jnp.float32),
            gamma=jnp.ones((cout,), jnp.float32),
            beta=jnp.zeros((cout,), jnp.float32)))
        cin = cout

    c_enc, d, h, w = encoded_shape
    flattened = c_enc * d * h * w
    bott_size = channels[-1]
    key, k1, k2, k3, k4 = jax.random.split(key, 5)
    bott_params = dict(
        w1=0.1 * jax.random.normal(k1, (flattened, bott_size), jnp.float32),
        b1=0.01 * jax.random.normal(k2, (bott_size,), jnp.float32),
        w2=0.1 * jax.random.normal(k3, (bott_size, flattened), jnp.float32),
        b2=0.01 * jax.random.normal(k4, (flattened,), jnp.float32))

    rev = list(reversed(channels))
    dec_io = [(rev[i], rev[i + 1]) for i in range(len(rev) - 1)]
    dec_io.append((rev[-1], input_channels))
    dec = []
    for (ci, co) in dec_io:
        key, kw, kb = jax.random.split(key, 3)
        # TODO(synk): equivalent same-size conv weight for ConvTranspose3d
        # (synthetic init; output_padding dropped, see module docstring).
        dec.append(dict(
            w=0.1 * jax.random.normal(kw, (co, ci, 3, 3, 3), jnp.float32),
            b=0.01 * jax.random.normal(kb, (co,), jnp.float32),
            gamma=jnp.ones((co,), jnp.float32),
            beta=jnp.zeros((co,), jnp.float32)))
    return dict(encoder=enc, bottleneck=bott_params, decoder=dec)


def mri3d_autoencoder_forward(x_ncdhw, params):
    # ---- Encoder: [Conv3d -> BN -> ReLU -> MaxPool] x3, Flatten ----
    x = jnp.transpose(x_ncdhw, (1, 0, 2, 3, 4)).astype(jnp.bfloat16)  # (C,N,D,H,W)
    feats = []
    for p in params["encoder"]:
        x = encoder_stage(x, p)
        feats.append(x)

    c, n, d, h, w = x.shape
    # PyTorch Flatten: (N, C*D*H*W), channel-major within each sample.
    encoded = jnp.transpose(x, (1, 0, 2, 3, 4)).reshape(n, -1).astype(jnp.float32)

    # ---- Bottleneck: Linear -> ReLU -> Linear ----
    bp = params["bottleneck"]
    bott = bottleneck_apply(encoded, bp["w1"], bp["b1"], bp["w2"], bp["b2"])

    # ---- Decoder ----
    z = bott.reshape(n, c, d, h, w)                       # UnFlatten (NCDHW)
    z = jnp.transpose(z, (1, 0, 2, 3, 4)).astype(jnp.bfloat16)
    dec = params["decoder"]
    for i, p in enumerate(dec):
        enc_feat = feats[-(i + 1)]
        tgt = enc_feat.shape[2:]
        # F.interpolate(mode='trilinear', align_corners=False) equivalent.
        z = jax.image.resize(z, z.shape[:2] + tuple(tgt), method="trilinear")
        # TODO(synk): torch.cat skip-connection omitted (inconsistent in the
        # reference; see module docstring).
        z = decoder_stage(z, p, last=(i == len(dec) - 1))

    decoded = jnp.transpose(z, (1, 0, 2, 3, 4))           # -> NCDHW (f32)
    return decoded, bott


# ----------------------------------------------------------------------------
if __name__ == "__main__":
    B = 2
    input_channels = 1
    input_shape = (16, 16, 16)
    channels = (4, 8, 16)

    # compute_output_shape: each conv keeps spatial size, each pool halves it.
    d, h, w = input_shape
    for _ in channels:
        d, h, w = d // 2, h // 2, w // 2
    encoded_shape = (channels[-1], d, h, w)
    flattened_size = channels[-1] * d * h * w

    key = jax.random.PRNGKey(0)
    key, kx = jax.random.split(key)
    x = jax.random.normal(kx, (B, input_channels) + input_shape, jnp.float32)
    params = init_params(key, input_channels, channels, encoded_shape)

    fwd = jax.jit(mri3d_autoencoder_forward)
    decoded, bott = fwd(x, params)
    jax.block_until_ready((decoded, bott))

    # Decoder output spatial size follows the first encoder feature (8^3).
    assert decoded.shape == (B, input_channels, 8, 8, 8), decoded.shape
    assert bott.shape == (B, flattened_size), bott.shape
    assert bool(jnp.all(jnp.isfinite(decoded))) and bool(jnp.all(jnp.isfinite(bott)))

    print("KERNEL_OK")
</pallas_src>

<mosaic_0001>
module attributes {stable_mosaic.version = 11 : i64} {
  func.func @_conv_stats_kernel(%arg0: i32, %arg1: memref<27x1024xbf16, #tpu.memory_space<vmem>>, %arg2: memref<4x27xbf16, #tpu.memory_space<vmem>>, %arg3: memref<4x1xf32, #tpu.memory_space<vmem>>, %arg4: memref<4x1024xbf16, #tpu.memory_space<vmem>>, %arg5: memref<1x4x2xf32, #tpu.memory_space<vmem>>) attributes {dimension_semantics = [#tpu.dimension_semantics<parallel>], iteration_bounds = array<i64: 8>, scalar_prefetch = 0 : i64, scratch_operands = 0 : i64, tpu.core_type = #tpu.core_type<tc>, window_params = [{transform_indices = @transform_0, window_bounds = array<i64: 27, 1024>}, {pipeline_mode = #tpu.pipeline_mode<synchronous>, transform_indices = @transform_1, window_bounds = array<i64: 4, 27>}, {pipeline_mode = #tpu.pipeline_mode<synchronous>, transform_indices = @transform_2, window_bounds = array<i64: 4, 1>}, {transform_indices = @transform_3, window_bounds = array<i64: 4, 1024>}, {transform_indices = @transform_4, window_bounds = array<i64: 1, 4, 2>}]} {
    %c0 = arith.constant 0 : index
    %c0_0 = arith.constant 0 : index
    %0 = vector.load %arg2[%c0, %c0_0] : memref<4x27xbf16, #tpu.memory_space<vmem>>, vector<4x27xbf16>
    %c0_1 = arith.constant 0 : index
    %c0_2 = arith.constant 0 : index
    %1 = vector.load %arg1[%c0_1, %c0_2] : memref<27x1024xbf16, #tpu.memory_space<vmem>>, vector<27x1024xbf16>
    %cst = arith.constant dense<0.000000e+00> : vector<4x1024xf32>
    %2 = tpu.matmul %0, %1, %cst {dimension_numbers = #tpu.dot_dimension_numbers<[1], [0], [0], [1], [0, 0, 1, 1], [], []>} : vector<4x27xbf16>, vector<27x1024xbf16>, vector<4x1024xf32> -> vector<4x1024xf32>
    %c0_3 = arith.constant 0 : index
    %c0_4 = arith.constant 0 : index
    %3 = vector.load %arg3[%c0_3, %c0_4] : memref<4x1xf32, #tpu.memory_space<vmem>>, vector<4x1xf32>
    %4 = vector.broadcast %3 : vector<4x1xf32> to vector<4x1024xf32>
    %5 = arith.addf %2, %4 : vector<4x1024xf32>
    %6 = arith.truncf %5 : vector<4x1024xf32> to vector<4x1024xbf16>
    %c0_5 = arith.constant 0 : index
    %c0_6 = arith.constant 0 : index
    %7 = vector.load %arg4[%c0_5, %c0_6] : memref<4x1024xbf16, #tpu.memory_space<vmem>>, vector<4x1024xbf16>
    tpu.vector_store %arg4[%c0_5, %c0_6], %6 {strides = array<i32>} : memref<4x1024xbf16, #tpu.memory_space<vmem>>, vector<4x1024xbf16>,
    %cst_7 = arith.constant dense<0.000000e+00> : vector<4xf32>
    %8 = vector.multi_reduction <add>, %5, %cst_7 [1] : vector<4x1024xf32> to vector<4xf32>
    %9 = vector.shape_cast %8 : vector<4xf32> to vector<4x1xf32>
    %10 = arith.mulf %5, %5 : vector<4x1024xf32>
    %cst_8 = arith.constant dense<0.000000e+00> : vector<4xf32>
    %11 = vector.multi_reduction <add>, %10, %cst_8 [1] : vector<4x1024xf32> to vector<4xf32>
    %12 = vector.shape_cast %11 : vector<4xf32> to vector<4x1xf32>
    %13 = tpu.concatenate %9, %12 in 1 : vector<4x1xf32>, vector<4x1xf32> -> vector<4x2xf32>
    %c0_9 = arith.constant 0 : index
    %c0_10 = arith.constant 0 : index
    %c0_11 = arith.constant 0 : index
    %14 = vector.load %arg5[%c0_9, %c0_10, %c0_11] : memref<1x4x2xf32, #tpu.memory_space<vmem>>, vector<1x4x2xf32>
    %15 = vector.shape_cast %14 : vector<1x4x2xf32> to vector<4x2xf32>
    %16 = vector.shape_cast %13 : vector<4x2xf32> to vector<1x4x2xf32>
    tpu.vector_store %arg5[%c0_9, %c0_10, %c0_11], %16 {strides = array<i32>} : memref<1x4x2xf32, #tpu.memory_space<vmem>>, vector<1x4x2xf32>,
    return
  }
  func.func @transform_0(%arg0: i32) -> (i32, i32) {
    %c0_i32 = arith.constant 0 : i32
    %c0_i32_0 = arith.constant 0 : i32
    return %c0_i32, %arg0 : i32, i32
  }
  func.func @transform_1(%arg0: i32) -> (i32, i32) {
    %c0_i32 = arith.constant 0 : i32
    %c0_i32_0 = arith.constant 0 : i32
    %c0_i32_1 = arith.constant 0 : i32
    return %c0_i32, %c0_i32_0 : i32, i32
  }
  func.func @transform_2(%arg0: i32) -> (i32, i32) {
    %c0_i32 = arith.constant 0 : i32
    %c0_i32_0 = arith.constant 0 : i32
    %c0_i32_1 = arith.constant 0 : i32
    return %c0_i32, %c0_i32_0 : i32, i32
  }
  func.func @transform_3(%arg0: i32) -> (i32, i32) {
    %c0_i32 = arith.constant 0 : i32
    %c0_i32_0 = arith.constant 0 : i32
    return %c0_i32, %arg0 : i32, i32
  }
  func.func @transform_4(%arg0: i32) -> (i32, i32, i32) {
    %c0_i32 = arith.constant 0 : i32
    %c0_i32_0 = arith.constant 0 : i32
    %c0_i32_1 = arith.constant 0 : i32
    return %arg0, %c0_i32, %c0_i32_0 : i32, i32, i32
  }
}

module attributes {stable_mosaic.version = 11 : i64} {
  func.func @_bn_relu_pool_kernel(%arg0: i32, %arg1: memref<4x8x1024xbf16, #tpu.memory_space<vmem>>, %arg2: memref<4x1x1xf32, #tpu.memory_space<vmem>>, %arg3: memref<4x1x1xf32, #tpu.memory_space<vmem>>, %arg4: memref<4x1024xbf16, #tpu.memory_space<vmem>>) attributes {dimension_semantics = [#tpu.dimension_semantics<parallel>], iteration_bounds = array<i64: 1>, scalar_prefetch = 0 : i64, scratch_operands = 0 : i64, tpu.core_type = #tpu.core_type<tc>, window_params = [{transform_indices = @transform_0, window_bounds = array<i64: 4, 8, 1024>}, {pipeline_mode = #tpu.pipeline_mode<synchronous>, transform_indices = @transform_1, window_bounds = array<i64: 4, 1, 1>}, {pipeline_mode = #tpu.pipeline_mode<synchronous>, transform_indices = @transform_2, window_bounds = array<i64: 4, 1, 1>}, {transform_indices = @transform_3, window_bounds = array<i64: 4, 1024>}]} {
    %c0 = arith.constant 0 : index
    %c0_0 = arith.constant 0 : index
    %c0_1 = arith.constant 0 : index
    %0 = vector.load %arg1[%c0, %c0_0, %c0_1] : memref<4x8x1024xbf16, #tpu.memory_space<vmem>>, vector<4x8x1024xbf16>
    %1 = arith.extf %0 : vector<4x8x1024xbf16> to vector<4x8x1024xf32>
    %c0_2 = arith.constant 0 : index
    %c0_3 = arith.constant 0 : index
    %c0_4 = arith.constant 0 : index
    %2 = vector.load %arg2[%c0_2, %c0_3, %c0_4] : memref<4x1x1xf32, #tpu.memory_space<vmem>>, vector<4x1x1xf32>
    %3 = vector.broadcast %2 : vector<4x1x1xf32> to vector<4x8x1024xf32>
    %4 = arith.mulf %1, %3 : vector<4x8x1024xf32>
    %c0_5 = arith.constant 0 : index
    %c0_6 = arith.constant 0 : index
    %c0_7 = arith.constant 0 : index
    %5 = vector.load %arg3[%c0_5, %c0_6, %c0_7] : memref<4x1x1xf32, #tpu.memory_space<vmem>>, vector<4x1x1xf32>
    %6 = vector.broadcast %5 : vector<4x1x1xf32> to vector<4x8x1024xf32>
    %7 = arith.addf %4, %6 : vector<4x8x1024xf32>
    %cst = arith.constant 0.000000e+00 : f32
    %8 = vector.broadcast %cst : f32 to vector<4x8x1024xf32>
    %9 = arith.maximumf %7, %8 : vector<4x8x1024xf32>
    %cst_8 = arith.constant dense<0xFF800000> : vector<4x1024xf32>
    %10 = vector.multi_reduction <maximumf>, %9, %cst_8 [1] : vector<4x8x1024xf32> to vector<4x1024xf32>
    %11 = arith.truncf %10 : vector<4x1024xf32> to vector<4x1024xbf16>
    %c0_9 = arith.constant 0 : index
    %c0_10 = arith.constant 0 : index
    %12 = vector.load %arg4[%c0_9, %c0_10] : memref<4x1024xbf16, #tpu.memory_space<vmem>>, vector<4x1024xbf16>
    tpu.vector_store %arg4[%c0_9, %c0_10], %11 {strides = array<i32>} : memref<4x1024xbf16, #tpu.memory_space<vmem>>, vector<4x1024xbf16>,
    return
  }
  func.func @transform_0(%arg0: i32) -> (i32, i32, i32) {
    %c0_i32 = arith.constant 0 : i32
    %c0_i32_0 = arith.constant 0 : i32
    %c0_i32_1 = arith.constant 0 : i32
    return %c0_i32, %c0_i32_0, %arg0 : i32, i32, i32
  }
  func.func @transform_1(%arg0: i32) -> (i32, i32, i32) {
    %c0_i32 = arith.constant 0 : i32
    %c0_i32_0 = arith.constant 0 : i32
    %c0_i32_1 = arith.constant 0 : i32
    %c0_i32_2 = arith.constant 0 : i32
    return %c0_i32, %c0_i32_0, %c0_i32_1 : i32, i32, i32
  }
  func.func @transform_2(%arg0: i32) -> (i32, i32, i32) {
    %c0_i32 = arith.constant 0 : i32
    %c0_i32_0 = arith.constant 0 : i32
    %c0_i32_1 = arith.constant 0 : i32
    %c0_i32_2 = arith.constant 0 : i32
    return %c0_i32, %c0_i32_0, %c0_i32_1 : i32, i32, i32
  }
  func.func @transform_3(%arg0: i32) -> (i32, i32) {
    %c0_i32 = arith.constant 0 : i32
    %c0_i32_0 = arith.constant 0 : i32
    return %c0_i32, %arg0 : i32, i32
  }
}

module attributes {stable_mosaic.version = 11 : i64} {
  func.func @_conv_stats_kernel(%arg0: i32, %arg1: memref<108x1024xbf16, #tpu.memory_space<vmem>>, %arg2: memref<8x108xbf16, #tpu.memory_space<vmem>>, %arg3: memref<8x1xf32, #tpu.memory_space<vmem>>, %arg4: memref<8x1024xbf16, #tpu.memory_space<vmem>>, %arg5: memref<1x8x2xf32, #tpu.memory_space<vmem>>) attributes {dimension_semantics = [#tpu.dimension_semantics<parallel>], iteration_bounds = array<i64: 1>, scalar_prefetch = 0 : i64, scratch_operands = 0 : i64, tpu.core_type = #tpu.core_type<tc>, window_params = [{transform_indices = @transform_0, window_bounds = array<i64: 108, 1024>}, {pipeline_mode = #tpu.pipeline_mode<synchronous>, transform_indices = @transform_1, window_bounds = array<i64: 8, 108>}, {pipeline_mode = #tpu.pipeline_mode<synchronous>, transform_indices = @transform_2, window_bounds = array<i64: 8, 1>}, {transform_indices = @transform_3, window_bounds = array<i64: 8, 1024>}, {transform_indices = @transform_4, window_bounds = array<i64: 1, 8, 2>}]} {
    %c0 = arith.constant 0 : index
    %c0_0 = arith.constant 0 : index
    %0 = vector.load %arg2[%c0, %c0_0] : memref<8x108xbf16, #tpu.memory_space<vmem>>, vector<8x108xbf16>
    %c0_1 = arith.constant 0 : index
    %c0_2 = arith.constant 0 : index
    %1 = vector.load %arg1[%c0_1, %c0_2] : memref<108x1024xbf16, #tpu.memory_space<vmem>>, vector<108x1024xbf16>
    %cst = arith.constant dense<0.000000e+00> : vector<8x1024xf32>
    %2 = tpu.matmul %0, %1, %cst {dimension_numbers = #tpu.dot_dimension_numbers<[1], [0], [0], [1], [0, 0, 1, 1], [], []>} : vector<8x108xbf16>, vector<108x1024xbf16>, vector<8x1024xf32> -> vector<8x1024xf32>
    %c0_3 = arith.constant 0 : index
    %c0_4 = arith.constant 0 : index
    %3 = vector.load %arg3[%c0_3, %c0_4] : memref<8x1xf32, #tpu.memory_space<vmem>>, vector<8x1xf32>
    %4 = vector.broadcast %3 : vector<8x1xf32> to vector<8x1024xf32>
    %5 = arith.addf %2, %4 : vector<8x1024xf32>
    %6 = arith.truncf %5 : vector<8x1024xf32> to vector<8x1024xbf16>
    %c0_5 = arith.constant 0 : index
    %c0_6 = arith.constant 0 : index
    %7 = vector.load %arg4[%c0_5, %c0_6] : memref<8x1024xbf16, #tpu.memory_space<vmem>>, vector<8x1024xbf16>
    tpu.vector_store %arg4[%c0_5, %c0_6], %6 {strides = array<i32>} : memref<8x1024xbf16, #tpu.memory_space<vmem>>, vector<8x1024xbf16>,
    %cst_7 = arith.constant dense<0.000000e+00> : vector<8xf32>
    %8 = vector.multi_reduction <add>, %5, %cst_7 [1] : vector<8x1024xf32> to vector<8xf32>
    %9 = vector.shape_cast %8 : vector<8xf32> to vector<8x1xf32>
    %10 = arith.mulf %5, %5 : vector<8x1024xf32>
    %cst_8 = arith.constant dense<0.000000e+00> : vector<8xf32>
    %11 = vector.multi_reduction <add>, %10, %cst_8 [1] : vector<8x1024xf32> to vector<8xf32>
    %12 = vector.shape_cast %11 : vector<8xf32> to vector<8x1xf32>
    %13 = tpu.concatenate %9, %12 in 1 : vector<8x1xf32>, vector<8x1xf32> -> vector<8x2xf32>
    %c0_9 = arith.constant 0 : index
    %c0_10 = arith.constant 0 : index
    %c0_11 = arith.constant 0 : index
    %14 = vector.load %arg5[%c0_9, %c0_10, %c0_11] : memref<1x8x2xf32, #tpu.memory_space<vmem>>, vector<1x8x2xf32>
    %15 = vector.shape_cast %14 : vector<1x8x2xf32> to vector<8x2xf32>
    %16 = vector.shape_cast %13 : vector<8x2xf32> to vector<1x8x2xf32>
    tpu.vector_store %arg5[%c0_9, %c0_10, %c0_11], %16 {strides = array<i32>} : memref<1x8x2xf32, #tpu.memory_space<vmem>>, vector<1x8x2xf32>,
    return
  }
  func.func @transform_0(%arg0: i32) -> (i32, i32) {
    %c0_i32 = arith.constant 0 : i32
    %c0_i32_0 = arith.constant 0 : i32
    return %c0_i32, %arg0 : i32, i32
  }
  func.func @transform_1(%arg0: i32) -> (i32, i32) {
    %c0_i32 = arith.constant 0 : i32
    %c0_i32_0 = arith.constant 0 : i32
    %c0_i32_1 = arith.constant 0 : i32
    return %c0_i32, %c0_i32_0 : i32, i32
  }
  func.func @transform_2(%arg0: i32) -> (i32, i32) {
    %c0_i32 = arith.constant 0 : i32
    %c0_i32_0 = arith.constant 0 : i32
    %c0_i32_1 = arith.constant 0 : i32
    return %c0_i32, %c0_i32_0 : i32, i32
  }
  func.func @transform_3(%arg0: i32) -> (i32, i32) {
    %c0_i32 = arith.constant 0 : i32
    %c0_i32_0 = arith.constant 0 : i32
    return %c0_i32, %arg0 : i32, i32
  }
  func.func @transform_4(%arg0: i32) -> (i32, i32, i32) {
    %c0_i32 = arith.constant 0 : i32
    %c0_i32_0 = arith.constant 0 : i32
    %c0_i32_1 = arith.constant 0 : i32
    return %arg0, %c0_i32, %c0_i32_0 : i32, i32, i32
  }
}

module attributes {stable_mosaic.version = 11 : i64} {
  func.func @_bn_relu_pool_kernel(%arg0: i32, %arg1: memref<8x8x128xbf16, #tpu.memory_space<vmem>>, %arg2: memref<8x1x1xf32, #tpu.memory_space<vmem>>, %arg3: memref<8x1x1xf32, #tpu.memory_space<vmem>>, %arg4: memref<8x128xbf16, #tpu.memory_space<vmem>>) attributes {dimension_semantics = [#tpu.dimension_semantics<parallel>], iteration_bounds = array<i64: 1>, scalar_prefetch = 0 : i64, scratch_operands = 0 : i64, tpu.core_type = #tpu.core_type<tc>, window_params = [{transform_indices = @transform_0, window_bounds = array<i64: 8, 8, 128>}, {pipeline_mode = #tpu.pipeline_mode<synchronous>, transform_indices = @transform_1, window_bounds = array<i64: 8, 1, 1>}, {pipeline_mode = #tpu.pipeline_mode<synchronous>, transform_indices = @transform_2, window_bounds = array<i64: 8, 1, 1>}, {transform_indices = @transform_3, window_bounds = array<i64: 8, 128>}]} {
    %c0 = arith.constant 0 : index
    %c0_0 = arith.constant 0 : index
    %c0_1 = arith.constant 0 : index
    %0 = vector.load %arg1[%c0, %c0_0, %c0_1] : memref<8x8x128xbf16, #tpu.memory_space<vmem>>, vector<8x8x128xbf16>
    %1 = arith.extf %0 : vector<8x8x128xbf16> to vector<8x8x128xf32>
    %c0_2 = arith.constant 0 : index
    %c0_3 = arith.constant 0 : index
    %c0_4 = arith.constant 0 : index
    %2 = vector.load %arg2[%c0_2, %c0_3, %c0_4] : memref<8x1x1xf32, #tpu.memory_space<vmem>>, vector<8x1x1xf32>
    %3 = vector.broadcast %2 : vector<8x1x1xf32> to vector<8x8x128xf32>
    %4 = arith.mulf %1, %3 : vector<8x8x128xf32>
    %c0_5 = arith.constant 0 : index
    %c0_6 = arith.constant 0 : index
    %c0_7 = arith.constant 0 : index
    %5 = vector.load %arg3[%c0_5, %c0_6, %c0_7] : memref<8x1x1xf32, #tpu.memory_space<vmem>>, vector<8x1x1xf32>
    %6 = vector.broadcast %5 : vector<8x1x1xf32> to vector<8x8x128xf32>
    %7 = arith.addf %4, %6 : vector<8x8x128xf32>
    %cst = arith.constant 0.000000e+00 : f32
    %8 = vector.broadcast %cst : f32 to vector<8x8x128xf32>
    %9 = arith.maximumf %7, %8 : vector<8x8x128xf32>
    %cst_8 = arith.constant dense<0xFF800000> : vector<8x128xf32>
    %10 = vector.multi_reduction <maximumf>, %9, %cst_8 [1] : vector<8x8x128xf32> to vector<8x128xf32>
    %11 = arith.truncf %10 : vector<8x128xf32> to vector<8x128xbf16>
    %c0_9 = arith.constant 0 : index
    %c0_10 = arith.constant 0 : index
    %12 = vector.load %arg4[%c0_9, %c0_10] : memref<8x128xbf16, #tpu.memory_space<vmem>>, vector<8x128xbf16>
    tpu.vector_store %arg4[%c0_9, %c0_10], %11 {strides = array<i32>} : memref<8x128xbf16, #tpu.memory_space<vmem>>, vector<8x128xbf16>,
    return
  }
  func.func @transform_0(%arg0: i32) -> (i32, i32, i32) {
    %c0_i32 = arith.constant 0 : i32
    %c0_i32_0 = arith.constant 0 : i32
    %c0_i32_1 = arith.constant 0 : i32
    return %c0_i32, %c0_i32_0, %arg0 : i32, i32, i32
  }
  func.func @transform_1(%arg0: i32) -> (i32, i32, i32) {
    %c0_i32 = arith.constant 0 : i32
    %c0_i32_0 = arith.constant 0 : i32
    %c0_i32_1 = arith.constant 0 : i32
    %c0_i32_2 = arith.constant 0 : i32
    return %c0_i32, %c0_i32_0, %c0_i32_1 : i32, i32, i32
  }
  func.func @transform_2(%arg0: i32) -> (i32, i32, i32) {
    %c0_i32 = arith.constant 0 : i32
    %c0_i32_0 = arith.constant 0 : i32
    %c0_i32_1 = arith.constant 0 : i32
    %c0_i32_2 = arith.constant 0 : i32
    return %c0_i32, %c0_i32_0, %c0_i32_1 : i32, i32, i32
  }
  func.func @transform_3(%arg0: i32) -> (i32, i32) {
    %c0_i32 = arith.constant 0 : i32
    %c0_i32_0 = arith.constant 0 : i32
    return %c0_i32, %arg0 : i32, i32
  }
}

module attributes {stable_mosaic.version = 11 : i64} {
  func.func @_conv_stats_kernel(%arg0: i32, %arg1: memref<216x128xbf16, #tpu.memory_space<vmem>>, %arg2: memref<16x216xbf16, #tpu.memory_space<vmem>>, %arg3: memref<16x1xf32, #tpu.memory_space<vmem>>, %arg4: memref<16x128xbf16, #tpu.memory_space<vmem>>, %arg5: memref<1x16x2xf32, #tpu.memory_space<vmem>>) attributes {dimension_semantics = [#tpu.dimension_semantics<parallel>], iteration_bounds = array<i64: 1>, scalar_prefetch = 0 : i64, scratch_operands = 0 : i64, tpu.core_type = #tpu.core_type<tc>, window_params = [{transform_indices = @transform_0, window_bounds = array<i64: 216, 128>}, {pipeline_mode = #tpu.pipeline_mode<synchronous>, transform_indices = @transform_1, window_bounds = array<i64: 16, 216>}, {pipeline_mode = #tpu.pipeline_mode<synchronous>, transform_indices = @transform_2, window_bounds = array<i64: 16, 1>}, {transform_indices = @transform_3, window_bounds = array<i64: 16, 128>}, {transform_indices = @transform_4, window_bounds = array<i64: 1, 16, 2>}]} {
    %c0 = arith.constant 0 : index
    %c0_0 = arith.constant 0 : index
    %0 = vector.load %arg2[%c0, %c0_0] : memref<16x216xbf16, #tpu.memory_space<vmem>>, vector<16x216xbf16>
    %c0_1 = arith.constant 0 : index
    %c0_2 = arith.constant 0 : index
    %1 = vector.load %arg1[%c0_1, %c0_2] : memref<216x128xbf16, #tpu.memory_space<vmem>>, vector<216x128xbf16>
    %cst = arith.constant dense<0.000000e+00> : vector<16x128xf32>
    %2 = tpu.matmul %0, %1, %cst {dimension_numbers = #tpu.dot_dimension_numbers<[1], [0], [0], [1], [0, 0, 1, 1], [], []>} : vector<16x216xbf16>, vector<216x128xbf16>, vector<16x128xf32> -> vector<16x128xf32>
    %c0_3 = arith.constant 0 : index
    %c0_4 = arith.constant 0 : index
    %3 = vector.load %arg3[%c0_3, %c0_4] : memref<16x1xf32, #tpu.memory_space<vmem>>, vector<16x1xf32>
    %4 = vector.broadcast %3 : vector<16x1xf32> to vector<16x128xf32>
    %5 = arith.addf %2, %4 : vector<16x128xf32>
    %6 = arith.truncf %5 : vector<16x128xf32> to vector<16x128xbf16>
    %c0_5 = arith.constant 0 : index
    %c0_6 = arith.constant 0 : index
    %7 = vector.load %arg4[%c0_5, %c0_6] : memref<16x128xbf16, #tpu.memory_space<vmem>>, vector<16x128xbf16>
    tpu.vector_store %arg4[%c0_5, %c0_6], %6 {strides = array<i32>} : memref<16x128xbf16, #tpu.memory_space<vmem>>, vector<16x128xbf16>,
    %cst_7 = arith.constant dense<0.000000e+00> : vector<16xf32>
    %8 = vector.multi_reduction <add>, %5, %cst_7 [1] : vector<16x128xf32> to vector<16xf32>
    %9 = vector.shape_cast %8 : vector<16xf32> to vector<16x1xf32>
    %10 = arith.mulf %5, %5 : vector<16x128xf32>
    %cst_8 = arith.constant dense<0.000000e+00> : vector<16xf32>
    %11 = vector.multi_reduction <add>, %10, %cst_8 [1] : vector<16x128xf32> to vector<16xf32>
    %12 = vector.shape_cast %11 : vector<16xf32> to vector<16x1xf32>
    %13 = tpu.concatenate %9, %12 in 1 : vector<16x1xf32>, vector<16x1xf32> -> vector<16x2xf32>
    %c0_9 = arith.constant 0 : index
    %c0_10 = arith.constant 0 : index
    %c0_11 = arith.constant 0 : index
    %14 = vector.load %arg5[%c0_9, %c0_10, %c0_11] : memref<1x16x2xf32, #tpu.memory_space<vmem>>, vector<1x16x2xf32>
    %15 = vector.shape_cast %14 : vector<1x16x2xf32> to vector<16x2xf32>
    %16 = vector.shape_cast %13 : vector<16x2xf32> to vector<1x16x2xf32>
    tpu.vector_store %arg5[%c0_9, %c0_10, %c0_11], %16 {strides = array<i32>} : memref<1x16x2xf32, #tpu.memory_space<vmem>>, vector<1x16x2xf32>,
    return
  }
  func.func @transform_0(%arg0: i32) -> (i32, i32) {
    %c0_i32 = arith.constant 0 : i32
    %c0_i32_0 = arith.constant 0 : i32
    return %c0_i32, %arg0 : i32, i32
  }
  func.func @transform_1(%arg0: i32) -> (i32, i32) {
    %c0_i32 = arith.constant 0 : i32
    %c0_i32_0 = arith.constant 0 : i32
    %c0_i32_1 = arith.constant 0 : i32
    return %c0_i32, %c0_i32_0 : i32, i32
  }
  func.func @transform_2(%arg0: i32) -> (i32, i32) {
    %c0_i32 = arith.constant 0 : i32
    %c0_i32_0 = arith.constant 0 : i32
    %c0_i32_1 = arith.constant 0 : i32
    return %c0_i32, %c0_i32_0 : i32, i32
  }
  func.func @transform_3(%arg0: i32) -> (i32, i32) {
    %c0_i32 = arith.constant 0 : i32
    %c0_i32_0 = arith.constant 0 : i32
    return %c0_i32, %arg0 : i32, i32
  }
  func.func @transform_4(%arg0: i32) -> (i32, i32, i32) {
    %c0_i32 = arith.constant 0 : i32
    %c0_i32_0 = arith.constant 0 : i32
    %c0_i32_1 = arith.constant 0 : i32
    return %arg0, %c0_i32, %c0_i32_0 : i32, i32, i32
  }
}

module attributes {stable_mosaic.version = 11 : i64} {
  func.func @_bn_relu_pool_kernel(%arg0: i32, %arg1: memref<16x8x16xbf16, #tpu.memory_space<vmem>>, %arg2: memref<16x1x1xf32, #tpu.memory_space<vmem>>, %arg3: memref<16x1x1xf32, #tpu.memory_space<vmem>>, %arg4: memref<16x16xbf16, #tpu.memory_space<vmem>>) attributes {dimension_semantics = [#tpu.dimension_semantics<parallel>], iteration_bounds = array<i64: 1>, scalar_prefetch = 0 : i64, scratch_operands = 0 : i64, tpu.core_type = #tpu.core_type<tc>, window_params = [{transform_indices = @transform_0, window_bounds = array<i64: 16, 8, 16>}, {pipeline_mode = #tpu.pipeline_mode<synchronous>, transform_indices = @transform_1, window_bounds = array<i64: 16, 1, 1>}, {pipeline_mode = #tpu.pipeline_mode<synchronous>, transform_indices = @transform_2, window_bounds = array<i64: 16, 1, 1>}, {transform_indices = @transform_3, window_bounds = array<i64: 16, 16>}]} {
    %c0 = arith.constant 0 : index
    %c0_0 = arith.constant 0 : index
    %c0_1 = arith.constant 0 : index
    %0 = vector.load %arg1[%c0, %c0_0, %c0_1] : memref<16x8x16xbf16, #tpu.memory_space<vmem>>, vector<16x8x16xbf16>
    %1 = arith.extf %0 : vector<16x8x16xbf16> to vector<16x8x16xf32>
    %c0_2 = arith.constant 0 : index
    %c0_3 = arith.constant 0 : index
    %c0_4 = arith.constant 0 : index
    %2 = vector.load %arg2[%c0_2, %c0_3, %c0_4] : memref<16x1x1xf32, #tpu.memory_space<vmem>>, vector<16x1x1xf32>
    %3 = vector.broadcast %2 : vector<16x1x1xf32> to vector<16x8x16xf32>
    %4 = arith.mulf %1, %3 : vector<16x8x16xf32>
    %c0_5 = arith.constant 0 : index
    %c0_6 = arith.constant 0 : index
    %c0_7 = arith.constant 0 : index
    %5 = vector.load %arg3[%c0_5, %c0_6, %c0_7] : memref<16x1x1xf32, #tpu.memory_space<vmem>>, vector<16x1x1xf32>
    %6 = vector.broadcast %5 : vector<16x1x1xf32> to vector<16x8x16xf32>
    %7 = arith.addf %4, %6 : vector<16x8x16xf32>
    %cst = arith.constant 0.000000e+00 : f32
    %8 = vector.broadcast %cst : f32 to vector<16x8x16xf32>
    %9 = arith.maximumf %7, %8 : vector<16x8x16xf32>
    %cst_8 = arith.constant dense<0xFF800000> : vector<16x16xf32>
    %10 = vector.multi_reduction <maximumf>, %9, %cst_8 [1] : vector<16x8x16xf32> to vector<16x16xf32>
    %11 = arith.truncf %10 : vector<16x16xf32> to vector<16x16xbf16>
    %c0_9 = arith.constant 0 : index
    %c0_10 = arith.constant 0 : index
    %12 = vector.load %arg4[%c0_9, %c0_10] : memref<16x16xbf16, #tpu.memory_space<vmem>>, vector<16x16xbf16>
    tpu.vector_store %arg4[%c0_9, %c0_10], %11 {strides = array<i32>} : memref<16x16xbf16, #tpu.memory_space<vmem>>, vector<16x16xbf16>,
    return
  }
  func.func @transform_0(%arg0: i32) -> (i32, i32, i32) {
    %c0_i32 = arith.constant 0 : i32
    %c0_i32_0 = arith.constant 0 : i32
    %c0_i32_1 = arith.constant 0 : i32
    return %c0_i32, %c0_i32_0, %arg0 : i32, i32, i32
  }
  func.func @transform_1(%arg0: i32) -> (i32, i32, i32) {
    %c0_i32 = arith.constant 0 : i32
    %c0_i32_0 = arith.constant 0 : i32
    %c0_i32_1 = arith.constant 0 : i32
    %c0_i32_2 = arith.constant 0 : i32
    return %c0_i32, %c0_i32_0, %c0_i32_1 : i32, i32, i32
  }
  func.func @transform_2(%arg0: i32) -> (i32, i32, i32) {
    %c0_i32 = arith.constant 0 : i32
    %c0_i32_0 = arith.constant 0 : i32
    %c0_i32_1 = arith.constant 0 : i32
    %c0_i32_2 = arith.constant 0 : i32
    return %c0_i32, %c0_i32_0, %c0_i32_1 : i32, i32, i32
  }
  func.func @transform_3(%arg0: i32) -> (i32, i32) {
    %c0_i32 = arith.constant 0 : i32
    %c0_i32_0 = arith.constant 0 : i32
    return %c0_i32, %arg0 : i32, i32
  }
}

module attributes {stable_mosaic.version = 11 : i64} {
  func.func @_bottleneck_kernel(%arg0: memref<2x128xf32, #tpu.memory_space<vmem>>, %arg1: memref<128x16xf32, #tpu.memory_space<vmem>>, %arg2: memref<1x16xf32, #tpu.memory_space<vmem>>, %arg3: memref<16x128xf32, #tpu.memory_space<vmem>>, %arg4: memref<1x128xf32, #tpu.memory_space<vmem>>, %arg5: memref<2x128xf32, #tpu.memory_space<vmem>>) attributes {dimension_semantics = [], scalar_prefetch = 0 : i64, scratch_operands = 0 : i64, tpu.core_type = #tpu.core_type<tc>} {
    %c0 = arith.constant 0 : index
    %c0_0 = arith.constant 0 : index
    %0 = vector.load %arg0[%c0, %c0_0] : memref<2x128xf32, #tpu.memory_space<vmem>>, vector<2x128xf32>
    %c0_1 = arith.constant 0 : index
    %c0_2 = arith.constant 0 : index
    %1 = vector.load %arg1[%c0_1, %c0_2] : memref<128x16xf32, #tpu.memory_space<vmem>>, vector<128x16xf32>
    %cst = arith.constant dense<0.000000e+00> : vector<2x16xf32>
    %2 = tpu.matmul %0, %1, %cst {dimension_numbers = #tpu.dot_dimension_numbers<[1], [0], [0], [1], [0, 0, 1, 1], [], []>} : vector<2x128xf32>, vector<128x16xf32>, vector<2x16xf32> -> vector<2x16xf32>
    %c0_3 = arith.constant 0 : index
    %c0_4 = arith.constant 0 : index
    %3 = vector.load %arg2[%c0_3, %c0_4] : memref<1x16xf32, #tpu.memory_space<vmem>>, vector<1x16xf32>
    %4 = vector.broadcast %3 : vector<1x16xf32> to vector<2x16xf32>
    %5 = arith.addf %2, %4 : vector<2x16xf32>
    %cst_5 = arith.constant 0.000000e+00 : f32
    %6 = vector.broadcast %cst_5 : f32 to vector<2x16xf32>
    %7 = arith.maximumf %5, %6 : vector<2x16xf32>
    %c0_6 = arith.constant 0 : index
    %c0_7 = arith.constant 0 : index
    %8 = vector.load %arg3[%c0_6, %c0_7] : memref<16x128xf32, #tpu.memory_space<vmem>>, vector<16x128xf32>
    %cst_8 = arith.constant dense<0.000000e+00> : vector<2x128xf32>
    %9 = tpu.matmul %7, %8, %cst_8 {dimension_numbers = #tpu.dot_dimension_numbers<[1], [0], [0], [1], [0, 0, 1, 1], [], []>} : vector<2x16xf32>, vector<16x128xf32>, vector<2x128xf32> -> vector<2x128xf32>
    %c0_9 = arith.constant 0 : index
    %c0_10 = arith.constant 0 : index
    %10 = vector.load %arg4[%c0_9, %c0_10] : memref<1x128xf32, #tpu.memory_space<vmem>>, vector<1x128xf32>
    %11 = vector.broadcast %10 : vector<1x128xf32> to vector<2x128xf32>
    %12 = arith.addf %9, %11 : vector<2x128xf32>
    %c0_11 = arith.constant 0 : index
    %c0_12 = arith.constant 0 : index
    %13 = vector.load %arg5[%c0_11, %c0_12] : memref<2x128xf32, #tpu.memory_space<vmem>>, vector<2x128xf32>
    tpu.vector_store %arg5[%c0_11, %c0_12], %12 {strides = array<i32>} : memref<2x128xf32, #tpu.memory_space<vmem>>, vector<2x128xf32>,
    return
  }
}

module attributes {stable_mosaic.version = 11 : i64} {
  func.func @_conv_stats_kernel(%arg0: i32, %arg1: memref<432x16xbf16, #tpu.memory_space<vmem>>, %arg2: memref<8x432xbf16, #tpu.memory_space<vmem>>, %arg3: memref<8x1xf32, #tpu.memory_space<vmem>>, %arg4: memref<8x16xbf16, #tpu.memory_space<vmem>>, %arg5: memref<1x8x2xf32, #tpu.memory_space<vmem>>) attributes {dimension_semantics = [#tpu.dimension_semantics<parallel>], iteration_bounds = array<i64: 1>, scalar_prefetch = 0 : i64, scratch_operands = 0 : i64, tpu.core_type = #tpu.core_type<tc>, window_params = [{transform_indices = @transform_0, window_bounds = array<i64: 432, 16>}, {pipeline_mode = #tpu.pipeline_mode<synchronous>, transform_indices = @transform_1, window_bounds = array<i64: 8, 432>}, {pipeline_mode = #tpu.pipeline_mode<synchronous>, transform_indices = @transform_2, window_bounds = array<i64: 8, 1>}, {transform_indices = @transform_3, window_bounds = array<i64: 8, 16>}, {transform_indices = @transform_4, window_bounds = array<i64: 1, 8, 2>}]} {
    %c0 = arith.constant 0 : index
    %c0_0 = arith.constant 0 : index
    %0 = vector.load %arg2[%c0, %c0_0] : memref<8x432xbf16, #tpu.memory_space<vmem>>, vector<8x432xbf16>
    %c0_1 = arith.constant 0 : index
    %c0_2 = arith.constant 0 : index
    %1 = vector.load %arg1[%c0_1, %c0_2] : memref<432x16xbf16, #tpu.memory_space<vmem>>, vector<432x16xbf16>
    %cst = arith.constant dense<0.000000e+00> : vector<8x16xf32>
    %2 = tpu.matmul %0, %1, %cst {dimension_numbers = #tpu.dot_dimension_numbers<[1], [0], [0], [1], [0, 0, 1, 1], [], []>} : vector<8x432xbf16>, vector<432x16xbf16>, vector<8x16xf32> -> vector<8x16xf32>
    %c0_3 = arith.constant 0 : index
    %c0_4 = arith.constant 0 : index
    %3 = vector.load %arg3[%c0_3, %c0_4] : memref<8x1xf32, #tpu.memory_space<vmem>>, vector<8x1xf32>
    %4 = vector.broadcast %3 : vector<8x1xf32> to vector<8x16xf32>
    %5 = arith.addf %2, %4 : vector<8x16xf32>
    %6 = arith.truncf %5 : vector<8x16xf32> to vector<8x16xbf16>
    %c0_5 = arith.constant 0 : index
    %c0_6 = arith.constant 0 : index
    %7 = vector.load %arg4[%c0_5, %c0_6] : memref<8x16xbf16, #tpu.memory_space<vmem>>, vector<8x16xbf16>
    tpu.vector_store %arg4[%c0_5, %c0_6], %6 {strides = array<i32>} : memref<8x16xbf16, #tpu.memory_space<vmem>>, vector<8x16xbf16>,
    %cst_7 = arith.constant dense<0.000000e+00> : vector<8xf32>
    %8 = vector.multi_reduction <add>, %5, %cst_7 [1] : vector<8x16xf32> to vector<8xf32>
    %9 = vector.shape_cast %8 : vector<8xf32> to vector<8x1xf32>
    %10 = arith.mulf %5, %5 : vector<8x16xf32>
    %cst_8 = arith.constant dense<0.000000e+00> : vector<8xf32>
    %11 = vector.multi_reduction <add>, %10, %cst_8 [1] : vector<8x16xf32> to vector<8xf32>
    %12 = vector.shape_cast %11 : vector<8xf32> to vector<8x1xf32>
    %13 = tpu.concatenate %9, %12 in 1 : vector<8x1xf32>, vector<8x1xf32> -> vector<8x2xf32>
    %c0_9 = arith.constant 0 : index
    %c0_10 = arith.constant 0 : index
    %c0_11 = arith.constant 0 : index
    %14 = vector.load %arg5[%c0_9, %c0_10, %c0_11] : memref<1x8x2xf32, #tpu.memory_space<vmem>>, vector<1x8x2xf32>
    %15 = vector.shape_cast %14 : vector<1x8x2xf32> to vector<8x2xf32>
    %16 = vector.shape_cast %13 : vector<8x2xf32> to vector<1x8x2xf32>
    tpu.vector_store %arg5[%c0_9, %c0_10, %c0_11], %16 {strides = array<i32>} : memref<1x8x2xf32, #tpu.memory_space<vmem>>, vector<1x8x2xf32>,
    return
  }
  func.func @transform_0(%arg0: i32) -> (i32, i32) {
    %c0_i32 = arith.constant 0 : i32
    %c0_i32_0 = arith.constant 0 : i32
    return %c0_i32, %arg0 : i32, i32
  }
  func.func @transform_1(%arg0: i32) -> (i32, i32) {
    %c0_i32 = arith.constant 0 : i32
    %c0_i32_0 = arith.constant 0 : i32
    %c0_i32_1 = arith.constant 0 : i32
    return %c0_i32, %c0_i32_0 : i32, i32
  }
  func.func @transform_2(%arg0: i32) -> (i32, i32) {
    %c0_i32 = arith.constant 0 : i32
    %c0_i32_0 = arith.constant 0 : i32
    %c0_i32_1 = arith.constant 0 : i32
    return %c0_i32, %c0_i32_0 : i32, i32
  }
  func.func @transform_3(%arg0: i32) -> (i32, i32) {
    %c0_i32 = arith.constant 0 : i32
    %c0_i32_0 = arith.constant 0 : i32
    return %c0_i32, %arg0 : i32, i32
  }
  func.func @transform_4(%arg0: i32) -> (i32, i32, i32) {
    %c0_i32 = arith.constant 0 : i32
    %c0_i32_0 = arith.constant 0 : i32
    %c0_i32_1 = arith.constant 0 : i32
    return %arg0, %c0_i32, %c0_i32_0 : i32, i32, i32
  }
}

module attributes {stable_mosaic.version = 11 : i64} {
  func.func @_bn_relu_pool_kernel(%arg0: i32, %arg1: memref<8x1x16xbf16, #tpu.memory_space<vmem>>, %arg2: memref<8x1x1xf32, #tpu.memory_space<vmem>>, %arg3: memref<8x1x1xf32, #tpu.memory_space<vmem>>, %arg4: memref<8x16xbf16, #tpu.memory_space<vmem>>) attributes {dimension_semantics = [#tpu.dimension_semantics<parallel>], iteration_bounds = array<i64: 1>, scalar_prefetch = 0 : i64, scratch_operands = 0 : i64, tpu.core_type = #tpu.core_type<tc>, window_params = [{transform_indices = @transform_0, window_bounds = array<i64: 8, 1, 16>}, {pipeline_mode = #tpu.pipeline_mode<synchronous>, transform_indices = @transform_1, window_bounds = array<i64: 8, 1, 1>}, {pipeline_mode = #tpu.pipeline_mode<synchronous>, transform_indices = @transform_2, window_bounds = array<i64: 8, 1, 1>}, {transform_indices = @transform_3, window_bounds = array<i64: 8, 16>}]} {
    %c0 = arith.constant 0 : index
    %c0_0 = arith.constant 0 : index
    %c0_1 = arith.constant 0 : index
    %0 = vector.load %arg1[%c0, %c0_0, %c0_1] : memref<8x1x16xbf16, #tpu.memory_space<vmem>>, vector<8x1x16xbf16>
    %1 = arith.extf %0 : vector<8x1x16xbf16> to vector<8x1x16xf32>
    %c0_2 = arith.constant 0 : index
    %c0_3 = arith.constant 0 : index
    %c0_4 = arith.constant 0 : index
    %2 = vector.load %arg2[%c0_2, %c0_3, %c0_4] : memref<8x1x1xf32, #tpu.memory_space<vmem>>, vector<8x1x1xf32>
    %3 = vector.broadcast %2 : vector<8x1x1xf32> to vector<8x1x16xf32>
    %4 = arith.mulf %1, %3 : vector<8x1x16xf32>
    %c0_5 = arith.constant 0 : index
    %c0_6 = arith.constant 0 : index
    %c0_7 = arith.constant 0 : index
    %5 = vector.load %arg3[%c0_5, %c0_6, %c0_7] : memref<8x1x1xf32, #tpu.memory_space<vmem>>, vector<8x1x1xf32>
    %6 = vector.broadcast %5 : vector<8x1x1xf32> to vector<8x1x16xf32>
    %7 = arith.addf %4, %6 : vector<8x1x16xf32>
    %cst = arith.constant 0.000000e+00 : f32
    %8 = vector.broadcast %cst : f32 to vector<8x1x16xf32>
    %9 = arith.maximumf %7, %8 : vector<8x1x16xf32>
    %cst_8 = arith.constant dense<0xFF800000> : vector<8x16xf32>
    %10 = vector.multi_reduction <maximumf>, %9, %cst_8 [1] : vector<8x1x16xf32> to vector<8x16xf32>
    %11 = arith.truncf %10 : vector<8x16xf32> to vector<8x16xbf16>
    %c0_9 = arith.constant 0 : index
    %c0_10 = arith.constant 0 : index
    %12 = vector.load %arg4[%c0_9, %c0_10] : memref<8x16xbf16, #tpu.memory_space<vmem>>, vector<8x16xbf16>
    tpu.vector_store %arg4[%c0_9, %c0_10], %11 {strides = array<i32>} : memref<8x16xbf16, #tpu.memory_space<vmem>>, vector<8x16xbf16>,
    return
  }
  func.func @transform_0(%arg0: i32) -> (i32, i32, i32) {
    %c0_i32 = arith.constant 0 : i32
    %c0_i32_0 = arith.constant 0 : i32
    %c0_i32_1 = arith.constant 0 : i32
    return %c0_i32, %c0_i32_0, %arg0 : i32, i32, i32
  }
  func.func @transform_1(%arg0: i32) -> (i32, i32, i32) {
    %c0_i32 = arith.constant 0 : i32
    %c0_i32_0 = arith.constant 0 : i32
    %c0_i32_1 = arith.constant 0 : i32
    %c0_i32_2 = arith.constant 0 : i32
    return %c0_i32, %c0_i32_0, %c0_i32_1 : i32, i32, i32
  }
  func.func @transform_2(%arg0: i32) -> (i32, i32, i32) {
    %c0_i32 = arith.constant 0 : i32
    %c0_i32_0 = arith.constant 0 : i32
    %c0_i32_1 = arith.constant 0 : i32
    %c0_i32_2 = arith.constant 0 : i32
    return %c0_i32, %c0_i32_0, %c0_i32_1 : i32, i32, i32
  }
  func.func @transform_3(%arg0: i32) -> (i32, i32) {
    %c0_i32 = arith.constant 0 : i32
    %c0_i32_0 = arith.constant 0 : i32
    return %c0_i32, %arg0 : i32, i32
  }
}

module attributes {stable_mosaic.version = 11 : i64} {
  func.func @_conv_stats_kernel(%arg0: i32, %arg1: memref<216x128xbf16, #tpu.memory_space<vmem>>, %arg2: memref<4x216xbf16, #tpu.memory_space<vmem>>, %arg3: memref<4x1xf32, #tpu.memory_space<vmem>>, %arg4: memref<4x128xbf16, #tpu.memory_space<vmem>>, %arg5: memref<1x4x2xf32, #tpu.memory_space<vmem>>) attributes {dimension_semantics = [#tpu.dimension_semantics<parallel>], iteration_bounds = array<i64: 1>, scalar_prefetch = 0 : i64, scratch_operands = 0 : i64, tpu.core_type = #tpu.core_type<tc>, window_params = [{transform_indices = @transform_0, window_bounds = array<i64: 216, 128>}, {pipeline_mode = #tpu.pipeline_mode<synchronous>, transform_indices = @transform_1, window_bounds = array<i64: 4, 216>}, {pipeline_mode = #tpu.pipeline_mode<synchronous>, transform_indices = @transform_2, window_bounds = array<i64: 4, 1>}, {transform_indices = @transform_3, window_bounds = array<i64: 4, 128>}, {transform_indices = @transform_4, window_bounds = array<i64: 1, 4, 2>}]} {
    %c0 = arith.constant 0 : index
    %c0_0 = arith.constant 0 : index
    %0 = vector.load %arg2[%c0, %c0_0] : memref<4x216xbf16, #tpu.memory_space<vmem>>, vector<4x216xbf16>
    %c0_1 = arith.constant 0 : index
    %c0_2 = arith.constant 0 : index
    %1 = vector.load %arg1[%c0_1, %c0_2] : memref<216x128xbf16, #tpu.memory_space<vmem>>, vector<216x128xbf16>
    %cst = arith.constant dense<0.000000e+00> : vector<4x128xf32>
    %2 = tpu.matmul %0, %1, %cst {dimension_numbers = #tpu.dot_dimension_numbers<[1], [0], [0], [1], [0, 0, 1, 1], [], []>} : vector<4x216xbf16>, vector<216x128xbf16>, vector<4x128xf32> -> vector<4x128xf32>
    %c0_3 = arith.constant 0 : index
    %c0_4 = arith.constant 0 : index
    %3 = vector.load %arg3[%c0_3, %c0_4] : memref<4x1xf32, #tpu.memory_space<vmem>>, vector<4x1xf32>
    %4 = vector.broadcast %3 : vector<4x1xf32> to vector<4x128xf32>
    %5 = arith.addf %2, %4 : vector<4x128xf32>
    %6 = arith.truncf %5 : vector<4x128xf32> to vector<4x128xbf16>
    %c0_5 = arith.constant 0 : index
    %c0_6 = arith.constant 0 : index
    %7 = vector.load %arg4[%c0_5, %c0_6] : memref<4x128xbf16, #tpu.memory_space<vmem>>, vector<4x128xbf16>
    tpu.vector_store %arg4[%c0_5, %c0_6], %6 {strides = array<i32>} : memref<4x128xbf16, #tpu.memory_space<vmem>>, vector<4x128xbf16>,
    %cst_7 = arith.constant dense<0.000000e+00> : vector<4xf32>
    %8 = vector.multi_reduction <add>, %5, %cst_7 [1] : vector<4x128xf32> to vector<4xf32>
    %9 = vector.shape_cast %8 : vector<4xf32> to vector<4x1xf32>
    %10 = arith.mulf %5, %5 : vector<4x128xf32>
    %cst_8 = arith.constant dense<0.000000e+00> : vector<4xf32>
    %11 = vector.multi_reduction <add>, %10, %cst_8 [1] : vector<4x128xf32> to vector<4xf32>
    %12 = vector.shape_cast %11 : vector<4xf32> to vector<4x1xf32>
    %13 = tpu.concatenate %9, %12 in 1 : vector<4x1xf32>, vector<4x1xf32> -> vector<4x2xf32>
    %c0_9 = arith.constant 0 : index
    %c0_10 = arith.constant 0 : index
    %c0_11 = arith.constant 0 : index
    %14 = vector.load %arg5[%c0_9, %c0_10, %c0_11] : memref<1x4x2xf32, #tpu.memory_space<vmem>>, vector<1x4x2xf32>
    %15 = vector.shape_cast %14 : vector<1x4x2xf32> to vector<4x2xf32>
    %16 = vector.shape_cast %13 : vector<4x2xf32> to vector<1x4x2xf32>
    tpu.vector_store %arg5[%c0_9, %c0_10, %c0_11], %16 {strides = array<i32>} : memref<1x4x2xf32, #tpu.memory_space<vmem>>, vector<1x4x2xf32>,
    return
  }
  func.func @transform_0(%arg0: i32) -> (i32, i32) {
    %c0_i32 = arith.constant 0 : i32
    %c0_i32_0 = arith.constant 0 : i32
    return %c0_i32, %arg0 : i32, i32
  }
  func.func @transform_1(%arg0: i32) -> (i32, i32) {
    %c0_i32 = arith.constant 0 : i32
    %c0_i32_0 = arith.constant 0 : i32
    %c0_i32_1 = arith.constant 0 : i32
    return %c0_i32, %c0_i32_0 : i32, i32
  }
  func.func @transform_2(%arg0: i32) -> (i32, i32) {
    %c0_i32 = arith.constant 0 : i32
    %c0_i32_0 = arith.constant 0 : i32
    %c0_i32_1 = arith.constant 0 : i32
    return %c0_i32, %c0_i32_0 : i32, i32
  }
  func.func @transform_3(%arg0: i32) -> (i32, i32) {
    %c0_i32 = arith.constant 0 : i32
    %c0_i32_0 = arith.constant 0 : i32
    return %c0_i32, %arg0 : i32, i32
  }
  func.func @transform_4(%arg0: i32) -> (i32, i32, i32) {
    %c0_i32 = arith.constant 0 : i32
    %c0_i32_0 = arith.constant 0 : i32
    %c0_i32_1 = arith.constant 0 : i32
    return %arg0, %c0_i32, %c0_i32_0 : i32, i32, i32
  }
}

module attributes {stable_mosaic.version = 11 : i64} {
  func.func @_bn_relu_pool_kernel(%arg0: i32, %arg1: memref<4x1x128xbf16, #tpu.memory_space<vmem>>, %arg2: memref<4x1x1xf32, #tpu.memory_space<vmem>>, %arg3: memref<4x1x1xf32, #tpu.memory_space<vmem>>, %arg4: memref<4x128xbf16, #tpu.memory_space<vmem>>) attributes {dimension_semantics = [#tpu.dimension_semantics<parallel>], iteration_bounds = array<i64: 1>, scalar_prefetch = 0 : i64, scratch_operands = 0 : i64, tpu.core_type = #tpu.core_type<tc>, window_params = [{transform_indices = @transform_0, window_bounds = array<i64: 4, 1, 128>}, {pipeline_mode = #tpu.pipeline_mode<synchronous>, transform_indices = @transform_1, window_bounds = array<i64: 4, 1, 1>}, {pipeline_mode = #tpu.pipeline_mode<synchronous>, transform_indices = @transform_2, window_bounds = array<i64: 4, 1, 1>}, {transform_indices = @transform_3, window_bounds = array<i64: 4, 128>}]} {
    %c0 = arith.constant 0 : index
    %c0_0 = arith.constant 0 : index
    %c0_1 = arith.constant 0 : index
    %0 = vector.load %arg1[%c0, %c0_0, %c0_1] : memref<4x1x128xbf16, #tpu.memory_space<vmem>>, vector<4x1x128xbf16>
    %1 = arith.extf %0 : vector<4x1x128xbf16> to vector<4x1x128xf32>
    %c0_2 = arith.constant 0 : index
    %c0_3 = arith.constant 0 : index
    %c0_4 = arith.constant 0 : index
    %2 = vector.load %arg2[%c0_2, %c0_3, %c0_4] : memref<4x1x1xf32, #tpu.memory_space<vmem>>, vector<4x1x1xf32>
    %3 = vector.broadcast %2 : vector<4x1x1xf32> to vector<4x1x128xf32>
    %4 = arith.mulf %1, %3 : vector<4x1x128xf32>
    %c0_5 = arith.constant 0 : index
    %c0_6 = arith.constant 0 : index
    %c0_7 = arith.constant 0 : index
    %5 = vector.load %arg3[%c0_5, %c0_6, %c0_7] : memref<4x1x1xf32, #tpu.memory_space<vmem>>, vector<4x1x1xf32>
    %6 = vector.broadcast %5 : vector<4x1x1xf32> to vector<4x1x128xf32>
    %7 = arith.addf %4, %6 : vector<4x1x128xf32>
    %cst = arith.constant 0.000000e+00 : f32
    %8 = vector.broadcast %cst : f32 to vector<4x1x128xf32>
    %9 = arith.maximumf %7, %8 : vector<4x1x128xf32>
    %cst_8 = arith.constant dense<0xFF800000> : vector<4x128xf32>
    %10 = vector.multi_reduction <maximumf>, %9, %cst_8 [1] : vector<4x1x128xf32> to vector<4x128xf32>
    %11 = arith.truncf %10 : vector<4x128xf32> to vector<4x128xbf16>
    %c0_9 = arith.constant 0 : index
    %c0_10 = arith.constant 0 : index
    %12 = vector.load %arg4[%c0_9, %c0_10] : memref<4x128xbf16, #tpu.memory_space<vmem>>, vector<4x128xbf16>
    tpu.vector_store %arg4[%c0_9, %c0_10], %11 {strides = array<i32>} : memref<4x128xbf16, #tpu.memory_space<vmem>>, vector<4x128xbf16>,
    return
  }
  func.func @transform_0(%arg0: i32) -> (i32, i32, i32) {
    %c0_i32 = arith.constant 0 : i32
    %c0_i32_0 = arith.constant 0 : i32
    %c0_i32_1 = arith.constant 0 : i32
    return %c0_i32, %c0_i32_0, %arg0 : i32, i32, i32
  }
  func.func @transform_1(%arg0: i32) -> (i32, i32, i32) {
    %c0_i32 = arith.constant 0 : i32
    %c0_i32_0 = arith.constant 0 : i32
    %c0_i32_1 = arith.constant 0 : i32
    %c0_i32_2 = arith.constant 0 : i32
    return %c0_i32, %c0_i32_0, %c0_i32_1 : i32, i32, i32
  }
  func.func @transform_2(%arg0: i32) -> (i32, i32, i32) {
    %c0_i32 = arith.constant 0 : i32
    %c0_i32_0 = arith.constant 0 : i32
    %c0_i32_1 = arith.constant 0 : i32
    %c0_i32_2 = arith.constant 0 : i32
    return %c0_i32, %c0_i32_0, %c0_i32_1 : i32, i32, i32
  }
  func.func @transform_3(%arg0: i32) -> (i32, i32) {
    %c0_i32 = arith.constant 0 : i32
    %c0_i32_0 = arith.constant 0 : i32
    return %c0_i32, %arg0 : i32, i32
  }
}

module attributes {stable_mosaic.version = 11 : i64} {
  func.func @_conv_sigmoid_kernel(%arg0: i32, %arg1: memref<108x1024xbf16, #tpu.memory_space<vmem>>, %arg2: memref<1x108xbf16, #tpu.memory_space<vmem>>, %arg3: memref<1x1xf32, #tpu.memory_space<vmem>>, %arg4: memref<1x1024xf32, #tpu.memory_space<vmem>>) attributes {dimension_semantics = [#tpu.dimension_semantics<parallel>], iteration_bounds = array<i64: 1>, scalar_prefetch = 0 : i64, scratch_operands = 0 : i64, tpu.core_type = #tpu.core_type<tc>, window_params = [{transform_indices = @transform_0, window_bounds = array<i64: 108, 1024>}, {pipeline_mode = #tpu.pipeline_mode<synchronous>, transform_indices = @transform_1, window_bounds = array<i64: 1, 108>}, {pipeline_mode = #tpu.pipeline_mode<synchronous>, transform_indices = @transform_2, window_bounds = array<i64: 1, 1>}, {transform_indices = @transform_3, window_bounds = array<i64: 1, 1024>}]} {
    %c0 = arith.constant 0 : index
    %c0_0 = arith.constant 0 : index
    %0 = vector.load %arg2[%c0, %c0_0] : memref<1x108xbf16, #tpu.memory_space<vmem>>, vector<1x108xbf16>
    %c0_1 = arith.constant 0 : index
    %c0_2 = arith.constant 0 : index
    %1 = vector.load %arg1[%c0_1, %c0_2] : memref<108x1024xbf16, #tpu.memory_space<vmem>>, vector<108x1024xbf16>
    %cst = arith.constant dense<0.000000e+00> : vector<1x1024xf32>
    %2 = tpu.matmul %0, %1, %cst {dimension_numbers = #tpu.dot_dimension_numbers<[1], [0], [0], [1], [0, 0, 1, 1], [], []>} : vector<1x108xbf16>, vector<108x1024xbf16>, vector<1x1024xf32> -> vector<1x1024xf32>
    %c0_3 = arith.constant 0 : index
    %c0_4 = arith.constant 0 : index
    %3 = vector.load %arg3[%c0_3, %c0_4] : memref<1x1xf32, #tpu.memory_space<vmem>>, vector<1x1xf32>
    %4 = vector.broadcast %3 : vector<1x1xf32> to vector<1x1024xf32>
    %5 = arith.addf %2, %4 : vector<1x1024xf32>
    %6 = arith.negf %5 : vector<1x1024xf32>
    %7 = math.exp %6 : vector<1x1024xf32>
    %cst_5 = arith.constant 1.000000e+00 : f32
    %8 = vector.broadcast %cst_5 : f32 to vector<1x1024xf32>
    %9 = arith.addf %8, %7 : vector<1x1024xf32>
    %10 = arith.divf %8, %9 : vector<1x1024xf32>
    %c0_6 = arith.constant 0 : index
    %c0_7 = arith.constant 0 : index
    %11 = vector.load %arg4[%c0_6, %c0_7] : memref<1x1024xf32, #tpu.memory_space<vmem>>, vector<1x1024xf32>
    tpu.vector_store %arg4[%c0_6, %c0_7], %10 {strides = array<i32>} : memref<1x1024xf32, #tpu.memory_space<vmem>>, vector<1x1024xf32>,
    return
  }
  func.func @transform_0(%arg0: i32) -> (i32, i32) {
    %c0_i32 = arith.constant 0 : i32
    %c0_i32_0 = arith.constant 0 : i32
    return %c0_i32, %arg0 : i32, i32
  }
  func.func @transform_1(%arg0: i32) -> (i32, i32) {
    %c0_i32 = arith.constant 0 : i32
    %c0_i32_0 = arith.constant 0 : i32
    %c0_i32_1 = arith.constant 0 : i32
    return %c0_i32, %c0_i32_0 : i32, i32
  }
  func.func @transform_2(%arg0: i32) -> (i32, i32) {
    %c0_i32 = arith.constant 0 : i32
    %c0_i32_0 = arith.constant 0 : i32
    %c0_i32_1 = arith.constant 0 : i32
    return %c0_i32, %c0_i32_0 : i32, i32
  }
  func.func @transform_3(%arg0: i32) -> (i32, i32) {
    %c0_i32 = arith.constant 0 : i32
    %c0_i32_0 = arith.constant 0 : i32
    return %c0_i32, %arg0 : i32, i32
  }
}

</mosaic_0001>

<bundles_post_ra>
// kernel: mri3d_autoencoder_forward.12
= control target key start
LH: loop header
LB: loop body
LE: loop exit
PB: predicated region body
PF: predicated region fallthrough
CT: control target
= control target key end

     0   :  { %s866_s15 = smov 0   ;;  %s868_s16 = smov 0   ;;  %s998_s0 = inlined_call_operand.vmem [shape: bf16[27,8192], index: 0, kind: input, shape index: {}]   ;;  %s999_s1 = inlined_call_operand.vmem [shape: bf16[4,27], index: 1, kind: input, shape index: {}]   ;;  %s1000_s2 = inlined_call_operand.vmem [shape: f32[4,1], index: 2, kind: input, shape index: {}]   ;;  %s1001_s3 = inlined_call_operand.vmem [shape: bf16[4,8192], index: 3, kind: output, shape index: {0}]   ;;  %s1002_s4 = inlined_call_operand.vmem [shape: f32[8,4,2], index: 4, kind: output, shape index: {1}]  }
   0x1   :  { %s870_s17 = smov 0  }
   0x2 LB: > { %s882_s18 = sadd.s32 4294967295, %s836_s17   ;;  %s885_s19 = sadd.s32 1, %s836_s17   ;;  %s836_s17 = sphi %s870_s17, %s1005_s17   ;;  %s832_s16 = sphi %s868_s16, %s1004_s16   ;;  %s828_s15 = sphi %s866_s15, %s1003_s15  }
   0x3   : > { %s19_s20 = ssub.s32 %s836_s17, %s885_s19  ;;  %s22_s21 = sadd.s32 1, %s832_s16 }
   0x4   : > { %p20_p0 = scmp.eq.s32.totalorder %s19_s20, 0  ;;  %p29_p1 = scmp.ne.s32.totalorder %s832_s16, %s828_s15 }
   0x5   : > { %p30_p2 = scmp.eq.s32.totalorder %s836_s17, 0  ;;  %p750_p4 = scmp.ge.s32.totalorder %s836_s17, 8 }
   0x6   : > { %s894_s22 = scalar_select %p20_p0, %s832_s16, %s22_s21  }
   0x7   : > { %p31_p3 = por %p30_p2, %p29_p1  ;;  %155 = sbr.rel (%p750_p4) target bundleno = 24 (0x18), region = 24 }
   0xc   : > { %158 = sbr.rel (!%p31_p3) target bundleno = 24 (0x18), region = 28  ;;  %s160_s23 = sand.u32 (%p31_p3), 1, %s832_s16  }
   0xd   : > { %s785_s24 = sshll.u32 (%p31_p3), %s836_s17, 5  ;;  %s751_s25 = sshll.u32 (%p31_p3), %s160_s23, 7 }
   0xe   : > { %s902_s28 = scalar_lea.vmem (%p31_p3), %s998_s0, %s785_s24  ;;  %s162_s29 = scalar_lea.vmem (%p31_p3), [#allocation2], %s751_s25 }
   0xf   : > { %v178_v0 = vld [vmem:[%s902_s28] sm:$0xff] (%p31_p3)  ;;  %v180_v1 = vld [vmem:[%s902_s28 + $0x8] sm:$0xff] (%p31_p3)  ;;  %v182_v2 = vld [vmem:[%s902_s28 + $0x10] sm:$0xff] (%p31_p3) }
  0x10   : > { %179 = vst [vmem:[%s162_s29] sm:$0xff] (%p31_p3), %v178_v0  ;;  %181 = vst [vmem:[%s162_s29 + $0x8] sm:$0xff] (%p31_p3), %v180_v1  ;;  %v184_v3 = vld [vmem:[%s902_s28 + $0x18] sm:$0xff] (%p31_p3)  ;;  %v186_v4 = vld [vmem:[%s902_s28 + $0x100] sm:$0xff] (%p31_p3) }
  0x11   : > { %183 = vst [vmem:[%s162_s29 + $0x10] sm:$0xff] %v182_v2  ;;  %v188_v5 = vld [vmem:[%s902_s28 + $0x108] sm:$0xff]  ;;  %185 = vst [vmem:[%s162_s29 + $0x18] sm:$0xff] %v184_v3  ;;  %v190_v6 = vld [vmem:[%s902_s28 + $0x110] sm:$0xff] }
  0x12   : > { %187 = vst [vmem:[%s162_s29 + $0x20] sm:$0xff] %v186_v4  ;;  %189 = vst [vmem:[%s162_s29 + $0x28] sm:$0xff] %v188_v5  ;;  %v192_v7 = vld [vmem:[%s902_s28 + $0x118] sm:$0xff]  ;;  %v194_v8 = vld [vmem:[%s902_s28 + $0x200] sm:$0xff] }
  0x13   : > { %191 = vst [vmem:[%s162_s29 + $0x30] sm:$0xff] %v190_v6  ;;  %193 = vst [vmem:[%s162_s29 + $0x38] sm:$0xff] %v192_v7  ;;  %v196_v9 = vld [vmem:[%s902_s28 + $0x208] sm:$0xff]  ;;  %v198_v10 = vld [vmem:[%s902_s28 + $0x210] sm:$0xff] }
  0x14   : > { %195 = vst [vmem:[%s162_s29 + $0x40] sm:$0xff] %v194_v8  ;;  %v200_v11 = vld [vmem:[%s902_s28 + $0x218] sm:$0xff]  ;;  %197 = vst [vmem:[%s162_s29 + $0x48] sm:$0xff] %v196_v9  ;;  %v202_v12 = vld [vmem:[%s902_s28 + $0x300] sm:$0xff] }
  0x15   : > { %199 = vst [vmem:[%s162_s29 + $0x50] sm:$0xff] %v198_v10  ;;  %201 = vst [vmem:[%s162_s29 + $0x58] sm:$0xff] %v200_v11  ;;  %v204_v13 = vld [vmem:[%s902_s28 + $0x308] sm:$0xff]  ;;  %v206_v14 = vld [vmem:[%s902_s28 + $0x310] sm:$0xff] }
  0x16   : > { %203 = vst [vmem:[%s162_s29 + $0x60] sm:$0xff] %v202_v12  ;;  %205 = vst [vmem:[%s162_s29 + $0x68] sm:$0xff] %v204_v13  ;;  %v208_v15 = vld [vmem:[%s902_s28 + $0x318] sm:$0xff] }
  0x17   : > { %207 = vst [vmem:[%s162_s29 + $0x70] sm:$0xff] %v206_v14  ;;  %209 = vst [vmem:[%s162_s29 + $0x78] sm:$0xff] %v208_v15 }
  0x18 PF: > { %p754_p5 = scmp.ge.s32.totalorder %s836_s17, 1  ;;  %p214_p6 = scmp.lt.s32.totalorder %s836_s17, 9 }
  0x1a   : > { %p215_p7 = pnand %p754_p5, %p214_p6 }
  0x1b   : > { %s221_s30 = sand.u32 (!%p215_p7), 1, %s828_s15   ;;  %s756_s11 = sshll.u32 (!%p215_p7), %s882_s18, 3 }
  0x1c   : > { %218 = sbr.rel (%p215_p7) target bundleno = 403 (0x193), region = 51  ;;  %s755_s5 = sshll.u32 (!%p215_p7), %s221_s30, 7 }
  0x1d   : > { %s929_s8 = scalar_lea.vmem (!%p215_p7), [#allocation2], %s755_s5  ;;  %p252_p8 = scmp.lt.s32.totalorder (!%p215_p7), %s756_s11, 63 }
  0x1e   : > { %p257_p9 = scmp.lt.s32.totalorder (!%p215_p7), %s882_s18, 7 }
  0x21   : > { %vm361_vm0 = vcmask 1044480   ;;  %vm362_vm1 = vcmask 1045504   ;;  %v838_v16 = vmov 65535   ;;  %v839_v18 = vmov 0   ;;  %v279_v19 = vld [vmem:[%s1000_s2] sm:$0xf] }
  0x22   : > { %v363_v17 = vsel %vm361_vm0, 4294967295, %v838_v16  ;;  %421 = vmatprep.mubr.bf16.mxu0 %v839_v18  ;;  %462 = vmatprep.mubr.bf16.mxu1 %v839_v18  ;;  %v271_v20 = vld [vmem:[%s929_s8 + $0x40] sm:$0xff]  ;;  %v272_v23 = vld [vmem:[%s929_s8 + $0x48] sm:$0xff]  ;;  %v273_v33 = vld [vmem:[%s929_s8 + $0x50] sm:$0xff]  ;;  %vm357_vm2 = vcmask 220160   ;;  %v574_v0 = vlaneseq  ;;  %vm607_vm3 = vcmask 1043456  }
  0x23   : > { %813 = vset.pattern.permute.xlu0 %v839_v18  ;;  %v275_v21 = vld [vmem:[%s929_s8 + $0x60] sm:$0x33]  ;;  %v364_v22 = vsel %vm362_vm1, %v363_v17, 0  ;;  %v276_v25 = vld [vmem:[%s929_s8 + $0x68] sm:$0x33]  ;;  %v274_v38 = vld [vmem:[%s929_s8 + $0x58] sm:$0xff] }
  0x24   : > { %282 = vperm.xlu0 %813, %v279_v19   ;;  %v768_v24 = vcombine.high %v271_v20, %v275_v21  ;;  %v767_v26 = vcombine.low %v271_v20, %v275_v21  ;;  %v263_v27 = vld [vmem:[%s929_s8] sm:$0xff]  ;;  %v770_v29 = vcombine.high %v272_v23, %v276_v25  ;;  %v769_v30 = vcombine.low %v272_v23, %v276_v25  ;;  %v264_v31 = vld [vmem:[%s929_s8 + $0x8] sm:$0xff]  ;;  %v277_v37 = vld [vmem:[%s929_s8 + $0x70] sm:$0x33]  ;;  %s1007_s11 = smov (!%p252_p8, %s756_s11), 63  ;;  %s1009_s18 = smov (!%p257_p9, %s882_s18), 7 }
  0x25   : > { %v267_v28 = vld [vmem:[%s929_s8 + $0x20] sm:$0xff]  ;;  %v268_v32 = vld [vmem:[%s929_s8 + $0x28] sm:$0xff]  ;;  %v278_v39 = vld [vmem:[%s929_s8 + $0x78] sm:$0x33]  ;;  %v772_v43 = vcombine.high %v273_v33, %v277_v37  ;;  %v771_v46 = vcombine.low %v273_v33, %v277_v37  ;;  %v840_v62 = vmov 1983009808  }
  0x26   : > { %v369_v34 = vand.u32 %v768_v24, %v364_v22  ;;  %v366_v35 = vand.u32 %v767_v26, %v364_v22  ;;  %v760_v36 = vcombine.high %v263_v27, %v267_v28  ;;  %v375_v40 = vand.u32 %v770_v29, %v364_v22  ;;  %v265_v51 = vld [vmem:[%s929_s8 + $0x10] sm:$0xff]  ;;  %v266_v53 = vld [vmem:[%s929_s8 + $0x18] sm:$0xff]  ;;  %v262_v55 = vld [vmem:[%s999_s1] sm:$0x3]  ;;  %s757_s12 = sshll.u32 %s1007_s11, 1  ;;  %s758_s17 = sshll.u32 %s1009_s18, 2 }
  0x27   : > { %v372_v41 = vand.u32 %v769_v30, %v364_v22  ;;  %v762_v42 = vcombine.high %v264_v31, %v268_v32  ;;  %v774_v44 = vcombine.high %v274_v38, %v278_v39  ;;  %v759_v45 = vcombine.low %v263_v27, %v267_v28  ;;  %v269_v52 = vld [vmem:[%s929_s8 + $0x30] sm:$0xff]  ;;  %v270_v54 = vld [vmem:[%s929_s8 + $0x38] sm:$0xff]  ;;  %s968_s15 = scalar_lea.vmem %s1001_s3, %s757_s12  ;;  %s260_s23 = scalar_lea.vmem %s1002_s4, %s758_s17 }
  0x28   : > { %401 = vmatprep.subr.bf16.mxu0 %v369_v34  ;;  %442 = vmatprep.subr.bf16.mxu1 %v375_v40  ;;  %v761_v47 = vcombine.low %v264_v31, %v268_v32  ;;  %v381_v48 = vand.u32 %v772_v43, %v364_v22  ;;  %v773_v49 = vcombine.low %v274_v38, %v278_v39  ;;  %v572_v63 = vunpack.c.l.s4 %v840_v62 }
  0x29   : > { %402 = vmatpush1.bf16.msra.mxu0 %v366_v35  ;;  %443 = vmatpush1.bf16.msra.mxu1 %v372_v41  ;;  %v387_v50 = vand.u32 %v774_v44, %v364_v22  ;;  %v378_v56 = vand.u32 %v771_v46, %v364_v22  ;;  %v764_v58 = vcombine.high %v265_v51, %v269_v52  ;;  %v575_v3 = vshrl.u32 %v574_v0, 7 }
  0x2a   : > { %403 = vmatprep.subr.bf16.mxu0 %v760_v36  ;;  %444 = vmatprep.subr.bf16.mxu1 %v762_v42  ;;  %v384_v57 = vand.u32 %v773_v49, %v364_v22  ;;  %v766_v59 = vcombine.high %v266_v53, %v270_v54  ;;  %v763_v60 = vcombine.low %v265_v51, %v269_v52  ;;  %v573_v2 = vunpack.c.0.s8 %v572_v63 }
  0x2b   : > { %v765_v61 = vcombine.low %v266_v53, %v270_v54  ;;  %vm650_vm4 = vcmask 7168   ;;  %vm652_vm5 = vcmask 11264  }
  0x2c   : > { %v576_v10 = vsub.s32 %v573_v2, %v575_v3 }
  0x2d   : > { %404 = vmatpush1.bf16.msra.mxu0 %v759_v45  ;;  %445 = vmatpush1.bf16.msra.mxu1 %v761_v47 }
  0x2e   : > { %483 = vmatprep.subr.bf16.mxu0 %v381_v48  ;;  %524 = vmatprep.subr.bf16.mxu1 %v387_v50 }
  0x30   : > { %775 = vmatmul.mubr.msk.bf16.vlgmr.msra.gmra.mxu0 %vm357_vm2, %v262_v55  ;;  %776 = vmatmul.mubr.msk.bf16.vlgmr.msra.gmra.mxu1 %vm357_vm2, %v262_v55 }
  0x31   : > { %484 = vmatpush1.bf16.msra.mxu0 %v378_v56  ;;  %525 = vmatpush1.bf16.msra.mxu1 %v384_v57 }
  0x32   : > { %485 = vmatprep.subr.bf16.mxu0 %v764_v58  ;;  %526 = vmatprep.subr.bf16.mxu1 %v766_v59 }
  0x33   : > { %503 = vmatprep.mubr.bf16.mxu0 %v839_v18  ;;  %544 = vmatprep.mubr.bf16.mxu1 %v839_v18 }
  0x35   : > { %486 = vmatpush1.bf16.msra.mxu0 %v763_v60  ;;  %527 = vmatpush1.bf16.msra.mxu1 %v765_v61 }
  0x38   : > { %777 = vmatmul.mubr.msk.bf16.vlgmr.msra.gmra.mxu0 %vm357_vm2, %v262_v55  ;;  %778 = vmatmul.mubr.msk.bf16.vlgmr.msra.gmra.mxu1 %vm357_vm2, %v262_v55 }
  0x9f   : > { %v283_v1 = vpop.permute.xlu0 %282 }
  0xf0   : > { %v423_v4 = vpop.f32.mrf.mxu0  ;;  %v464_v5 = vpop.f32.mrf.mxu1 }
  0xf1   : > { %v424_v6 = vadd.f32 %v423_v4, %v283_v1  ;;  %v465_v8 = vadd.f32 %v464_v5, %v283_v1 }
  0xf2   : > { %v425_v7 = vpop.f32.mrf.mxu0  ;;  %v466_v12 = vpop.f32.mrf.mxu1 }
  0xf3   : > { %v426_v9 = vadd.f32 %v425_v7, %v283_v1  ;;  %v625_v11 = vmul.f32 %v424_v6, %v424_v6  ;;  %v608_v13 = vsel %vm607_vm3, %v424_v6, 0.0  ;;  %v467_v14 = vadd.f32 %v466_v12, %v283_v1 }
  0xf4   : > { %v427_v15 = vpop.f32.mrf.mxu0  ;;  %v468_v19 = vpop.f32.mrf.mxu1  ;;  %v627_v20 = vmul.f32 %v465_v8, %v465_v8  ;;  %v611_v27 = vsel %vm607_vm3, %v465_v8, 0.0 }
  0xf5   : > { %v779_v16 = vpack.c.bf16 %v426_v9, %v424_v6  ;;  %v609_v17 = vsel %vm607_vm3, %v426_v9, 0.0  ;;  %v626_v18 = vmul.f32 %v426_v9, %v426_v9  ;;  %v780_v22 = vpack.c.bf16 %v467_v14, %v465_v8 }
  0xf6   : > { %v610_v21 = vadd.f32 %v609_v17, %v608_v13  ;;  %v428_v23 = vpop.f32.mrf.mxu0  ;;  %v633_v25 = vsel %vm607_vm3, %v625_v11, 0.0  ;;  %v469_v28 = vpop.f32.mrf.mxu1  ;;  %v628_v32 = vmul.f32 %v467_v14, %v467_v14  ;;  %v613_v34 = vsel %vm607_vm3, %v467_v14, 0.0 }
  0xf7   : > { %v577_v24 = vrot.slane %v779_v16, %v576_v10  ;;  %v634_v26 = vsel %vm607_vm3, %v626_v18, 0.0  ;;  %v584_v30 = vrot.slane %v780_v22, %v576_v10  ;;  %v636_v37 = vsel %vm607_vm3, %v627_v20, 0.0 }
  0xf8   : > { %v635_v29 = vadd.f32 %v634_v26, %v633_v25  ;;  %v612_v31 = vadd.f32 %v611_v27, %v610_v21  ;;  %v505_v33 = vpop.f32.mrf.mxu0  ;;  %v546_v36 = vpop.f32.mrf.mxu1  ;;  %v638_v47 = vsel %vm607_vm3, %v628_v32, 0.0 }
  0xf9   : > { %v506_v35 = vadd.f32 %v505_v33, %v283_v1  ;;  %v585_v38 = vcombine.low %v577_v24, %v584_v30  ;;  %v547_v40 = vadd.f32 %v546_v36, %v283_v1 }
  0xfa   : > { %v614_v39 = vadd.f32 %v613_v34, %v612_v31  ;;  %v507_v41 = vpop.f32.mrf.mxu0  ;;  %v637_v42 = vadd.f32 %v636_v37, %v635_v29  ;;  %v548_v46 = vpop.f32.mrf.mxu1 }
  0xfb   : > { %v615_v43 = vsel %vm607_vm3, %v506_v35, 0.0  ;;  %v629_v44 = vmul.f32 %v506_v35, %v506_v35  ;;  %v508_v45 = vadd.f32 %v507_v41, %v283_v1  ;;  %605 = vst [vmem:[%s968_s15] sm:$0xff] %v585_v38  ;;  %v549_v49 = vadd.f32 %v548_v46, %v283_v1 }
  0xfc   : > { %v616_v48 = vadd.f32 %v615_v43, %v614_v39  ;;  %v509_v50 = vpop.f32.mrf.mxu0  ;;  %v550_v54 = vpop.f32.mrf.mxu1  ;;  %v639_v55 = vadd.f32 %v638_v47, %v637_v42  ;;  %v619_v59 = vsel %vm607_vm3, %v547_v40, 0.0  ;;  %v631_v62 = vmul.f32 %v547_v40, %v547_v40 }
  0xfd   : > { %v781_v51 = vpack.c.bf16 %v508_v45, %v506_v35  ;;  %v617_v52 = vsel %vm607_vm3, %v508_v45, 0.0  ;;  %v630_v53 = vmul.f32 %v508_v45, %v508_v45  ;;  %v782_v56 = vpack.c.bf16 %v549_v49, %v547_v40 }
  0xfe   : > { %v510_v57 = vpop.f32.mrf.mxu0  ;;  %v618_v58 = vadd.f32 %v617_v52, %v616_v48  ;;  %v551_v61 = vpop.f32.mrf.mxu1  ;;  %v640_v63 = vsel %vm607_vm3, %v629_v44, 0.0  ;;  %v621_v4 = vsel %vm607_vm3, %v549_v49, 0.0  ;;  %v632_v5 = vmul.f32 %v549_v49, %v549_v49 }
  0xff   : > { %v594_v60 = vrot.slane %v781_v51, %v576_v10  ;;  %v642_v0 = vsel %vm607_vm3, %v630_v53, 0.0  ;;  %v601_v1 = vrot.slane %v782_v56, %v576_v10  ;;  %v641_v3 = vadd.f32 %v640_v63, %v639_v55 }
 0x100   : > { %v620_v2 = vadd.f32 %v619_v59, %v618_v58  ;;  %v644_v9 = vsel %vm607_vm3, %v631_v62, 0.0  ;;  %v646_v12 = vsel %vm607_vm3, %v632_v5, 0.0 }
 0x101   : > { %v602_v6 = vcombine.low %v594_v60, %v601_v1  ;;  %v643_v8 = vadd.f32 %v642_v0, %v641_v3 }
 0x102   : > { %v622_v7 = vadd.f32 %v621_v4, %v620_v2 }
 0x103   : > { %606 = vst [vmem:[%s968_s15 + $0x8] sm:$0xff] %v602_v6  ;;  %v645_v11 = vadd.f32 %v644_v9, %v643_v8 }
 0x104   : > { %623 = vadd.xlane.f32.xlu0 %v622_v7 }
 0x105   : > { %v647_v13 = vadd.f32 %v646_v12, %v645_v11 }
 0x107   : > { %648 = vadd.xlane.f32.xlu1 %v647_v13 }
 0x18d   : > { %v624_v10 = vpop.xlane.xlu0 %623 }
 0x190   : > { %v649_v14 = vpop.xlane.xlu1 %648 }
 0x191   : > { %v651_v15 = vsel %vm650_vm4, %v624_v10, %v649_v14 }
 0x192   : > { %653 = vst.msk [vmem:[%s260_s23] sm:$0xf] %vm652_vm5, %v651_v15 }
 0x193 PF: > { %p12_p10 = scmp.ge.s32.totalorder %s885_s19, 10   ;;  %s1003_s15 = smov %s832_s16 }
 0x194   : > { %s1004_s16 = smov %s894_s22  ;;  %s1005_s17 = smov %s885_s19 }
 0x195   :  { %14 = sbr.rel (!%p12_p10) target bundleno = 2 (0x2), region = 102 }

// kernel: mri3d_autoencoder_forward.13
= control target key start
LH: loop header
LB: loop body
LE: loop exit
PB: predicated region body
PF: predicated region fallthrough
CT: control target
= control target key end

     0   :  { %v911_v0 = vmov 0   ;;  %v912_v9 = vmov 1983009808   ;;  %v499_v11 = vlaneseq  ;;  %vm783_vm0 = vcmask 1041409   ;;  %s1301_s1 = inlined_call_operand.vmem [shape: f32[4,1,1], index: 1, kind: input, shape index: {}]   ;;  %s1302_s2 = inlined_call_operand.vmem [shape: f32[4,1,1], index: 2, kind: input, shape index: {}]   ;;  %s1303_s0 = inlined_call_operand.vmem [shape: bf16[4,8,1024], index: 0, kind: input, shape index: {}]   ;;  %s1304_s3 = inlined_call_operand.vmem [shape: bf16[4,1024], index: 3, kind: output, shape index: {}]  }
   0x1   :  { %910 = vset.pattern.permute.xlu1 %v911_v0  ;;  %909 = vset.pattern.permute.xlu0 %v911_v0  ;;  %v876_v1 = vld [vmem:[%s1301_s1 + $0x1] ss:$0 sm:$0xff]  ;;  %v875_v2 = vld [vmem:[%s1301_s1] ss:$0 sm:$0xff]  ;;  %v877_v3 = vld [vmem:[%s1301_s1 + $0x2] ss:$0 sm:$0xff]  ;;  %v497_v10 = vunpack.c.l.s4 %v912_v9 }
   0x2   :  { %91 = vperm.xlu0 %909, %v876_v1   ;;  %87 = vperm.xlu1 %910, %v875_v2   ;;  %v878_v4 = vld [vmem:[%s1301_s1 + $0x3] ss:$0 sm:$0xff]  ;;  %v880_v5 = vld [vmem:[%s1302_s2 + $0x1] ss:$0 sm:$0xff]  ;;  %v881_v6 = vld [vmem:[%s1302_s2 + $0x2] ss:$0 sm:$0xff] }
   0x3   :  { %v879_v7 = vld [vmem:[%s1302_s2] ss:$0 sm:$0xff]  ;;  %v882_v8 = vld [vmem:[%s1302_s2 + $0x3] ss:$0 sm:$0xff]  ;;  %v19_v13 = vld [vmem:[%s1303_s0 + $0x28] sm:$0xff]  ;;  %v498_v20 = vunpack.c.0.s8 %v497_v10  ;;  %v500_v21 = vshrl.u32 %v499_v11, 7 }
   0x4   :  { %v18_v12 = vld [vmem:[%s1303_s0 + $0x20] sm:$0xff]  ;;  %v20_v14 = vld [vmem:[%s1303_s0 + $0x30] sm:$0xff]  ;;  %v21_v15 = vld [vmem:[%s1303_s0 + $0x38] sm:$0xff]  ;;  %v40_v23 = vunpack.c.l.bf16 %v19_v13  ;;  %v41_v24 = vunpack.c.h.bf16 %v19_v13  ;;  %vm786_vm1 = vcmask 1042434   ;;  %vm789_vm2 = vcmask 1043459  }
   0x5   :  { %v972_v16 = vld [vmem:[%s1303_s0 + $0x40] sm:$0xff]  ;;  %v38_v17 = vunpack.c.l.bf16 %v18_v12  ;;  %v977_v18 = vld [vmem:[%s1303_s0 + $0x48] sm:$0xff]  ;;  %v982_v19 = vld [vmem:[%s1303_s0 + $0x50] sm:$0xff]  ;;  %v39_v22 = vunpack.c.h.bf16 %v18_v12  ;;  %v42_v25 = vunpack.c.l.bf16 %v20_v14  ;;  %v43_v27 = vunpack.c.h.bf16 %v20_v14 }
   0x6   :  { %95 = vperm.xlu0 %909, %v877_v3   ;;  %99 = vperm.xlu1 %910, %v878_v4   ;;  %v987_v26 = vld [vmem:[%s1303_s0 + $0x58] sm:$0xff]  ;;  %v44_v28 = vunpack.c.l.bf16 %v21_v15  ;;  %v45_v29 = vunpack.c.h.bf16 %v21_v15  ;;  %v46_v30 = vunpack.c.l.bf16 %v972_v16  ;;  %v14_v31 = vld [vmem:[%s1303_s0] sm:$0xff]  ;;  %v15_v32 = vld [vmem:[%s1303_s0 + $0x8] sm:$0xff]  ;;  %v47_v33 = vunpack.c.h.bf16 %v972_v16 }
   0x7   :  { %v48_v34 = vunpack.c.l.bf16 %v977_v18  ;;  %v49_v35 = vunpack.c.h.bf16 %v977_v18  ;;  %v50_v36 = vunpack.c.l.bf16 %v982_v19  ;;  %v16_v37 = vld [vmem:[%s1303_s0 + $0x10] sm:$0xff]  ;;  %v17_v38 = vld [vmem:[%s1303_s0 + $0x18] sm:$0xff]  ;;  %v51_v40 = vunpack.c.h.bf16 %v982_v19  ;;  %v1014_v44 = vld [vmem:[%s1303_s0 + $0x60] sm:$0xff] }
   0x8   :  { %v52_v41 = vunpack.c.l.bf16 %v987_v26  ;;  %v53_v42 = vunpack.c.h.bf16 %v987_v26  ;;  %v1009_v43 = vsub.s32 %v498_v20, %v500_v21  ;;  %v1019_v45 = vld [vmem:[%s1303_s0 + $0x68] sm:$0xff]  ;;  %v30_v46 = vunpack.c.l.bf16 %v14_v31  ;;  %v1024_v50 = vld [vmem:[%s1303_s0 + $0x70] sm:$0xff]  ;;  %v1029_v51 = vld [vmem:[%s1303_s0 + $0x78] sm:$0xff] }
   0x9   :  { %v31_v47 = vunpack.c.h.bf16 %v14_v31  ;;  %v32_v48 = vunpack.c.l.bf16 %v15_v32  ;;  %v33_v49 = vunpack.c.h.bf16 %v15_v32  ;;  %v34_v52 = vunpack.c.l.bf16 %v16_v37 }
   0xa   :  { %163 = vperm.xlu0 %909, %v880_v5   ;;  %167 = vperm.xlu1 %910, %v881_v6   ;;  %v35_v53 = vunpack.c.h.bf16 %v16_v37  ;;  %v36_v54 = vunpack.c.l.bf16 %v17_v38  ;;  %v37_v55 = vunpack.c.h.bf16 %v17_v38  ;;  %v54_v56 = vunpack.c.l.bf16 %v1014_v44 }
   0xb   :  { %v55_v57 = vunpack.c.h.bf16 %v1014_v44 }
   0xe   :  { %159 = vperm.xlu0 %909, %v879_v7   ;;  %171 = vperm.xlu1 %910, %v882_v8  }
  0x7d   :  { %v92_v39 = vpop.permute.xlu0 %91  ;;  %v88_v60 = vpop.permute.xlu1 %87 }
  0x7e   :  { %v110_v2 = vmul.f32 %v92_v39, %v38_v17  ;;  %v111_v3 = vmul.f32 %v92_v39, %v39_v22  ;;  %v112_v4 = vmul.f32 %v92_v39, %v40_v23  ;;  %v113_v5 = vmul.f32 %v92_v39, %v41_v24 }
  0x7f   :  { %v114_v6 = vmul.f32 %v92_v39, %v42_v25  ;;  %v115_v7 = vmul.f32 %v92_v39, %v43_v27  ;;  %v116_v8 = vmul.f32 %v92_v39, %v44_v28  ;;  %v117_v9 = vmul.f32 %v92_v39, %v45_v29 }
  0x80   :  { %v1041_v10 = vmul.f32 %v88_v60, %v30_v46  ;;  %v1043_v11 = vmul.f32 %v88_v60, %v31_v47  ;;  %v1045_v12 = vmul.f32 %v88_v60, %v32_v48  ;;  %v1047_v13 = vmul.f32 %v88_v60, %v33_v49 }
  0x81   :  { %v1035_v61 = vpop.permute.xlu0 %95  ;;  %v1049_v15 = vmul.f32 %v88_v60, %v34_v52  ;;  %v1051_v20 = vmul.f32 %v88_v60, %v35_v53  ;;  %v1053_v17 = vmul.f32 %v88_v60, %v36_v54  ;;  %v1055_v21 = vmul.f32 %v88_v60, %v37_v55 }
  0x82   :  { %v123_v16 = vmul.f32 %v1035_v61, %v51_v40  ;;  %v125_v18 = vmul.f32 %v1035_v61, %v53_v42 }
  0x85   :  { %v164_v14 = vpop.permute.xlu0 %163 }
  0x86   :  { %v182_v22 = vadd.f32 %v164_v14, %v110_v2  ;;  %v183_v23 = vadd.f32 %v164_v14, %v111_v3  ;;  %v184_v24 = vadd.f32 %v164_v14, %v112_v4  ;;  %v185_v25 = vadd.f32 %v164_v14, %v113_v5 }
  0x87   :  { %v186_v27 = vadd.f32 %v164_v14, %v114_v6  ;;  %v187_v28 = vadd.f32 %v164_v14, %v115_v7  ;;  %v188_v29 = vadd.f32 %v164_v14, %v116_v8  ;;  %v189_v31 = vadd.f32 %v164_v14, %v117_v9 }
  0x88   :  { %v214_v32 = vmax.f32 %v182_v22, 0.0  ;;  %v215_v37 = vmax.f32 %v183_v23, 0.0  ;;  %v216_v38 = vmax.f32 %v184_v24, 0.0  ;;  %v217_v39 = vmax.f32 %v185_v25, 0.0 }
  0x89   :  { %v218_v46 = vmax.f32 %v186_v27, 0.0  ;;  %v219_v47 = vmax.f32 %v187_v28, 0.0  ;;  %v220_v48 = vmax.f32 %v188_v29, 0.0  ;;  %v221_v49 = vmax.f32 %v189_v31, 0.0 }
  0x8a   :  { %v286_v52 = vrot.slane %v214_v32, 4  ;;  %v292_v53 = vrot.slane %v215_v37, 4  ;;  %v298_v54 = vrot.slane %v216_v38, 4  ;;  %v304_v55 = vrot.slane %v217_v39, 4 }
  0x8b   :  { %v310_v60 = vrot.slane %v218_v46, 4  ;;  %v316_v2 = vrot.slane %v219_v47, 4  ;;  %v322_v3 = vrot.slane %v220_v48, 4  ;;  %v328_v4 = vrot.slane %v221_v49, 4 }
  0x8c   :  { %v287_v5 = vmax.f32 %v214_v32, %v286_v52  ;;  %v293_v6 = vmax.f32 %v215_v37, %v292_v53  ;;  %v299_v7 = vmax.f32 %v216_v38, %v298_v54  ;;  %v305_v8 = vmax.f32 %v217_v39, %v304_v55  ;;  %v1057_v32 = vpop.permute.xlu1 %99 }
  0x8d   :  { %v311_v9 = vmax.f32 %v218_v46, %v310_v60  ;;  %v317_v14 = vmax.f32 %v219_v47, %v316_v2  ;;  %v323_v22 = vmax.f32 %v220_v48, %v322_v3  ;;  %v329_v23 = vmax.f32 %v221_v49, %v328_v4 }
  0x8e   :  { %v288_v24 = vrot.slane %v287_v5, 2  ;;  %v294_v25 = vrot.slane %v293_v6, 2  ;;  %v300_v27 = vrot.slane %v299_v7, 2  ;;  %v306_v28 = vrot.slane %v305_v8, 2 }
  0x8f   :  { %v312_v29 = vrot.slane %v311_v9, 2  ;;  %v318_v31 = vrot.slane %v317_v14, 2  ;;  %v324_v1 = vrot.slane %v323_v22, 2  ;;  %v330_v0 = vrot.slane %v329_v23, 2 }
  0x90   :  { %v289_v63 = vmax.f32 %v287_v5, %v288_v24  ;;  %v295_v62 = vmax.f32 %v293_v6, %v294_v25  ;;  %v301_v59 = vmax.f32 %v299_v7, %v300_v27  ;;  %v307_v58 = vmax.f32 %v305_v8, %v306_v28 }
  0x91   :  { %v313_v37 = vmax.f32 %v311_v9, %v312_v29  ;;  %v319_v38 = vmax.f32 %v317_v14, %v318_v31  ;;  %v325_v39 = vmax.f32 %v323_v22, %v324_v1  ;;  %v331_v46 = vmax.f32 %v329_v23, %v330_v0  ;;  %v168_v22 = vpop.permute.xlu1 %167 }
  0x92   :  { %v290_v47 = vrot.slane %v289_v63, 1  ;;  %v296_v48 = vrot.slane %v295_v62, 1  ;;  %v302_v49 = vrot.slane %v301_v59, 1  ;;  %v308_v52 = vrot.slane %v307_v58, 1 }
  0x93   :  { %v314_v53 = vrot.slane %v313_v37, 1  ;;  %v320_v54 = vrot.slane %v319_v38, 1  ;;  %v326_v55 = vrot.slane %v325_v39, 1  ;;  %v332_v60 = vrot.slane %v331_v46, 1 }
  0x94   :  { %v291_v2 = vmax.f32 %v289_v63, %v290_v47  ;;  %v297_v3 = vmax.f32 %v295_v62, %v296_v48  ;;  %v303_v4 = vmax.f32 %v301_v59, %v302_v49  ;;  %v309_v5 = vmax.f32 %v307_v58, %v308_v52 }
  0x95   :  { %v315_v6 = vmax.f32 %v313_v37, %v314_v53  ;;  %v321_v7 = vmax.f32 %v319_v38, %v320_v54  ;;  %v327_v8 = vmax.f32 %v325_v39, %v326_v55  ;;  %v333_v24 = vmax.f32 %v331_v46, %v332_v60 }
  0x96   :  { %v118_v0 = vmul.f32 %v1035_v61, %v46_v30  ;;  %v119_v1 = vmul.f32 %v1035_v61, %v47_v33  ;;  %v887_v9 = vpack.c.bf16 %v297_v3, %v291_v2  ;;  %v888_v14 = vpack.c.bf16 %v309_v5, %v303_v4 }
  0x97   :  { %v120_v62 = vmul.f32 %v1035_v61, %v48_v34  ;;  %v121_v58 = vmul.f32 %v1035_v61, %v49_v35  ;;  %v889_v59 = vpack.c.bf16 %v321_v7, %v315_v6  ;;  %v890_v63 = vpack.c.bf16 %v333_v24, %v327_v8 }
  0x98   :  { %v122_v30 = vmul.f32 %v1035_v61, %v50_v36  ;;  %v124_v33 = vmul.f32 %v1035_v61, %v52_v41  ;;  %v536_v34 = vrot.slane %v887_v9, %v1009_v43  ;;  %v543_v35 = vrot.slane %v888_v14, %v1009_v43 }
  0x99   :  { %v553_v23 = vrot.slane %v889_v59, %v1009_v43  ;;  %v560_v36 = vrot.slane %v890_v63, %v1009_v43  ;;  %v190_v25 = vadd.f32 %v168_v22, %v118_v0  ;;  %v191_v19 = vadd.f32 %v168_v22, %v119_v1 }
  0x9a   :  { %v192_v27 = vadd.f32 %v168_v22, %v120_v62  ;;  %v193_v40 = vadd.f32 %v168_v22, %v121_v58  ;;  %v194_v28 = vadd.f32 %v168_v22, %v122_v30  ;;  %v195_v29 = vadd.f32 %v168_v22, %v123_v16 }
  0x9b   :  { %v196_v31 = vadd.f32 %v168_v22, %v124_v33  ;;  %v197_v41 = vadd.f32 %v168_v22, %v125_v18  ;;  %v1090_v26 = vmul.f32 %v1057_v32, %v54_v56  ;;  %v1095_v42 = vmul.f32 %v1057_v32, %v55_v57 }
  0x9c   :  { %v1305_v61 = vunpack.c.l.bf16 %v1019_v45  ;;  %v1306_v38 = vunpack.c.h.bf16 %v1019_v45  ;;  %v544_v46 = vcombine.low %v536_v34, %v543_v35  ;;  %v561_v47 = vcombine.low %v553_v23, %v560_v36 }
  0x9d   :  { %v901_v48 = vcombine.low %v543_v35, %v543_v35  ;;  %v902_v56 = vcombine.low %v560_v36, %v560_v36  ;;  %v222_v49 = vmax.f32 %v190_v25, 0.0  ;;  %v223_v52 = vmax.f32 %v191_v19, 0.0 }
  0x9e   :  { %v1100_v37 = vmul.f32 %v1057_v32, %v1305_v61  ;;  %v1105_v39 = vmul.f32 %v1057_v32, %v1306_v38  ;;  %v224_v44 = vmax.f32 %v192_v27, 0.0  ;;  %v225_v53 = vmax.f32 %v193_v40, 0.0 }
  0x9f   :  { %v226_v57 = vmax.f32 %v194_v28, 0.0  ;;  %v227_v54 = vmax.f32 %v195_v29, 0.0  ;;  %v228_v55 = vmax.f32 %v196_v31, 0.0  ;;  %v229_v60 = vmax.f32 %v197_v41, 0.0 }
  0xa0   :  { %v1307_v2 = vunpack.c.l.bf16 %v1024_v50  ;;  %v1308_v45 = vunpack.c.h.bf16 %v1024_v50  ;;  %v1309_v5 = vunpack.c.l.bf16 %v1029_v51  ;;  %v1310_v7 = vunpack.c.h.bf16 %v1029_v51 }
  0xa1   :  { %v1128_v24 = vrot.slane %v544_v46, %v1009_v43  ;;  %v1131_v0 = vrot.slane %v901_v48, %v1009_v43  ;;  %v1134_v50 = vrot.slane %v561_v47, %v1009_v43  ;;  %v1137_v1 = vrot.slane %v902_v56, %v1009_v43 }
  0xa2   :  { %v1110_v3 = vmul.f32 %v1057_v32, %v1307_v2  ;;  %v1115_v4 = vmul.f32 %v1057_v32, %v1308_v45  ;;  %v1120_v6 = vmul.f32 %v1057_v32, %v1309_v5  ;;  %v1125_v8 = vmul.f32 %v1057_v32, %v1310_v7 }
  0xa3   :  { %v334_v9 = vrot.slane %v222_v49, 4  ;;  %v340_v14 = vrot.slane %v223_v52, 4  ;;  %v346_v62 = vrot.slane %v224_v44, 4  ;;  %v352_v58 = vrot.slane %v225_v53, 4 }
  0xa4   :  { %v358_v51 = vrot.slane %v226_v57, 4  ;;  %v364_v59 = vrot.slane %v227_v54, 4  ;;  %v370_v32 = vrot.slane %v228_v55, 4  ;;  %v376_v63 = vrot.slane %v229_v60, 4 }
  0xa5   :  { %v335_v22 = vmax.f32 %v222_v49, %v334_v9  ;;  %v341_v30 = vmax.f32 %v223_v52, %v340_v14  ;;  %v347_v16 = vmax.f32 %v224_v44, %v346_v62  ;;  %v353_v33 = vmax.f32 %v225_v53, %v352_v58 }
  0xa6   :  { %v359_v18 = vmax.f32 %v226_v57, %v358_v51  ;;  %v365_v34 = vmax.f32 %v227_v54, %v364_v59  ;;  %v371_v35 = vmax.f32 %v228_v55, %v370_v32  ;;  %v377_v23 = vmax.f32 %v229_v60, %v376_v63 }
  0xa7   :  { %v336_v36 = vrot.slane %v335_v22, 2  ;;  %v342_v25 = vrot.slane %v341_v30, 2  ;;  %v348_v19 = vrot.slane %v347_v16, 2  ;;  %v354_v27 = vrot.slane %v353_v33, 2 }
  0xa8   :  { %v360_v40 = vrot.slane %v359_v18, 2  ;;  %v366_v28 = vrot.slane %v365_v34, 2  ;;  %v372_v29 = vrot.slane %v371_v35, 2  ;;  %v378_v31 = vrot.slane %v377_v23, 2 }
  0xa9   :  { %v337_v41 = vmax.f32 %v335_v22, %v336_v36  ;;  %v343_v61 = vmax.f32 %v341_v30, %v342_v25  ;;  %v349_v38 = vmax.f32 %v347_v16, %v348_v19  ;;  %v355_v46 = vmax.f32 %v353_v33, %v354_v27 }
  0xaa   :  { %v361_v47 = vmax.f32 %v359_v18, %v360_v40  ;;  %v367_v48 = vmax.f32 %v365_v34, %v366_v28  ;;  %v373_v56 = vmax.f32 %v371_v35, %v372_v29  ;;  %v379_v49 = vmax.f32 %v377_v23, %v378_v31  ;;  %v160_v34 = vpop.permute.xlu0 %159 }
  0xab   :  { %v338_v52 = vrot.slane %v337_v41, 1  ;;  %v344_v44 = vrot.slane %v343_v61, 1  ;;  %v350_v53 = vrot.slane %v349_v38, 1  ;;  %v356_v57 = vrot.slane %v355_v46, 1 }
  0xac   :  { %v362_v54 = vrot.slane %v361_v47, 1  ;;  %v368_v55 = vrot.slane %v367_v48, 1  ;;  %v374_v60 = vrot.slane %v373_v56, 1  ;;  %v380_v2 = vrot.slane %v379_v49, 1 }
  0xad   :  { %v339_v45 = vmax.f32 %v337_v41, %v338_v52  ;;  %v345_v5 = vmax.f32 %v343_v61, %v344_v44  ;;  %v351_v7 = vmax.f32 %v349_v38, %v350_v53  ;;  %v357_v9 = vmax.f32 %v355_v46, %v356_v57 }
  0xae   :  { %v363_v14 = vmax.f32 %v361_v47, %v362_v54  ;;  %v369_v62 = vmax.f32 %v367_v48, %v368_v55  ;;  %v375_v58 = vmax.f32 %v373_v56, %v374_v60  ;;  %v381_v51 = vmax.f32 %v379_v49, %v380_v2 }
  0xaf   :  { %v758_v59 = vunpack.c.l.b16 %v1128_v24  ;;  %v759_v32 = vunpack.c.h.b16 %v1128_v24  ;;  %v891_v63 = vpack.c.bf16 %v345_v5, %v339_v45  ;;  %v892_v22 = vpack.c.bf16 %v357_v9, %v351_v7 }
  0xb0   :  { %v760_v30 = vunpack.c.l.b16 %v1131_v0  ;;  %v761_v16 = vunpack.c.h.b16 %v1131_v0  ;;  %v893_v33 = vpack.c.bf16 %v369_v62, %v363_v14  ;;  %v894_v18 = vpack.c.bf16 %v381_v51, %v375_v58 }
  0xb1   :  { %v762_v35 = vunpack.c.l.b16 %v1134_v50  ;;  %v763_v23 = vunpack.c.h.b16 %v1134_v50  ;;  %v764_v36 = vunpack.c.l.b16 %v1137_v1  ;;  %v765_v25 = vunpack.c.h.b16 %v1137_v1 }
  0xb2   :  { %v570_v19 = vrot.slane %v891_v63, %v1009_v43  ;;  %v577_v24 = vrot.slane %v892_v22, %v1009_v43  ;;  %v587_v27 = vrot.slane %v893_v33, %v1009_v43  ;;  %v594_v40 = vrot.slane %v894_v18, %v1009_v43 }
  0xb3   :  { %v174_v0 = vadd.f32 %v160_v34, %v1041_v10  ;;  %v175_v28 = vadd.f32 %v160_v34, %v1043_v11  ;;  %v176_v29 = vadd.f32 %v160_v34, %v1045_v12  ;;  %v177_v50 = vadd.f32 %v160_v34, %v1047_v13 }
  0xb4   :  { %v178_v31 = vadd.f32 %v160_v34, %v1049_v15  ;;  %v179_v1 = vadd.f32 %v160_v34, %v1051_v20  ;;  %v180_v41 = vadd.f32 %v160_v34, %v1053_v17  ;;  %v181_v61 = vadd.f32 %v160_v34, %v1055_v21 }
  0xb5   :  { %v1159_v38 = vrot.slane %v758_v59, 7  ;;  %v1161_v46 = vrot.slane %v759_v32, 7  ;;  %v1163_v47 = vrot.slane %v760_v30, 7  ;;  %v1165_v10 = vrot.slane %v761_v16, 7 }
  0xb6   :  { %v578_v11 = vcombine.low %v570_v19, %v577_v24  ;;  %v595_v12 = vcombine.low %v587_v27, %v594_v40  ;;  %v903_v48 = vcombine.low %v577_v24, %v577_v24  ;;  %v904_v13 = vcombine.low %v594_v40, %v594_v40 }
  0xb7   :  { %v206_v56 = vmax.f32 %v174_v0, 0.0  ;;  %v207_v15 = vmax.f32 %v175_v28, 0.0  ;;  %v208_v49 = vmax.f32 %v176_v29, 0.0  ;;  %v209_v20 = vmax.f32 %v177_v50, 0.0 }
  0xb8   :  { %v210_v52 = vmax.f32 %v178_v31, 0.0  ;;  %v211_v17 = vmax.f32 %v179_v1, 0.0  ;;  %v212_v44 = vmax.f32 %v180_v41, 0.0  ;;  %v213_v21 = vmax.f32 %v181_v61, 0.0 }
  0xb9   :  { %v1167_v53 = vrot.slane %v762_v35, 7  ;;  %v1169_v57 = vrot.slane %v763_v23, 7  ;;  %v1171_v54 = vrot.slane %v764_v36, 7  ;;  %v1173_v55 = vrot.slane %v765_v25, 7 }
  0xba   :  { %v1176_v60 = vrot.slane %v578_v11, %v1009_v43  ;;  %v1179_v2 = vrot.slane %v903_v48, %v1009_v43  ;;  %v1182_v45 = vrot.slane %v595_v12, %v1009_v43  ;;  %v1185_v5 = vrot.slane %v904_v13, %v1009_v43 }
  0xbb   :  { %v238_v7 = vrot.slane %v206_v56, 4  ;;  %v244_v9 = vrot.slane %v207_v15, 4  ;;  %v250_v14 = vrot.slane %v208_v49, 4  ;;  %v256_v62 = vrot.slane %v209_v20, 4 }
  0xbc   :  { %v262_v58 = vrot.slane %v210_v52, 4  ;;  %v268_v51 = vrot.slane %v211_v17, 4  ;;  %v274_v59 = vrot.slane %v212_v44, 4  ;;  %v280_v32 = vrot.slane %v213_v21, 4 }
  0xbd   :  { %v239_v63 = vmax.f32 %v206_v56, %v238_v7  ;;  %v245_v22 = vmax.f32 %v207_v15, %v244_v9  ;;  %v251_v30 = vmax.f32 %v208_v49, %v250_v14  ;;  %v257_v16 = vmax.f32 %v209_v20, %v256_v62 }
  0xbe   :  { %v263_v33 = vmax.f32 %v210_v52, %v262_v58  ;;  %v269_v18 = vmax.f32 %v211_v17, %v268_v51  ;;  %v275_v34 = vmax.f32 %v212_v44, %v274_v59  ;;  %v281_v35 = vmax.f32 %v213_v21, %v280_v32 }
  0xbf   :  { %v240_v23 = vrot.slane %v239_v63, 2  ;;  %v246_v36 = vrot.slane %v245_v22, 2  ;;  %v252_v25 = vrot.slane %v251_v30, 2  ;;  %v258_v19 = vrot.slane %v257_v16, 2 }
  0xc0   :  { %v264_v24 = vrot.slane %v263_v33, 2  ;;  %v270_v27 = vrot.slane %v269_v18, 2  ;;  %v276_v40 = vrot.slane %v275_v34, 2  ;;  %v282_v0 = vrot.slane %v281_v35, 2 }
  0xc1   :  { %v241_v28 = vmax.f32 %v239_v63, %v240_v23  ;;  %v247_v29 = vmax.f32 %v245_v22, %v246_v36  ;;  %v253_v50 = vmax.f32 %v251_v30, %v252_v25  ;;  %v259_v31 = vmax.f32 %v257_v16, %v258_v19  ;;  %v172_v36 = vpop.permute.xlu1 %171 }
  0xc2   :  { %v265_v1 = vmax.f32 %v263_v33, %v264_v24  ;;  %v271_v41 = vmax.f32 %v269_v18, %v270_v27  ;;  %v277_v61 = vmax.f32 %v275_v34, %v276_v40  ;;  %v283_v11 = vmax.f32 %v281_v35, %v282_v0 }
  0xc3   :  { %v242_v12 = vrot.slane %v241_v28, 1  ;;  %v248_v48 = vrot.slane %v247_v29, 1  ;;  %v254_v13 = vrot.slane %v253_v50, 1  ;;  %v260_v56 = vrot.slane %v259_v31, 1 }
  0xc4   :  { %v266_v15 = vrot.slane %v265_v1, 1  ;;  %v272_v49 = vrot.slane %v271_v41, 1  ;;  %v278_v20 = vrot.slane %v277_v61, 1  ;;  %v284_v52 = vrot.slane %v283_v11, 1 }
  0xc5   :  { %v243_v17 = vmax.f32 %v241_v28, %v242_v12  ;;  %v249_v44 = vmax.f32 %v247_v29, %v248_v48  ;;  %v255_v21 = vmax.f32 %v253_v50, %v254_v13  ;;  %v261_v7 = vmax.f32 %v259_v31, %v260_v56 }
  0xc6   :  { %v267_v9 = vmax.f32 %v265_v1, %v266_v15  ;;  %v273_v14 = vmax.f32 %v271_v41, %v272_v49  ;;  %v279_v62 = vmax.f32 %v277_v61, %v278_v20  ;;  %v285_v58 = vmax.f32 %v283_v11, %v284_v52 }
  0xc7   :  { %v766_v51 = vunpack.c.l.b16 %v1176_v60  ;;  %v767_v59 = vunpack.c.h.b16 %v1176_v60  ;;  %v883_v32 = vpack.c.bf16 %v249_v44, %v243_v17  ;;  %v884_v63 = vpack.c.bf16 %v261_v7, %v255_v21 }
  0xc8   :  { %v768_v22 = vunpack.c.l.b16 %v1179_v2  ;;  %v769_v30 = vunpack.c.h.b16 %v1179_v2  ;;  %v885_v16 = vpack.c.bf16 %v273_v14, %v267_v9  ;;  %v886_v33 = vpack.c.bf16 %v285_v58, %v279_v62 }
  0xc9   :  { %v770_v18 = vunpack.c.l.b16 %v1182_v45  ;;  %v771_v34 = vunpack.c.h.b16 %v1182_v45  ;;  %v502_v35 = vrot.slane %v883_v32, %v1009_v43  ;;  %v509_v23 = vrot.slane %v884_v63, %v1009_v43 }
  0xca   :  { %v772_v60 = vunpack.c.l.b16 %v1185_v5  ;;  %v773_v25 = vunpack.c.h.b16 %v1185_v5  ;;  %v519_v19 = vrot.slane %v885_v16, %v1009_v43  ;;  %v526_v2 = vrot.slane %v886_v33, %v1009_v43 }
  0xcb   :  { %v1199_v24 = vrot.slane %v766_v51, 6  ;;  %v1201_v27 = vrot.slane %v767_v59, 6  ;;  %v510_v40 = vcombine.low %v502_v35, %v509_v23  ;;  %v899_v45 = vcombine.low %v509_v23, %v509_v23 }
  0xcc   :  { %v1203_v0 = vrot.slane %v768_v22, 6  ;;  %v1205_v28 = vrot.slane %v769_v30, 6  ;;  %v527_v29 = vcombine.low %v519_v19, %v526_v2  ;;  %v198_v50 = vadd.f32 %v172_v36, %v1090_v26 }
  0xcd   :  { %v637_v31 = vrot.slane %v510_v40, %v1009_v43  ;;  %v199_v5 = vadd.f32 %v172_v36, %v1095_v42  ;;  %v200_v1 = vadd.f32 %v172_v36, %v1100_v37  ;;  %v201_v41 = vadd.f32 %v172_v36, %v1105_v39 }
  0xce   :  { %v202_v61 = vadd.f32 %v172_v36, %v1110_v3  ;;  %v203_v11 = vadd.f32 %v172_v36, %v1115_v4  ;;  %v204_v12 = vadd.f32 %v172_v36, %v1120_v6  ;;  %v205_v48 = vadd.f32 %v172_v36, %v1125_v8 }
  0xcf   :  { %v1216_v13 = vrot.slane %v770_v18, 6  ;;  %v1218_v56 = vrot.slane %v771_v34, 6  ;;  %v1221_v26 = vrot.slane %v899_v45, %v1009_v43  ;;  %v900_v42 = vcombine.low %v526_v2, %v526_v2 }
  0xd0   :  { %v1223_v15 = vrot.slane %v772_v60, 6  ;;  %v1226_v37 = vrot.slane %v527_v29, %v1009_v43  ;;  %v750_v39 = vunpack.c.l.b16 %v637_v31  ;;  %v751_v3 = vunpack.c.h.b16 %v637_v31 }
  0xd1   :  { %v230_v4 = vmax.f32 %v198_v50, 0.0  ;;  %v231_v49 = vmax.f32 %v199_v5, 0.0  ;;  %v232_v6 = vmax.f32 %v200_v1, 0.0  ;;  %v233_v20 = vmax.f32 %v201_v41, 0.0 }
  0xd2   :  { %v234_v8 = vmax.f32 %v202_v61, 0.0  ;;  %v235_v52 = vmax.f32 %v203_v11, 0.0  ;;  %v236_v17 = vmax.f32 %v204_v12, 0.0  ;;  %v237_v44 = vmax.f32 %v205_v48, 0.0 }
  0xd3   :  { %v1228_v21 = vrot.slane %v773_v25, 6  ;;  %v1231_v7 = vrot.slane %v900_v42, %v1009_v43  ;;  %v752_v9 = vunpack.c.l.b16 %v1221_v26  ;;  %v753_v14 = vunpack.c.h.b16 %v1221_v26 }
  0xd4   :  { %v754_v62 = vunpack.c.l.b16 %v1226_v37  ;;  %v755_v58 = vunpack.c.h.b16 %v1226_v37  ;;  %v784_v51 = vsel %vm783_vm0, %v1159_v38, %v750_v39  ;;  %v792_v59 = vsel %vm783_vm0, %v1161_v46, %v751_v3 }
  0xd5   :  { %v382_v32 = vrot.slane %v230_v4, 4  ;;  %v388_v63 = vrot.slane %v231_v49, 4  ;;  %v394_v22 = vrot.slane %v232_v6, 4  ;;  %v400_v30 = vrot.slane %v233_v20, 4 }
  0xd6   :  { %v406_v16 = vrot.slane %v234_v8, 4  ;;  %v412_v33 = vrot.slane %v235_v52, 4  ;;  %v418_v18 = vrot.slane %v236_v17, 4  ;;  %v424_v34 = vrot.slane %v237_v44, 4 }
  0xd7   :  { %v383_v35 = vmax.f32 %v230_v4, %v382_v32  ;;  %v389_v23 = vmax.f32 %v231_v49, %v388_v63  ;;  %v395_v36 = vmax.f32 %v232_v6, %v394_v22  ;;  %v401_v60 = vmax.f32 %v233_v20, %v400_v30 }
  0xd8   :  { %v407_v25 = vmax.f32 %v234_v8, %v406_v16  ;;  %v413_v19 = vmax.f32 %v235_v52, %v412_v33  ;;  %v419_v2 = vmax.f32 %v236_v17, %v418_v18  ;;  %v425_v38 = vmax.f32 %v237_v44, %v424_v34 }
  0xd9   :  { %v384_v40 = vrot.slane %v383_v35, 2  ;;  %v390_v45 = vrot.slane %v389_v23, 2  ;;  %v396_v46 = vrot.slane %v395_v36, 2  ;;  %v402_v29 = vrot.slane %v401_v60, 2 }
  0xda   :  { %v408_v50 = vrot.slane %v407_v25, 2  ;;  %v414_v31 = vrot.slane %v413_v19, 2  ;;  %v420_v5 = vrot.slane %v419_v2, 2  ;;  %v426_v1 = vrot.slane %v425_v38, 2 }
  0xdb   :  { %v385_v41 = vmax.f32 %v383_v35, %v384_v40  ;;  %v391_v61 = vmax.f32 %v389_v23, %v390_v45  ;;  %v397_v11 = vmax.f32 %v395_v36, %v396_v46  ;;  %v403_v12 = vmax.f32 %v401_v60, %v402_v29 }
  0xdc   :  { %v409_v48 = vmax.f32 %v407_v25, %v408_v50  ;;  %v415_v26 = vmax.f32 %v413_v19, %v414_v31  ;;  %v421_v42 = vmax.f32 %v419_v2, %v420_v5  ;;  %v427_v39 = vmax.f32 %v425_v38, %v426_v1 }
  0xdd   :  { %v386_v3 = vrot.slane %v385_v41, 1  ;;  %v392_v4 = vrot.slane %v391_v61, 1  ;;  %v398_v49 = vrot.slane %v397_v11, 1  ;;  %v404_v6 = vrot.slane %v403_v12, 1 }
  0xde   :  { %v410_v20 = vrot.slane %v409_v48, 1  ;;  %v416_v8 = vrot.slane %v415_v26, 1  ;;  %v422_v52 = vrot.slane %v421_v42, 1  ;;  %v428_v17 = vrot.slane %v427_v39, 1 }
  0xdf   :  { %v387_v44 = vmax.f32 %v385_v41, %v386_v3  ;;  %v393_v32 = vmax.f32 %v391_v61, %v392_v4  ;;  %v399_v63 = vmax.f32 %v397_v11, %v398_v49  ;;  %v405_v22 = vmax.f32 %v403_v12, %v404_v6 }
  0xe0   :  { %v411_v30 = vmax.f32 %v409_v48, %v410_v20  ;;  %v417_v16 = vmax.f32 %v415_v26, %v416_v8  ;;  %v423_v33 = vmax.f32 %v421_v42, %v422_v52  ;;  %v429_v18 = vmax.f32 %v427_v39, %v428_v17 }
  0xe1   :  { %v756_v34 = vunpack.c.l.b16 %v1231_v7  ;;  %v757_v35 = vunpack.c.h.b16 %v1231_v7  ;;  %v895_v23 = vpack.c.bf16 %v393_v32, %v387_v44  ;;  %v896_v36 = vpack.c.bf16 %v405_v22, %v399_v63 }
  0xe2   :  { %v798_v60 = vsel %vm783_vm0, %v1163_v47, %v752_v9  ;;  %v804_v25 = vsel %vm783_vm0, %v1165_v10, %v753_v14  ;;  %v897_v19 = vpack.c.bf16 %v417_v16, %v411_v30  ;;  %v898_v2 = vpack.c.bf16 %v429_v18, %v423_v33 }
  0xe3   :  { %v787_v38 = vsel %vm786_vm1, %v1199_v24, %v784_v51  ;;  %v794_v40 = vsel %vm786_vm1, %v1201_v27, %v792_v59  ;;  %v604_v45 = vrot.slane %v895_v23, %v1009_v43  ;;  %v611_v7 = vrot.slane %v896_v36, %v1009_v43 }
  0xe4   :  { %v810_v47 = vsel %vm783_vm0, %v1167_v53, %v754_v62  ;;  %v816_v10 = vsel %vm783_vm0, %v1169_v57, %v755_v58  ;;  %v621_v9 = vrot.slane %v897_v19, %v1009_v43  ;;  %v628_v24 = vrot.slane %v898_v2, %v1009_v43 }
  0xe5   :  { %v822_v27 = vsel %vm783_vm0, %v1171_v54, %v756_v34  ;;  %v828_v14 = vsel %vm783_vm0, %v1173_v55, %v757_v35  ;;  %v612_v51 = vcombine.low %v604_v45, %v611_v7  ;;  %v905_v59 = vcombine.low %v611_v7, %v611_v7 }
  0xe6   :  { %v800_v53 = vsel %vm786_vm1, %v1203_v0, %v798_v60  ;;  %v806_v37 = vsel %vm786_vm1, %v1205_v28, %v804_v25  ;;  %v629_v62 = vcombine.low %v621_v9, %v628_v24  ;;  %v906_v57 = vcombine.low %v628_v24, %v628_v24 }
  0xe7   :  { %v812_v58 = vsel %vm786_vm1, %v1216_v13, %v810_v47  ;;  %v818_v46 = vsel %vm786_vm1, %v1218_v56, %v816_v10  ;;  %v727_v54 = vrot.slane %v612_v51, %v1009_v43  ;;  %v734_v55 = vrot.slane %v905_v59, %v1009_v43 }
  0xe8   :  { %v824_v29 = vsel %vm786_vm1, %v1223_v15, %v822_v27  ;;  %v830_v0 = vsel %vm786_vm1, %v1228_v21, %v828_v14  ;;  %v742_v28 = vrot.slane %v629_v62, %v1009_v43  ;;  %v749_v50 = vrot.slane %v906_v57, %v1009_v43 }
  0xe9   :  { %v774_v31 = vunpack.c.l.b16 %v727_v54  ;;  %v775_v5 = vunpack.c.h.b16 %v727_v54  ;;  %v776_v13 = vunpack.c.l.b16 %v734_v55  ;;  %v777_v1 = vunpack.c.h.b16 %v734_v55 }
  0xea   :  { %v778_v41 = vunpack.c.l.b16 %v742_v28  ;;  %v779_v56 = vunpack.c.h.b16 %v742_v28  ;;  %v780_v61 = vunpack.c.l.b16 %v749_v50  ;;  %v781_v11 = vunpack.c.h.b16 %v749_v50 }
  0xeb   :  { %v788_v12 = vrot.slane %v774_v31, 5  ;;  %v795_v48 = vrot.slane %v775_v5, 5  ;;  %v801_v26 = vrot.slane %v776_v13, 5  ;;  %v807_v42 = vrot.slane %v777_v1, 5 }
  0xec   :  { %v813_v15 = vrot.slane %v778_v41, 5  ;;  %v819_v39 = vrot.slane %v779_v56, 5  ;;  %v825_v3 = vrot.slane %v780_v61, 5  ;;  %v831_v21 = vrot.slane %v781_v11, 5 }
  0xed   :  { %v790_v4 = vsel %vm789_vm2, %v788_v12, %v787_v38  ;;  %v796_v49 = vsel %vm789_vm2, %v795_v48, %v794_v40  ;;  %v802_v6 = vsel %vm789_vm2, %v801_v26, %v800_v53  ;;  %v808_v20 = vsel %vm789_vm2, %v807_v42, %v806_v37 }
  0xee   :  { %v814_v8 = vsel %vm789_vm2, %v813_v15, %v812_v58  ;;  %v820_v52 = vsel %vm789_vm2, %v819_v39, %v818_v46  ;;  %v826_v17 = vsel %vm789_vm2, %v825_v3, %v824_v29  ;;  %v832_v44 = vsel %vm789_vm2, %v831_v21, %v830_v0 }
  0xef   :  { %v833_v32 = vpack.c.b16 %v796_v49, %v790_v4  ;;  %v834_v63 = vpack.c.b16 %v808_v20, %v802_v6  ;;  %v835_v22 = vpack.c.b16 %v820_v52, %v814_v8  ;;  %v836_v30 = vpack.c.b16 %v832_v44, %v826_v17 }
  0xf1   :  { %v843_v16 = vrot.slane %v833_v32, %v1009_v43  ;;  %v850_v33 = vrot.slane %v834_v63, %v1009_v43  ;;  %v858_v18 = vrot.slane %v835_v22, %v1009_v43  ;;  %v865_v34 = vrot.slane %v836_v30, %v1009_v43 }
  0xf3   :  { %v851_v35 = vcombine.low %v843_v16, %v850_v33  ;;  %v866_v23 = vcombine.low %v858_v18, %v865_v34 }
  0xf5   :  { %869 = vst [vmem:[%s1304_s3] sm:$0xff] %v851_v35  ;;  %870 = vst [vmem:[%s1304_s3 + $0x8] sm:$0xff] %v866_v23 }

// kernel: mri3d_autoencoder_forward.14
= control target key start
LH: loop header
LB: loop body
LE: loop exit
PB: predicated region body
PF: predicated region fallthrough
CT: control target
= control target key end

     0   :  { %vm356_vm0 = vcmask 1045504   ;;  %v693_v3 = vmov 0   ;;  %vm352_vm1 = vcmask 883712   ;;  %vm607_vm2 = vcmask 7168   ;;  %s931_s0 = inlined_call_operand.vmem [shape: bf16[108,1024], index: 0, kind: input, shape index: {}]   ;;  %s932_s2 = inlined_call_operand.vmem [shape: f32[8,1], index: 2, kind: input, shape index: {}]   ;;  %s933_s1 = inlined_call_operand.vmem [shape: bf16[8,108], index: 1, kind: input, shape index: {}]   ;;  %s934_s3 = inlined_call_operand.vmem [shape: bf16[8,1024], index: 3, kind: output, shape index: {0}]   ;;  %s935_s4 = inlined_call_operand.vmem [shape: f32[1,8,2], index: 4, kind: output, shape index: {1}]  }
   0x1   :  { %v66_v0 = vld [vmem:[%s931_s0 + $0x180] sm:$0xff]  ;;  %v67_v2 = vld [vmem:[%s931_s0 + $0x188] sm:$0xff]  ;;  %413 = vmatprep.mubr.bf16.mxu0 %v693_v3  ;;  %454 = vmatprep.mubr.bf16.mxu1 %v693_v3  ;;  %v68_v58 = vld [vmem:[%s931_s0 + $0x190] sm:$0xff]  ;;  %vm609_vm3 = vcmask 15360  }
   0x2   :  { %v70_v1 = vld [vmem:[%s931_s0 + $0x1a0] sm:$0x33]  ;;  %v71_v5 = vld [vmem:[%s931_s0 + $0x1a8] sm:$0x33]  ;;  %692 = vset.pattern.permute.xlu0 %v693_v3  ;;  %v72_v59 = vld [vmem:[%s931_s0 + $0x1b0] sm:$0x33] }
   0x3   :  { %v668_v4 = vcombine.high %v66_v0, %v70_v1  ;;  %v667_v6 = vcombine.low %v66_v0, %v70_v1  ;;  %v58_v7 = vld [vmem:[%s931_s0 + $0x140] sm:$0xff]  ;;  %v670_v9 = vcombine.high %v67_v2, %v71_v5  ;;  %v669_v10 = vcombine.low %v67_v2, %v71_v5  ;;  %v59_v12 = vld [vmem:[%s931_s0 + $0x148] sm:$0xff]  ;;  %v69_v60 = vld [vmem:[%s931_s0 + $0x198] sm:$0xff] }
   0x4   :  { %v62_v8 = vld [vmem:[%s931_s0 + $0x160] sm:$0xff]  ;;  %v63_v13 = vld [vmem:[%s931_s0 + $0x168] sm:$0xff]  ;;  %v73_v61 = vld [vmem:[%s931_s0 + $0x1b8] sm:$0x33]  ;;  %v672_v0 = vcombine.high %v68_v58, %v72_v59  ;;  %v671_v1 = vcombine.low %v68_v58, %v72_v59 }
   0x5   :  { %v660_v11 = vcombine.high %v58_v7, %v62_v8  ;;  %v50_v14 = vld [vmem:[%s931_s0 + $0x100] sm:$0xff]  ;;  %675 = vmatprep.subr.msk.bf16.mxu0 %vm356_vm0, %v668_v4  ;;  %v358_v15 = vsel %vm356_vm0, %v667_v6, 0  ;;  %v662_v16 = vcombine.high %v59_v12, %v63_v13  ;;  %v51_v18 = vld [vmem:[%s931_s0 + $0x108] sm:$0xff]  ;;  %677 = vmatprep.subr.msk.bf16.mxu1 %vm356_vm0, %v670_v9  ;;  %v364_v20 = vsel %vm356_vm0, %v669_v10, 0  ;;  %v60_v5 = vld [vmem:[%s931_s0 + $0x150] sm:$0xff] }
   0x6   :  { %v54_v17 = vld [vmem:[%s931_s0 + $0x120] sm:$0xff]  ;;  %v55_v19 = vld [vmem:[%s931_s0 + $0x128] sm:$0xff]  ;;  %384 = vmatpush1.bf16.msra.mxu0 %v358_v15  ;;  %v659_v21 = vcombine.low %v58_v7, %v62_v8  ;;  %425 = vmatpush1.bf16.msra.mxu1 %v364_v20  ;;  %v661_v22 = vcombine.low %v59_v12, %v63_v13  ;;  %v674_v2 = vcombine.high %v69_v60, %v73_v61  ;;  %v64_v6 = vld [vmem:[%s931_s0 + $0x170] sm:$0xff]  ;;  %v370_v10 = vsel %vm356_vm0, %v671_v1, 0 }
   0x7   :  { %385 = vmatprep.subr.bf16.mxu0 %v660_v11  ;;  %v652_v23 = vcombine.high %v50_v14, %v54_v17  ;;  %426 = vmatprep.subr.bf16.mxu1 %v662_v16  ;;  %v654_v24 = vcombine.high %v51_v18, %v55_v19  ;;  %v42_v25 = vld [vmem:[%s931_s0 + $0xc0] sm:$0xff]  ;;  %v43_v27 = vld [vmem:[%s931_s0 + $0xc8] sm:$0xff]  ;;  %v651_v29 = vcombine.low %v50_v14, %v54_v17  ;;  %v61_v7 = vld [vmem:[%s931_s0 + $0x158] sm:$0xff] }
   0x8   :  { %v46_v26 = vld [vmem:[%s931_s0 + $0xe0] sm:$0xff]  ;;  %v47_v28 = vld [vmem:[%s931_s0 + $0xe8] sm:$0xff]  ;;  %v653_v30 = vcombine.low %v51_v18, %v55_v19  ;;  %v673_v4 = vcombine.low %v69_v60, %v73_v61  ;;  %v65_v8 = vld [vmem:[%s931_s0 + $0x178] sm:$0xff]  ;;  %v664_v11 = vcombine.high %v60_v5, %v64_v6  ;;  %v663_v18 = vcombine.low %v60_v5, %v64_v6 }
   0x9   :  { %v644_v31 = vcombine.high %v42_v25, %v46_v26  ;;  %v646_v32 = vcombine.high %v43_v27, %v47_v28  ;;  %v34_v33 = vld [vmem:[%s931_s0 + $0x80] sm:$0xff]  ;;  %v35_v35 = vld [vmem:[%s931_s0 + $0x88] sm:$0xff]  ;;  %v643_v37 = vcombine.low %v42_v25, %v46_v26  ;;  %v645_v38 = vcombine.low %v43_v27, %v47_v28  ;;  %v52_v14 = vld [vmem:[%s931_s0 + $0x110] sm:$0xff] }
   0xa   :  { %386 = vmatpush1.bf16.msra.mxu0 %v659_v21  ;;  %427 = vmatpush1.bf16.msra.mxu1 %v661_v22  ;;  %v38_v34 = vld [vmem:[%s931_s0 + $0xa0] sm:$0xff]  ;;  %v39_v36 = vld [vmem:[%s931_s0 + $0xa8] sm:$0xff]  ;;  %v376_v12 = vsel %vm356_vm0, %v673_v4, 0  ;;  %v666_v13 = vcombine.high %v61_v7, %v65_v8  ;;  %v56_v15 = vld [vmem:[%s931_s0 + $0x130] sm:$0xff]  ;;  %v665_v19 = vcombine.low %v61_v7, %v65_v8 }
   0xb   :  { %387 = vmatprep.subr.bf16.mxu0 %v652_v23  ;;  %428 = vmatprep.subr.bf16.mxu1 %v654_v24  ;;  %v636_v39 = vcombine.high %v34_v33, %v38_v34  ;;  %v638_v40 = vcombine.high %v35_v35, %v39_v36  ;;  %v26_v41 = vld [vmem:[%s931_s0 + $0x40] sm:$0xff]  ;;  %v27_v43 = vld [vmem:[%s931_s0 + $0x48] sm:$0xff]  ;;  %v635_v45 = vcombine.low %v34_v33, %v38_v34  ;;  %v53_v16 = vld [vmem:[%s931_s0 + $0x118] sm:$0xff] }
   0xc   :  { %v30_v42 = vld [vmem:[%s931_s0 + $0x60] sm:$0xff]  ;;  %v31_v44 = vld [vmem:[%s931_s0 + $0x68] sm:$0xff]  ;;  %v637_v46 = vcombine.low %v35_v35, %v39_v36  ;;  %v57_v17 = vld [vmem:[%s931_s0 + $0x138] sm:$0xff]  ;;  %v656_v20 = vcombine.high %v52_v14, %v56_v15  ;;  %v655_v26 = vcombine.low %v52_v14, %v56_v15 }
   0xd   :  { %v628_v47 = vcombine.high %v26_v41, %v30_v42  ;;  %v630_v48 = vcombine.high %v27_v43, %v31_v44  ;;  %v18_v49 = vld [vmem:[%s931_s0] sm:$0xff]  ;;  %v19_v51 = vld [vmem:[%s931_s0 + $0x8] sm:$0xff]  ;;  %v627_v54 = vcombine.low %v26_v41, %v30_v42  ;;  %v629_v55 = vcombine.low %v27_v43, %v31_v44  ;;  %v44_v22 = vld [vmem:[%s931_s0 + $0xd0] sm:$0xff] }
   0xe   :  { %388 = vmatpush1.bf16.msra.mxu0 %v651_v29  ;;  %429 = vmatpush1.bf16.msra.mxu1 %v653_v30  ;;  %v22_v50 = vld [vmem:[%s931_s0 + $0x20] sm:$0xff]  ;;  %v23_v52 = vld [vmem:[%s931_s0 + $0x28] sm:$0xff]  ;;  %v658_v21 = vcombine.high %v53_v16, %v57_v17  ;;  %v48_v23 = vld [vmem:[%s931_s0 + $0xf0] sm:$0xff]  ;;  %v657_v27 = vcombine.low %v53_v16, %v57_v17 }
   0xf   :  { %389 = vmatprep.subr.bf16.mxu0 %v644_v31  ;;  %430 = vmatprep.subr.bf16.mxu1 %v646_v32  ;;  %v74_v53 = vld [vmem:[%s932_s2] sm:$0xff]  ;;  %v620_v56 = vcombine.high %v18_v49, %v22_v50  ;;  %v622_v57 = vcombine.high %v19_v51, %v23_v52  ;;  %v619_v62 = vcombine.low %v18_v49, %v22_v50  ;;  %v45_v24 = vld [vmem:[%s931_s0 + $0xd8] sm:$0xff]  ;;  %v36_v30 = vld [vmem:[%s931_s0 + $0x90] sm:$0xff] }
  0x10   :  { %77 = vperm.xlu0 %692, %v74_v53   ;;  %v621_v63 = vcombine.low %v19_v51, %v23_v52  ;;  %v840_v9 = vld [vmem:[%s933_s1] sm:$0xf]  ;;  %v49_v25 = vld [vmem:[%s931_s0 + $0xf8] sm:$0xff]  ;;  %v648_v28 = vcombine.high %v44_v22, %v48_v23  ;;  %v40_v31 = vld [vmem:[%s931_s0 + $0xb0] sm:$0xff]  ;;  %v647_v33 = vcombine.low %v44_v22, %v48_v23 }
  0x11   :  { %v650_v29 = vcombine.high %v45_v24, %v49_v25  ;;  %v41_v32 = vld [vmem:[%s931_s0 + $0xb8] sm:$0xff]  ;;  %v649_v34 = vcombine.low %v45_v24, %v49_v25  ;;  %v640_v35 = vcombine.high %v36_v30, %v40_v31  ;;  %v639_v41 = vcombine.low %v36_v30, %v40_v31 }
  0x12   :  { %390 = vmatpush1.bf16.msra.mxu0 %v643_v37  ;;  %431 = vmatpush1.bf16.msra.mxu1 %v645_v38  ;;  %v28_v37 = vld [vmem:[%s931_s0 + $0x50] sm:$0xff] }
  0x13   :  { %391 = vmatprep.subr.bf16.mxu0 %v636_v39  ;;  %432 = vmatprep.subr.bf16.mxu1 %v638_v40  ;;  %v32_v38 = vld [vmem:[%s931_s0 + $0x70] sm:$0xff]  ;;  %v29_v39 = vld [vmem:[%s931_s0 + $0x58] sm:$0xff] }
  0x14   :  { %v33_v40 = vld [vmem:[%s931_s0 + $0x78] sm:$0xff]  ;;  %v632_v43 = vcombine.high %v28_v37, %v32_v38  ;;  %v631_v49 = vcombine.low %v28_v37, %v32_v38 }
  0x15   :  { %v634_v44 = vcombine.high %v29_v39, %v33_v40  ;;  %v633_v50 = vcombine.low %v29_v39, %v33_v40 }
  0x16   :  { %392 = vmatpush1.bf16.msra.mxu0 %v635_v45  ;;  %433 = vmatpush1.bf16.msra.mxu1 %v637_v46  ;;  %v20_v45 = vld [vmem:[%s931_s0 + $0x10] sm:$0xff] }
  0x17   :  { %393 = vmatprep.subr.bf16.mxu0 %v628_v47  ;;  %434 = vmatprep.subr.bf16.mxu1 %v630_v48  ;;  %v24_v46 = vld [vmem:[%s931_s0 + $0x30] sm:$0xff]  ;;  %v21_v47 = vld [vmem:[%s931_s0 + $0x18] sm:$0xff] }
  0x18   :  { %v25_v48 = vld [vmem:[%s931_s0 + $0x38] sm:$0xff]  ;;  %v624_v51 = vcombine.high %v20_v45, %v24_v46  ;;  %v623_v53 = vcombine.low %v20_v45, %v24_v46 }
  0x19   :  { %v626_v52 = vcombine.high %v21_v47, %v25_v48 }
  0x1a   :  { %394 = vmatpush1.bf16.msra.mxu0 %v627_v54  ;;  %435 = vmatpush1.bf16.msra.mxu1 %v629_v55  ;;  %v625_v54 = vcombine.low %v21_v47, %v25_v48 }
  0x1b   :  { %395 = vmatprep.subr.bf16.mxu0 %v620_v56  ;;  %436 = vmatprep.subr.bf16.mxu1 %v622_v57 }
  0x1e   :  { %396 = vmatpush1.bf16.msra.mxu0 %v619_v62  ;;  %437 = vmatpush1.bf16.msra.mxu1 %v621_v63 }
  0x1f   :  { %679 = vmatprep.subr.msk.bf16.mxu0 %vm356_vm0, %v672_v0  ;;  %681 = vmatprep.subr.msk.bf16.mxu1 %vm356_vm0, %v674_v2 }
  0x21   :  { %676 = vmatmul.mubr.msk.bf16.vlgmr.msra.gmra.mxu0 %vm352_vm1, %v840_v9  ;;  %678 = vmatmul.mubr.msk.bf16.vlgmr.msra.gmra.mxu1 %vm352_vm1, %v840_v9 }
  0x22   :  { %466 = vmatpush1.bf16.msra.mxu0 %v370_v10  ;;  %507 = vmatpush1.bf16.msra.mxu1 %v376_v12 }
  0x23   :  { %467 = vmatprep.subr.bf16.mxu0 %v664_v11  ;;  %508 = vmatprep.subr.bf16.mxu1 %v666_v13 }
  0x24   :  { %495 = vmatprep.mubr.bf16.mxu0 %v693_v3  ;;  %536 = vmatprep.mubr.bf16.mxu1 %v693_v3  ;;  %v37_v3 = vld [vmem:[%s931_s0 + $0x98] sm:$0xff] }
  0x25   :  { %v642_v36 = vcombine.high %v37_v3, %v41_v32  ;;  %v641_v42 = vcombine.low %v37_v3, %v41_v32 }
  0x26   :  { %468 = vmatpush1.bf16.msra.mxu0 %v663_v18  ;;  %509 = vmatpush1.bf16.msra.mxu1 %v665_v19 }
  0x27   :  { %469 = vmatprep.subr.bf16.mxu0 %v656_v20  ;;  %510 = vmatprep.subr.bf16.mxu1 %v658_v21 }
  0x2a   :  { %470 = vmatpush1.bf16.msra.mxu0 %v655_v26  ;;  %511 = vmatpush1.bf16.msra.mxu1 %v657_v27 }
  0x2b   :  { %471 = vmatprep.subr.bf16.mxu0 %v648_v28  ;;  %512 = vmatprep.subr.bf16.mxu1 %v650_v29 }
  0x2e   :  { %472 = vmatpush1.bf16.msra.mxu0 %v647_v33  ;;  %513 = vmatpush1.bf16.msra.mxu1 %v649_v34 }
  0x2f   :  { %473 = vmatprep.subr.bf16.mxu0 %v640_v35  ;;  %514 = vmatprep.subr.bf16.mxu1 %v642_v36 }
  0x32   :  { %474 = vmatpush1.bf16.msra.mxu0 %v639_v41  ;;  %515 = vmatpush1.bf16.msra.mxu1 %v641_v42 }
  0x33   :  { %475 = vmatprep.subr.bf16.mxu0 %v632_v43  ;;  %516 = vmatprep.subr.bf16.mxu1 %v634_v44 }
  0x36   :  { %476 = vmatpush1.bf16.msra.mxu0 %v631_v49  ;;  %517 = vmatpush1.bf16.msra.mxu1 %v633_v50 }
  0x37   :  { %477 = vmatprep.subr.bf16.mxu0 %v624_v51  ;;  %518 = vmatprep.subr.bf16.mxu1 %v626_v52 }
  0x3a   :  { %478 = vmatpush1.bf16.msra.mxu0 %v623_v53  ;;  %519 = vmatpush1.bf16.msra.mxu1 %v625_v54 }
  0x3d   :  { %680 = vmatmul.mubr.msk.bf16.vlgmr.msra.gmra.mxu0 %vm352_vm1, %v840_v9  ;;  %682 = vmatmul.mubr.msk.bf16.vlgmr.msra.gmra.mxu1 %vm352_vm1, %v840_v9 }
  0x8b   :  { %v78_v55 = vpop.permute.xlu0 %77 }
  0xe1   :  { %v415_v56 = vpop.f32.mrf.mxu0  ;;  %v456_v57 = vpop.f32.mrf.mxu1 }
  0xe2   :  { %v416_v58 = vadd.f32 %v415_v56, %v78_v55  ;;  %v457_v60 = vadd.f32 %v456_v57, %v78_v55 }
  0xe3   :  { %v417_v59 = vpop.f32.mrf.mxu0  ;;  %v458_v62 = vpop.f32.mrf.mxu1 }
  0xe4   :  { %v418_v61 = vadd.f32 %v417_v59, %v78_v55  ;;  %v459_v63 = vadd.f32 %v458_v62, %v78_v55  ;;  %v590_v7 = vmul.f32 %v416_v58, %v416_v58  ;;  %v592_v11 = vmul.f32 %v457_v60, %v457_v60 }
  0xe5   :  { %v419_v0 = vpop.f32.mrf.mxu0  ;;  %v460_v2 = vpop.f32.mrf.mxu1 }
  0xe6   :  { %v687_v1 = vpack.c.bf16 %v418_v61, %v416_v58  ;;  %v688_v4 = vpack.c.bf16 %v459_v63, %v457_v60  ;;  %v591_v8 = vmul.f32 %v418_v61, %v418_v61  ;;  %v581_v9 = vadd.f32 %v418_v61, %v416_v58 }
  0xe7   :  { %v420_v5 = vpop.f32.mrf.mxu0  ;;  %v461_v6 = vpop.f32.mrf.mxu1  ;;  %v593_v13 = vmul.f32 %v459_v63, %v459_v63 }
  0xe8   :  { %577 = vst [vmem:[%s934_s3] sm:$0xff] %v687_v1  ;;  %578 = vst [vmem:[%s934_s3 + $0x8] sm:$0xff] %v688_v4  ;;  %v598_v10 = vadd.f32 %v591_v8, %v590_v7  ;;  %v582_v12 = vadd.f32 %v581_v9, %v457_v60 }
  0xea   :  { %v599_v14 = vadd.f32 %v598_v10, %v592_v11  ;;  %v583_v16 = vadd.f32 %v582_v12, %v459_v63 }
  0xec   :  { %v600_v19 = vadd.f32 %v599_v14, %v593_v13 }
  0xfd   :  { %v497_v15 = vpop.f32.mrf.mxu0  ;;  %v538_v18 = vpop.f32.mrf.mxu1 }
  0xfe   :  { %v498_v17 = vadd.f32 %v497_v15, %v78_v55  ;;  %v539_v23 = vadd.f32 %v538_v18, %v78_v55 }
  0xff   :  { %v499_v20 = vpop.f32.mrf.mxu0  ;;  %v540_v25 = vpop.f32.mrf.mxu1 }
 0x100   :  { %v584_v21 = vadd.f32 %v583_v16, %v498_v17  ;;  %v594_v22 = vmul.f32 %v498_v17, %v498_v17  ;;  %v500_v24 = vadd.f32 %v499_v20, %v78_v55  ;;  %v541_v26 = vadd.f32 %v540_v25, %v78_v55 }
 0x101   :  { %v501_v27 = vpop.f32.mrf.mxu0  ;;  %v542_v31 = vpop.f32.mrf.mxu1  ;;  %v596_v36 = vmul.f32 %v539_v23, %v539_v23 }
 0x102   :  { %v689_v28 = vpack.c.bf16 %v500_v24, %v498_v17  ;;  %v585_v29 = vadd.f32 %v584_v21, %v500_v24  ;;  %v595_v30 = vmul.f32 %v500_v24, %v500_v24  ;;  %v601_v3 = vadd.f32 %v600_v19, %v594_v22 }
 0x103   :  { %v690_v32 = vpack.c.bf16 %v541_v26, %v539_v23  ;;  %v502_v33 = vpop.f32.mrf.mxu0  ;;  %v543_v34 = vpop.f32.mrf.mxu1  ;;  %v597_v39 = vmul.f32 %v541_v26, %v541_v26 }
 0x104   :  { %579 = vst [vmem:[%s934_s3 + $0x10] sm:$0xff] %v689_v28  ;;  %v586_v35 = vadd.f32 %v585_v29, %v539_v23  ;;  %v602_v37 = vadd.f32 %v601_v3, %v595_v30 }
 0x105   :  { %580 = vst [vmem:[%s934_s3 + $0x18] sm:$0xff] %v690_v32 }
 0x106   :  { %v587_v38 = vadd.f32 %v586_v35, %v541_v26  ;;  %v603_v40 = vadd.f32 %v602_v37, %v596_v36 }
 0x108   :  { %588 = vadd.xlane.f32.xlu0 %v587_v38  ;;  %v604_v41 = vadd.f32 %v603_v40, %v597_v39 }
 0x10a   :  { %605 = vadd.xlane.f32.xlu1 %v604_v41 }
 0x191   :  { %v589_v42 = vpop.xlane.xlu0 %588 }
 0x193   :  { %v606_v43 = vpop.xlane.xlu1 %605 }
 0x194   :  { %v608_v44 = vsel %vm607_vm2, %v589_v42, %v606_v43 }
 0x195   :  { %610 = vst.msk [vmem:[%s935_s4] sm:$0xff] %vm609_vm3, %v608_v44 }

// kernel: mri3d_autoencoder_forward.15
= control target key start
LH: loop header
LB: loop body
LE: loop exit
PB: predicated region body
PF: predicated region fallthrough
CT: control target
= control target key end

     0   :  { %v377_v0 = vmov 0   ;;  %vm302_vm0 = vcmask 1041409   ;;  %vm304_vm1 = vcmask 1042434   ;;  %vm306_vm2 = vcmask 1043459   ;;  %s461_s1 = inlined_call_operand.vmem [shape: f32[8,1,1], index: 1, kind: input, shape index: {}]   ;;  %s462_s2 = inlined_call_operand.vmem [shape: f32[8,1,1], index: 2, kind: input, shape index: {}]   ;;  %s463_s0 = inlined_call_operand.vmem [shape: bf16[8,8,128], index: 0, kind: input, shape index: {}]   ;;  %s464_s3 = inlined_call_operand.vmem [shape: bf16[8,128], index: 3, kind: output, shape index: {}]  }
   0x1   :  { %376 = vset.pattern.permute.xlu1 %v377_v0  ;;  %375 = vset.pattern.permute.xlu0 %v377_v0  ;;  %v325_v1 = vld [vmem:[%s461_s1 + $0x2] ss:$0 sm:$0xff]  ;;  %v323_v2 = vld [vmem:[%s461_s1] ss:$0 sm:$0xff]  ;;  %v326_v3 = vld [vmem:[%s461_s1 + $0x3] ss:$0 sm:$0xff] }
   0x2   :  { %87 = vperm.xlu1 %376, %v325_v1   ;;  %79 = vperm.xlu0 %375, %v323_v2   ;;  %v324_v4 = vld [vmem:[%s461_s1 + $0x1] ss:$0 sm:$0xff]  ;;  %v331_v6 = vld [vmem:[%s462_s2] ss:$0 sm:$0xff]  ;;  %v333_v7 = vld [vmem:[%s462_s2 + $0x2] ss:$0 sm:$0xff] }
   0x3   :  { %v332_v5 = vld [vmem:[%s462_s2 + $0x1] ss:$0 sm:$0xff]  ;;  %v327_v8 = vld [vmem:[%s461_s1 + $0x4] ss:$0 sm:$0xff]  ;;  %v334_v9 = vld [vmem:[%s462_s2 + $0x3] ss:$0 sm:$0xff] }
   0x4   :  { %v328_v10 = vld [vmem:[%s461_s1 + $0x5] ss:$0 sm:$0xff]  ;;  %v335_v11 = vld [vmem:[%s462_s2 + $0x4] ss:$0 sm:$0xff]  ;;  %v329_v12 = vld [vmem:[%s461_s1 + $0x6] ss:$0 sm:$0xff] }
   0x5   :  { %v336_v13 = vld [vmem:[%s462_s2 + $0x5] ss:$0 sm:$0xff]  ;;  %v330_v14 = vld [vmem:[%s461_s1 + $0x7] ss:$0 sm:$0xff]  ;;  %v337_v16 = vld [vmem:[%s462_s2 + $0x6] ss:$0 sm:$0xff] }
   0x6   :  { %91 = vperm.xlu1 %376, %v326_v3   ;;  %83 = vperm.xlu0 %375, %v324_v4   ;;  %v338_v15 = vld [vmem:[%s462_s2 + $0x7] ss:$0 sm:$0xff]  ;;  %v371_v22 = vld [vmem:[%s463_s0 + $0x8] sm:$0xff]   ;;  %v372_v41 = vld [vmem:[%s463_s0 + $0x10] sm:$0xff]   ;;  %vm308_vm3 = vcmask 1044484   ;;  %vm310_vm4 = vcmask 1045509  }
   0x7   :  { %v356_v19 = vld [vmem:[%s463_s0] sm:$0xff]   ;;  %v361_v25 = vunpack.c.l.bf16 %v371_v22  ;;  %v362_v33 = vunpack.c.h.bf16 %v371_v22  ;;  %v365_v44 = vunpack.c.l.bf16 %v372_v41  ;;  %v366_v54 = vunpack.c.h.bf16 %v372_v41  ;;  %v373_v60 = vld [vmem:[%s463_s0 + $0x18] sm:$0xff]  }
   0x8   :  { %v357_v20 = vunpack.c.l.bf16 %v356_v19  ;;  %v358_v21 = vunpack.c.h.bf16 %v356_v19  ;;  %v370_v0 = vunpack.c.h.bf16 %v373_v60  ;;  %v369_v3 = vunpack.c.l.bf16 %v373_v60 }
   0x9   :  { %vm312_vm5 = vcmask 1046534   ;;  %vm314_vm6 = vcmask 1047559  }
   0xa   :  { %171 = vperm.xlu1 %376, %v332_v5   ;;  %167 = vperm.xlu0 %375, %v331_v6  }
   0xe   :  { %175 = vperm.xlu1 %376, %v333_v7   ;;  %95 = vperm.xlu0 %375, %v327_v8  }
  0x12   :  { %179 = vperm.xlu1 %376, %v334_v9   ;;  %99 = vperm.xlu0 %375, %v328_v10  }
  0x16   :  { %183 = vperm.xlu1 %376, %v335_v11   ;;  %103 = vperm.xlu0 %375, %v329_v12  }
  0x1a   :  { %187 = vperm.xlu1 %376, %v336_v13   ;;  %107 = vperm.xlu0 %375, %v330_v14  }
  0x1e   :  { %195 = vperm.xlu1 %376, %v338_v15   ;;  %191 = vperm.xlu0 %375, %v337_v16  }
  0x7d   :  { %v88_v17 = vpop.permute.xlu1 %87  ;;  %v80_v18 = vpop.permute.xlu0 %79 }
  0x7e   :  { %v110_v26 = vmul.f32 %v357_v20, %v80_v18  ;;  %v112_v32 = vmul.f32 %v361_v25, %v88_v17 }
  0x81   :  { %v92_v23 = vpop.permute.xlu1 %91  ;;  %v84_v24 = vpop.permute.xlu0 %83 }
  0x82   :  { %v111_v27 = vmul.f32 %v358_v21, %v84_v24  ;;  %v113_v42 = vmul.f32 %v362_v33, %v92_v23 }
  0x85   :  { %v172_v28 = vpop.permute.xlu1 %171  ;;  %v168_v29 = vpop.permute.xlu0 %167 }
  0x86   :  { %v199_v30 = vadd.f32 %v172_v28, %v111_v27  ;;  %v198_v31 = vadd.f32 %v168_v29, %v110_v26 }
  0x88   :  { %v207_v34 = vmax.f32 %v199_v30, 0.0  ;;  %v206_v35 = vmax.f32 %v198_v31, 0.0 }
  0x89   :  { %v176_v36 = vpop.permute.xlu1 %175  ;;  %v96_v37 = vpop.permute.xlu0 %95 }
  0x8a   :  { %v220_v38 = vrot.slane %v207_v34, 4  ;;  %v214_v39 = vrot.slane %v206_v35, 4  ;;  %v200_v40 = vadd.f32 %v176_v36, %v112_v32  ;;  %v114_v53 = vmul.f32 %v365_v44, %v96_v37 }
  0x8c   :  { %v208_v43 = vmax.f32 %v200_v40, 0.0  ;;  %v221_v47 = vmax.f32 %v207_v34, %v220_v38  ;;  %v215_v48 = vmax.f32 %v206_v35, %v214_v39 }
  0x8d   :  { %v180_v45 = vpop.permute.xlu1 %179  ;;  %v100_v46 = vpop.permute.xlu0 %99 }
  0x8e   :  { %v226_v49 = vrot.slane %v208_v43, 4  ;;  %v201_v50 = vadd.f32 %v180_v45, %v113_v42  ;;  %v222_v57 = vrot.slane %v221_v47, 2  ;;  %v216_v58 = vrot.slane %v215_v48, 2 }
  0x8f   :  { %v115_v1 = vmul.f32 %v366_v54, %v100_v46 }
  0x90   :  { %v227_v51 = vmax.f32 %v208_v43, %v226_v49  ;;  %v209_v52 = vmax.f32 %v201_v50, 0.0  ;;  %v223_v6 = vmax.f32 %v221_v47, %v222_v57  ;;  %v217_v7 = vmax.f32 %v215_v48, %v216_v58 }
  0x91   :  { %v184_v55 = vpop.permute.xlu1 %183  ;;  %v104_v56 = vpop.permute.xlu0 %103 }
  0x92   :  { %v232_v59 = vrot.slane %v209_v52, 4  ;;  %v228_v61 = vrot.slane %v227_v51, 2  ;;  %v202_v62 = vadd.f32 %v184_v55, %v114_v53  ;;  %v116_v15 = vmul.f32 %v369_v3, %v104_v56 }
  0x93   :  { %v224_v19 = vrot.slane %v223_v6, 1  ;;  %v218_v20 = vrot.slane %v217_v7, 1 }
  0x94   :  { %v233_v63 = vmax.f32 %v209_v52, %v232_v59  ;;  %v210_v2 = vmax.f32 %v202_v62, 0.0  ;;  %v229_v9 = vmax.f32 %v227_v51, %v228_v61 }
  0x95   :  { %v188_v4 = vpop.permute.xlu1 %187  ;;  %v108_v5 = vpop.permute.xlu0 %107  ;;  %v225_v31 = vmax.f32 %v223_v6, %v224_v19  ;;  %v219_v32 = vmax.f32 %v217_v7, %v218_v20 }
  0x96   :  { %v234_v8 = vrot.slane %v233_v63, 2  ;;  %v238_v10 = vrot.slane %v210_v2, 4  ;;  %v203_v11 = vadd.f32 %v188_v4, %v115_v1  ;;  %v117_v13 = vmul.f32 %v370_v0, %v108_v5 }
  0x97   :  { %v230_v22 = vrot.slane %v229_v9, 1  ;;  %v348_v43 = vpack.c.bf16 %v225_v31, %v225_v31  ;;  %v347_v44 = vpack.c.bf16 %v219_v32, %v219_v32 }
  0x98   :  { %v235_v12 = vmax.f32 %v233_v63, %v234_v8  ;;  %v239_v14 = vmax.f32 %v210_v2, %v238_v10  ;;  %v211_v16 = vmax.f32 %v203_v11, 0.0 }
  0x99   :  { %v196_v17 = vpop.permute.xlu1 %195  ;;  %v192_v18 = vpop.permute.xlu0 %191  ;;  %v231_v34 = vmax.f32 %v229_v9, %v230_v22  ;;  %v295_v54 = vunpack.c.l.b16 %v348_v43  ;;  %v294_v55 = vunpack.c.l.b16 %v347_v44 }
  0x9a   :  { %v205_v21 = vadd.f32 %v196_v17, %v117_v13  ;;  %v240_v23 = vrot.slane %v239_v14, 2  ;;  %v244_v24 = vrot.slane %v211_v16, 4  ;;  %v204_v25 = vadd.f32 %v192_v18, %v116_v15 }
  0x9b   :  { %v236_v26 = vrot.slane %v235_v12, 1  ;;  %v349_v46 = vpack.c.bf16 %v231_v34, %v231_v34  ;;  %v303_v0 = vsel %vm302_vm0, %v295_v54, %v294_v55 }
  0x9c   :  { %v213_v27 = vmax.f32 %v205_v21, 0.0  ;;  %v241_v28 = vmax.f32 %v239_v14, %v240_v23  ;;  %v245_v29 = vmax.f32 %v211_v16, %v244_v24  ;;  %v212_v30 = vmax.f32 %v204_v25, 0.0 }
  0x9d   :  { %v237_v38 = vmax.f32 %v235_v12, %v236_v26  ;;  %v296_v57 = vunpack.c.l.b16 %v349_v46 }
  0x9e   :  { %v256_v33 = vrot.slane %v213_v27, 4  ;;  %v242_v35 = vrot.slane %v241_v28, 1  ;;  %v246_v36 = vrot.slane %v245_v29, 2  ;;  %v250_v37 = vrot.slane %v212_v30, 4 }
  0x9f   :  { %v350_v49 = vpack.c.bf16 %v237_v38, %v237_v38  ;;  %v305_v3 = vsel %vm304_vm1, %v296_v57, %v303_v0 }
  0xa0   :  { %v257_v39 = vmax.f32 %v213_v27, %v256_v33  ;;  %v243_v40 = vmax.f32 %v241_v28, %v242_v35  ;;  %v247_v41 = vmax.f32 %v245_v29, %v246_v36  ;;  %v251_v42 = vmax.f32 %v212_v30, %v250_v37 }
  0xa1   :  { %v297_v60 = vunpack.c.l.b16 %v350_v49 }
  0xa2   :  { %v258_v45 = vrot.slane %v257_v39, 2  ;;  %v248_v47 = vrot.slane %v247_v41, 1  ;;  %v252_v48 = vrot.slane %v251_v42, 2  ;;  %v351_v51 = vpack.c.bf16 %v243_v40, %v243_v40 }
  0xa3   :  { %v307_v5 = vsel %vm306_vm2, %v297_v60, %v305_v3 }
  0xa4   :  { %v259_v50 = vmax.f32 %v257_v39, %v258_v45  ;;  %v249_v52 = vmax.f32 %v247_v41, %v248_v47  ;;  %v253_v53 = vmax.f32 %v251_v42, %v252_v48  ;;  %v298_v62 = vunpack.c.l.b16 %v351_v51 }
  0xa6   :  { %v260_v56 = vrot.slane %v259_v50, 1  ;;  %v352_v58 = vpack.c.bf16 %v249_v52, %v249_v52  ;;  %v254_v59 = vrot.slane %v253_v53, 1  ;;  %v309_v7 = vsel %vm308_vm3, %v298_v62, %v307_v5 }
  0xa8   :  { %v261_v61 = vmax.f32 %v259_v50, %v260_v56  ;;  %v255_v63 = vmax.f32 %v253_v53, %v254_v59  ;;  %v299_v1 = vunpack.c.l.b16 %v352_v58 }
  0xaa   :  { %v354_v2 = vpack.c.bf16 %v261_v61, %v261_v61  ;;  %v353_v4 = vpack.c.bf16 %v255_v63, %v255_v63  ;;  %v311_v9 = vsel %vm310_vm4, %v299_v1, %v309_v7 }
  0xac   :  { %v301_v6 = vunpack.c.l.b16 %v354_v2  ;;  %v300_v8 = vunpack.c.l.b16 %v353_v4 }
  0xae   :  { %v313_v10 = vsel %vm312_vm5, %v300_v8, %v311_v9 }
  0xaf   :  { %v315_v11 = vsel %vm314_vm6, %v301_v6, %v313_v10 }
  0xb0   :  { %v316_v12 = vpack.c.b16 %v315_v11, %v315_v11 }
  0xb2   :  { %318 = vst [vmem:[%s464_s3] sm:$0xf] %v316_v12 }

// kernel: mri3d_autoencoder_forward.16
= control target key start
LH: loop header
LB: loop body
LE: loop exit
PB: predicated region body
PF: predicated region fallthrough
CT: control target
= control target key end

     0   :  { %v276_v0 = vmov 0   ;;  %vm148_vm0 = vcmask 719872   ;;  %vm152_vm1 = vcmask 1043456   ;;  %vm217_vm2 = vcmask 7168   ;;  %s365_s0 = inlined_call_operand.vmem [shape: bf16[216,128], index: 0, kind: input, shape index: {}]   ;;  %s366_s1 = inlined_call_operand.vmem [shape: bf16[16,216], index: 1, kind: input, shape index: {}]   ;;  %s367_s2 = inlined_call_operand.vmem [shape: f32[16,1], index: 2, kind: input, shape index: {}]   ;;  %s368_s3 = inlined_call_operand.vmem [shape: bf16[16,128], index: 3, kind: output, shape index: {0}]   ;;  %s369_s4 = inlined_call_operand.vmem [shape: f32[1,16,2], index: 4, kind: output, shape index: {1}]  }
   0x1   :  { %156 = vmatprep.subr.bf16.mxu0 %v276_v0  ;;  %v259_v1 = vld [vmem:[%s365_s0 + $0x38] sm:$0xff]   ;;  %258 = vset.pattern.permute.xlu0 %v276_v0  ;;  %v260_v2 = vld [vmem:[%s365_s0 + $0x30] sm:$0xff]   ;;  %v261_v3 = vld [vmem:[%s365_s0 + $0x28] sm:$0xff]   ;;  %vm220_vm3 = vcmask 15360  }
   0x2   :  { %157 = vmatpush1.bf16.msra.mxu0 %v259_v1  ;;  %v262_v4 = vld [vmem:[%s365_s0 + $0x20] sm:$0xff]   ;;  %v263_v5 = vld [vmem:[%s365_s0 + $0x18] sm:$0xff]   ;;  %v47_v8 = vld [vmem:[%s367_s2 + $0x8] sm:$0xff] }
   0x3   :  { %158 = vmatprep.subr.bf16.mxu0 %v276_v0  ;;  %v275_v6 = vld [vmem:[%s366_s1 + $0x4] ss:$8 sps:$4 sm:$0xff]   ;;  %v264_v9 = vld [vmem:[%s365_s0 + $0x10] sm:$0xff]   ;;  %v267_v12 = vld [vmem:[%s365_s0 + $0x68] ss:$0 sps:$4 sm:$0xff]  }
   0x4   :  { %v46_v7 = vld [vmem:[%s367_s2] sm:$0xff]  ;;  %247 = vmatprep.mubr.msk.bf16.mxu0 %vm148_vm0, %v275_v6  ;;  %v265_v10 = vld [vmem:[%s365_s0 + $0x8] sm:$0xff]   ;;  %v154_v13 = vsel %vm152_vm1, %v267_v12, 0  ;;  %v269_v15 = vld [vmem:[%s365_s0 + $0x58] sm:$0xff]  }
   0x5   :  { %50 = vperm.xlu0 %258, %v46_v7   ;;  %v266_v11 = vld [vmem:[%s365_s0] sm:$0xff]   ;;  %v270_v16 = vld [vmem:[%s365_s0 + $0x50] sm:$0xff]   ;;  %v271_v17 = vld [vmem:[%s365_s0 + $0x48] sm:$0xff]  }
   0x6   :  { %159 = vmatpush1.bf16.msra.mxu0 %v260_v2  ;;  %v268_v14 = vld [vmem:[%s365_s0 + $0x60] sm:$0xff]  }
   0x7   :  { %160 = vmatprep.subr.bf16.mxu0 %v276_v0  ;;  %v272_v18 = vld [vmem:[%s365_s0 + $0x40] sm:$0xff]  }
   0x8   :  { %v273_v19 = vld [vmem:[%s366_s1] ss:$8 sps:$4 sm:$0xff]  }
   0x9   :  { %55 = vperm.xlu0 %258, %v47_v8  }
   0xa   :  { %161 = vmatpush1.bf16.msra.mxu0 %v261_v3 }
   0xb   :  { %162 = vmatprep.subr.bf16.mxu0 %v276_v0 }
   0xe   :  { %163 = vmatpush1.bf16.msra.mxu0 %v262_v4 }
   0xf   :  { %164 = vmatprep.subr.bf16.mxu0 %v276_v0 }
  0x12   :  { %165 = vmatpush1.bf16.msra.mxu0 %v263_v5 }
  0x13   :  { %166 = vmatprep.subr.bf16.mxu0 %v276_v0 }
  0x16   :  { %167 = vmatpush1.bf16.msra.mxu0 %v264_v9 }
  0x17   :  { %168 = vmatprep.subr.bf16.mxu0 %v276_v0 }
  0x1a   :  { %169 = vmatpush1.bf16.msra.mxu0 %v265_v10 }
  0x1b   :  { %170 = vmatprep.subr.bf16.mxu0 %v276_v0 }
  0x1e   :  { %171 = vmatpush1.bf16.msra.mxu0 %v266_v11 }
  0x1f   :  { %176 = vmatprep.subr.bf16.mxu0 %v276_v0 }
  0x22   :  { %177 = vmatpush2.bf16.msra.mxu0 %v154_v13 }
  0x23   :  { %178 = vmatprep.subr.bf16.mxu0 %v276_v0 }
  0x26   :  { %179 = vmatpush2.bf16.msra.mxu0 %v268_v14 }
  0x27   :  { %180 = vmatprep.subr.bf16.mxu0 %v276_v0 }
  0x2a   :  { %181 = vmatpush2.bf16.msra.mxu0 %v269_v15 }
  0x2b   :  { %182 = vmatprep.subr.bf16.mxu0 %v276_v0 }
  0x2e   :  { %183 = vmatpush2.bf16.msra.mxu0 %v270_v16 }
  0x2f   :  { %184 = vmatprep.subr.bf16.mxu0 %v276_v0 }
  0x32   :  { %185 = vmatpush2.bf16.msra.mxu0 %v271_v17 }
  0x33   :  { %186 = vmatprep.subr.bf16.mxu0 %v276_v0 }
  0x36   :  { %187 = vmatpush2.bf16.msra.mxu0 %v272_v18 }
  0x39   :  { %189 = vmatmul.mubr.bf16.vlgmr.msra.gmra.mxu0 %v273_v19 }
  0x80   :  { %v51_v20 = vpop.permute.xlu0 %50 }
  0x84   :  { %v56_v25 = vpop.permute.xlu0 %55 }
  0xf9   :  { %v190_v21 = vpop.f32.mrf.mxu0 }
  0xfa   :  { %v191_v22 = vadd.f32 %v190_v21, %v51_v20 }
  0xfb   :  { %v192_v23 = vpop.f32.mrf.mxu0 }
  0xfc   :  { %207 = vadd.xlane.f32.xlu1 %v191_v22  ;;  %v211_v24 = vmul.f32 %v191_v22, %v191_v22 }
  0xfd   :  { %v193_v26 = vpop.f32.mrf.mxu0 }
  0xfe   :  { %v194_v27 = vadd.f32 %v193_v26, %v56_v25  ;;  %213 = vadd.xlane.f32.xlu0 %v211_v24 }
  0xff   :  { %v195_v28 = vpop.f32.mrf.mxu0 }
 0x100   :  { %v255_v29 = vpack.c.bf16 %v194_v27, %v191_v22  ;;  %209 = vadd.xlane.f32.xlu1 %v194_v27  ;;  %v212_v30 = vmul.f32 %v194_v27, %v194_v27 }
 0x102   :  { %256 = vst [vmem:[%s368_s3] sm:$0xff] %v255_v29  }
 0x104   :  { %215 = vadd.xlane.f32.xlu1 %v212_v30 }
 0x185   :  { %v208_v31 = vpop.xlane.xlu1 %207 }
 0x187   :  { %v214_v32 = vpop.xlane.xlu0 %213 }
 0x188   :  { %v218_v33 = vsel %vm217_vm2, %v208_v31, %v214_v32 }
 0x189   :  { %221 = vst.msk [vmem:[%s369_s4] sm:$0xff] %vm220_vm3, %v218_v33  ;;  %v210_v34 = vpop.xlane.xlu1 %209 }
 0x18d   :  { %v216_v35 = vpop.xlane.xlu1 %215 }
 0x18e   :  { %v219_v36 = vsel %vm217_vm2, %v210_v34, %v216_v35 }
 0x18f   :  { %222 = vst.msk [vmem:[%s369_s4 + $0x8] sm:$0xff] %vm220_vm3, %v219_v36 }

// kernel: mri3d_autoencoder_forward.17
= control target key start
LH: loop header
LB: loop body
LE: loop exit
PB: predicated region body
PF: predicated region fallthrough
CT: control target
= control target key end

     0   :  { %v745_v0 = vmov 0   ;;  %vm414_vm0 = vcmask 130048   ;;  %vm607_vm1 = vcmask 1041409   ;;  %vm611_vm2 = vcmask 1043459   ;;  %s955_s1 = inlined_call_operand.vmem [shape: f32[16,1,1], index: 1, kind: input, shape index: {}]   ;;  %s956_s2 = inlined_call_operand.vmem [shape: f32[16,1,1], index: 2, kind: input, shape index: {}]   ;;  %s957_s0 = inlined_call_operand.vmem [shape: bf16[16,8,16], index: 0, kind: input, shape index: {}]   ;;  %s958_s3 = inlined_call_operand.vmem [shape: bf16[16,16], index: 3, kind: output, shape index: {}]  }
   0x1   :  { %744 = vset.pattern.permute.xlu1 %v745_v0  ;;  %743 = vset.pattern.permute.xlu0 %v745_v0  ;;  %v641_v1 = vld [vmem:[%s955_s1 + $0x2] ss:$0 sm:$0xff]  ;;  %v639_v2 = vld [vmem:[%s955_s1] ss:$0 sm:$0xff]  ;;  %v642_v3 = vld [vmem:[%s955_s1 + $0x3] ss:$0 sm:$0xff] }
   0x2   :  { %151 = vperm.xlu1 %744, %v641_v1   ;;  %143 = vperm.xlu0 %743, %v639_v2   ;;  %v640_v4 = vld [vmem:[%s955_s1 + $0x1] ss:$0 sm:$0xff]  ;;  %v644_v5 = vld [vmem:[%s955_s1 + $0x5] ss:$0 sm:$0xff]  ;;  %v643_v6 = vld [vmem:[%s955_s1 + $0x4] ss:$0 sm:$0xff] }
   0x3   :  { %v646_v7 = vld [vmem:[%s955_s1 + $0x7] ss:$0 sm:$0xff]  ;;  %v645_v8 = vld [vmem:[%s955_s1 + $0x6] ss:$0 sm:$0xff]  ;;  %v648_v9 = vld [vmem:[%s955_s1 + $0x9] ss:$0 sm:$0xff] }
   0x4   :  { %v647_v10 = vld [vmem:[%s955_s1 + $0x8] ss:$0 sm:$0xff]  ;;  %v650_v11 = vld [vmem:[%s955_s1 + $0xb] ss:$0 sm:$0xff]  ;;  %v649_v12 = vld [vmem:[%s955_s1 + $0xa] ss:$0 sm:$0xff] }
   0x5   :  { %v656_v13 = vld [vmem:[%s956_s2 + $0x1] ss:$0 sm:$0xff]  ;;  %v655_v14 = vld [vmem:[%s956_s2] ss:$0 sm:$0xff]  ;;  %v664_v15 = vld [vmem:[%s956_s2 + $0x9] ss:$0 sm:$0xff] }
   0x6   :  { %155 = vperm.xlu1 %744, %v642_v3   ;;  %147 = vperm.xlu0 %743, %v640_v4   ;;  %v663_v16 = vld [vmem:[%s956_s2 + $0x8] ss:$0 sm:$0xff]  ;;  %v657_v17 = vld [vmem:[%s956_s2 + $0x2] ss:$0 sm:$0xff]  ;;  %v651_v18 = vld [vmem:[%s955_s1 + $0xc] ss:$0 sm:$0xff] }
   0x7   :  { %v652_v19 = vld [vmem:[%s955_s1 + $0xd] ss:$0 sm:$0xff]  ;;  %v665_v20 = vld [vmem:[%s956_s2 + $0xa] ss:$0 sm:$0xff]  ;;  %v666_v21 = vld [vmem:[%s956_s2 + $0xb] ss:$0 sm:$0xff] }
   0x8   :  { %v658_v22 = vld [vmem:[%s956_s2 + $0x3] ss:$0 sm:$0xff]  ;;  %v659_v23 = vld [vmem:[%s956_s2 + $0x4] ss:$0 sm:$0xff]  ;;  %v653_v24 = vld [vmem:[%s955_s1 + $0xe] ss:$0 sm:$0xff] }
   0x9   :  { %v654_v25 = vld [vmem:[%s955_s1 + $0xf] ss:$0 sm:$0xff]  ;;  %v667_v26 = vld [vmem:[%s956_s2 + $0xc] ss:$0 sm:$0xff]  ;;  %v668_v27 = vld [vmem:[%s956_s2 + $0xd] ss:$0 sm:$0xff] }
   0xa   :  { %163 = vperm.xlu1 %744, %v644_v5   ;;  %159 = vperm.xlu0 %743, %v643_v6   ;;  %v660_v28 = vld [vmem:[%s956_s2 + $0x5] ss:$0 sm:$0xff]  ;;  %v669_v29 = vld [vmem:[%s956_s2 + $0xe] ss:$0 sm:$0xff]  ;;  %v661_v30 = vld [vmem:[%s956_s2 + $0x6] ss:$0 sm:$0xff] }
   0xb   :  { %v670_v31 = vld [vmem:[%s956_s2 + $0xf] ss:$0 sm:$0xff]  ;;  %v662_v32 = vld [vmem:[%s956_s2 + $0x7] ss:$0 sm:$0xff]  ;;  %vm609_vm3 = vcmask 1042434   ;;  %vm615_vm4 = vcmask 1045509  }
   0xc   :  { %v704_v41 = vld [vmem:[%s957_s0] sm:$0xff]   ;;  %v735_v55 = vld [vmem:[%s957_s0 + $0x8] sm:$0xff]   ;;  %vm613_vm5 = vcmask 1044484   ;;  %vm617_vm6 = vcmask 1046534   ;;  %vm619_vm7 = vcmask 1047559   ;;  %vm632_vm8 = vcmask 125952  }
   0xd   :  { %v705_v44 = vunpack.c.l.bf16 %v704_v41  ;;  %v706_v45 = vunpack.c.h.bf16 %v704_v41  ;;  %v738_v46 = vld [vmem:[%s957_s0 + $0x20] sm:$0xff]   ;;  %v709_v62 = vunpack.c.l.bf16 %v735_v55  ;;  %v739_v63 = vld [vmem:[%s957_s0 + $0x28] sm:$0xff]  }
   0xe   :  { %171 = vperm.xlu1 %744, %v646_v7   ;;  %167 = vperm.xlu0 %743, %v645_v8   ;;  %v722_v51 = vunpack.c.h.bf16 %v738_v46  ;;  %v721_v52 = vunpack.c.l.bf16 %v738_v46  ;;  %v725_v8 = vunpack.c.l.bf16 %v739_v63 }
  0x12   :  { %179 = vperm.xlu1 %744, %v648_v9   ;;  %175 = vperm.xlu0 %743, %v647_v10  }
  0x16   :  { %187 = vperm.xlu1 %744, %v650_v11   ;;  %183 = vperm.xlu0 %743, %v649_v12  }
  0x1a   :  { %323 = vperm.xlu1 %744, %v656_v13   ;;  %319 = vperm.xlu0 %743, %v655_v14  }
  0x1e   :  { %355 = vperm.xlu1 %744, %v664_v15   ;;  %351 = vperm.xlu0 %743, %v663_v16  }
  0x22   :  { %327 = vperm.xlu1 %744, %v657_v17   ;;  %191 = vperm.xlu0 %743, %v651_v18  }
  0x26   :  { %195 = vperm.xlu1 %744, %v652_v19   ;;  %359 = vperm.xlu0 %743, %v665_v20   ;;  %v710_v20 = vunpack.c.h.bf16 %v735_v55 }
  0x2a   :  { %363 = vperm.xlu1 %744, %v666_v21   ;;  %331 = vperm.xlu0 %743, %v658_v22   ;;  %v726_v21 = vunpack.c.h.bf16 %v739_v63 }
  0x2e   :  { %335 = vperm.xlu1 %744, %v659_v23   ;;  %199 = vperm.xlu0 %743, %v653_v24  }
  0x32   :  { %203 = vperm.xlu1 %744, %v654_v25   ;;  %367 = vperm.xlu0 %743, %v667_v26  }
  0x36   :  { %371 = vperm.xlu1 %744, %v668_v27   ;;  %339 = vperm.xlu0 %743, %v660_v28  }
  0x3a   :  { %375 = vperm.xlu1 %744, %v669_v29   ;;  %343 = vperm.xlu0 %743, %v661_v30   ;;  %v736_v29 = vld [vmem:[%s957_s0 + $0x10] sm:$0xff]  }
  0x3e   :  { %379 = vperm.xlu1 %744, %v670_v31   ;;  %347 = vperm.xlu0 %743, %v662_v32  }
  0x7d   :  { %v152_v33 = vpop.permute.xlu1 %151  ;;  %v144_v34 = vpop.permute.xlu0 %143 }
  0x7e   :  { %v206_v49 = vmul.f32 %v705_v44, %v144_v34  ;;  %v208_v11 = vmul.f32 %v709_v62, %v152_v33  ;;  %v713_v44 = vunpack.c.l.bf16 %v736_v29 }
  0x81   :  { %v862_v35 = vpop.permute.xlu1 %155  ;;  %v148_v36 = vpop.permute.xlu0 %147 }
  0x82   :  { %v207_v50 = vmul.f32 %v706_v45, %v148_v36  ;;  %v209_v32 = vmul.f32 %v710_v20, %v862_v35  ;;  %v737_v45 = vld [vmem:[%s957_s0 + $0x18] sm:$0xff]  }
  0x83   :  { %v718_v55 = vunpack.c.h.bf16 %v737_v45 }
  0x85   :  { %v864_v37 = vpop.permute.xlu1 %163  ;;  %v866_v38 = vpop.permute.xlu0 %159 }
  0x89   :  { %v868_v39 = vpop.permute.xlu1 %171  ;;  %v870_v40 = vpop.permute.xlu0 %167 }
  0x8d   :  { %v180_v42 = vpop.permute.xlu1 %179  ;;  %v176_v43 = vpop.permute.xlu0 %175 }
  0x8e   :  { %v215_v58 = vmul.f32 %v722_v51, %v180_v42  ;;  %v214_v59 = vmul.f32 %v721_v52, %v176_v43 }
  0x91   :  { %v188_v47 = vpop.permute.xlu1 %187  ;;  %v184_v48 = vpop.permute.xlu0 %183 }
  0x92   :  { %v216_v22 = vmul.f32 %v725_v8, %v184_v48  ;;  %v217_v33 = vmul.f32 %v726_v21, %v188_v47  ;;  %v740_v48 = vld [vmem:[%s957_s0 + $0x30] sm:$0xff]   ;;  %v714_v47 = vunpack.c.h.bf16 %v736_v29 }
  0x95   :  { %v324_v53 = vpop.permute.xlu1 %323  ;;  %v320_v54 = vpop.permute.xlu0 %319 }
  0x96   :  { %v383_v56 = vadd.f32 %v324_v53, %v207_v50  ;;  %v382_v57 = vadd.f32 %v320_v54, %v206_v49  ;;  %v902_v54 = vld [vmem:[%s957_s0 + $0x38] sm:$0xff]  }
  0x98   :  { %v399_v60 = vmax.f32 %v383_v56, 0.0  ;;  %v398_v61 = vmax.f32 %v382_v57, 0.0  ;;  %v729_v57 = vunpack.c.l.bf16 %v740_v48 }
  0x99   :  { %v356_v0 = vpop.permute.xlu1 %355  ;;  %v352_v1 = vpop.permute.xlu0 %351 }
  0x9a   :  { %v422_v2 = vsel %vm414_vm0, %v399_v60, -inf  ;;  %v415_v3 = vsel %vm414_vm0, %v398_v61, -inf  ;;  %v391_v4 = vadd.f32 %v356_v0, %v215_v58  ;;  %v390_v5 = vadd.f32 %v352_v1, %v214_v59 }
  0x9b   :  { %v423_v6 = vrot.slane %v422_v2, 4  ;;  %v416_v7 = vrot.slane %v415_v3, 4  ;;  %v210_v61 = vmul.f32 %v713_v44, %v866_v38  ;;  %v717_v1 = vunpack.c.l.bf16 %v737_v45 }
  0x9c   :  { %v407_v9 = vmax.f32 %v391_v4, 0.0  ;;  %v406_v10 = vmax.f32 %v390_v5, 0.0  ;;  %v733_v4 = vunpack.c.l.bf16 %v902_v54  ;;  %v734_v38 = vunpack.c.h.bf16 %v902_v54 }
  0x9d   :  { %v424_v12 = vmax.f32 %v422_v2, %v423_v6  ;;  %v328_v13 = vpop.permute.xlu1 %327  ;;  %v192_v14 = vpop.permute.xlu0 %191  ;;  %v417_v15 = vmax.f32 %v415_v3, %v416_v7  ;;  %v730_v3 = vunpack.c.h.bf16 %v740_v48 }
  0x9e   :  { %v478_v16 = vsel %vm414_vm0, %v407_v9, -inf  ;;  %v471_v17 = vsel %vm414_vm0, %v406_v10, -inf  ;;  %v384_v19 = vadd.f32 %v328_v13, %v208_v11  ;;  %v211_v9 = vmul.f32 %v714_v47, %v864_v37 }
  0x9f   :  { %v425_v18 = vrot.slane %v424_v12, 2  ;;  %v479_v23 = vrot.slane %v478_v16, 4  ;;  %v472_v24 = vrot.slane %v471_v17, 4  ;;  %v418_v27 = vrot.slane %v417_v15, 2 }
  0xa0   :  { %v400_v31 = vmax.f32 %v384_v19, 0.0  ;;  %v218_v11 = vmul.f32 %v729_v57, %v192_v14  ;;  %v912_v19 = vmul.f32 %v718_v55, %v868_v39 }
  0xa1   :  { %v196_v25 = vpop.permute.xlu1 %195  ;;  %v360_v26 = vpop.permute.xlu0 %359  ;;  %v426_v30 = vmax.f32 %v424_v12, %v425_v18  ;;  %v480_v34 = vmax.f32 %v478_v16, %v479_v23  ;;  %v473_v36 = vmax.f32 %v471_v17, %v472_v24  ;;  %v419_v46 = vmax.f32 %v417_v15, %v418_v27 }
  0xa2   :  { %v392_v28 = vadd.f32 %v360_v26, %v216_v22  ;;  %v429_v35 = vsel %vm414_vm0, %v400_v31, -inf  ;;  %v219_v24 = vmul.f32 %v730_v3, %v196_v25  ;;  %v212_v26 = vmul.f32 %v717_v1, %v870_v40 }
  0xa3   :  { %v427_v51 = vrot.slane %v426_v30, 1  ;;  %v481_v52 = vrot.slane %v480_v34, 2  ;;  %v474_v56 = vrot.slane %v473_v36, 2  ;;  %v420_v62 = vrot.slane %v419_v46, 1 }
  0xa4   :  { %v408_v41 = vmax.f32 %v392_v28, 0.0  ;;  %v430_v63 = vrot.slane %v429_v35, 4 }
  0xa5   :  { %v364_v42 = vpop.permute.xlu1 %363  ;;  %v332_v43 = vpop.permute.xlu0 %331  ;;  %v428_v2 = vmax.f32 %v426_v30, %v427_v51  ;;  %v482_v5 = vmax.f32 %v480_v34, %v481_v52  ;;  %v475_v10 = vmax.f32 %v473_v36, %v474_v56  ;;  %v421_v15 = vmax.f32 %v419_v46, %v420_v62 }
  0xa6   :  { %v393_v49 = vadd.f32 %v364_v42, %v217_v33  ;;  %v385_v50 = vadd.f32 %v332_v43, %v209_v32  ;;  %v485_v58 = vsel %vm414_vm0, %v408_v41, -inf  ;;  %v431_v16 = vmax.f32 %v429_v35, %v430_v63 }
  0xa7   :  { %v486_v6 = vrot.slane %v485_v58, 4  ;;  %v688_v20 = vpack.c.bf16 %v428_v2, %v428_v2  ;;  %v483_v23 = vrot.slane %v482_v5, 1  ;;  %v476_v27 = vrot.slane %v475_v10, 1 }
  0xa8   :  { %v409_v53 = vmax.f32 %v393_v49, 0.0  ;;  %v401_v0 = vmax.f32 %v385_v50, 0.0  ;;  %v687_v32 = vpack.c.bf16 %v421_v15, %v421_v15  ;;  %v432_v33 = vrot.slane %v431_v16, 2 }
  0xa9   :  { %v336_v59 = vpop.permute.xlu1 %335  ;;  %v200_v60 = vpop.permute.xlu0 %199  ;;  %v487_v37 = vmax.f32 %v485_v58, %v486_v6  ;;  %v916_v36 = vunpack.c.l.b16 %v688_v20  ;;  %v484_v43 = vmax.f32 %v482_v5, %v483_v23  ;;  %v919_v40 = vmax.f32 %v475_v10, %v476_v27 }
  0xaa   :  { %v492_v7 = vsel %vm414_vm0, %v409_v53, -inf  ;;  %v386_v8 = vadd.f32 %v336_v59, %v210_v61  ;;  %v436_v17 = vsel %vm414_vm0, %v401_v0, -inf  ;;  %v220_v45 = vmul.f32 %v733_v4, %v200_v60 }
  0xab   :  { %v493_v21 = vrot.slane %v492_v7, 4  ;;  %v437_v28 = vrot.slane %v436_v17, 4  ;;  %v488_v44 = vrot.slane %v487_v37, 2  ;;  %v433_v47 = vmax.f32 %v431_v16, %v432_v33 }
  0xac   :  { %v402_v18 = vmax.f32 %v386_v8, 0.0  ;;  %v921_v55 = vunpack.c.l.b16 %v687_v32  ;;  %v696_v59 = vpack.c.bf16 %v484_v43, %v484_v43  ;;  %v695_v63 = vpack.c.bf16 %v919_v40, %v919_v40 }
  0xad   :  { %v204_v12 = vpop.permute.xlu1 %203  ;;  %v368_v13 = vpop.permute.xlu0 %367  ;;  %v494_v41 = vmax.f32 %v492_v7, %v493_v21  ;;  %v438_v48 = vmax.f32 %v436_v17, %v437_v28  ;;  %v489_v60 = vmax.f32 %v487_v37, %v488_v44  ;;  %v434_v3 = vrot.slane %v433_v47, 1 }
  0xae   :  { %v394_v22 = vadd.f32 %v368_v13, %v218_v11  ;;  %v443_v14 = vsel %vm414_vm0, %v402_v18, -inf }
  0xaf   :  { %v444_v34 = vrot.slane %v443_v14, 4  ;;  %v495_v56 = vrot.slane %v494_v41, 2  ;;  %v439_v0 = vrot.slane %v438_v48, 2  ;;  %v490_v15 = vrot.slane %v489_v60, 1 }
  0xb0   :  { %v410_v29 = vmax.f32 %v394_v22, 0.0 }
  0xb1   :  { %v372_v30 = vpop.permute.xlu1 %371  ;;  %v340_v31 = vpop.permute.xlu0 %339  ;;  %v445_v52 = vmax.f32 %v443_v14, %v444_v34  ;;  %v496_v8 = vmax.f32 %v494_v41, %v495_v56  ;;  %v440_v20 = vmax.f32 %v438_v48, %v439_v0 }
  0xb2   :  { %v395_v39 = vadd.f32 %v372_v30, %v219_v24  ;;  %v499_v42 = vsel %vm414_vm0, %v410_v29, -inf  ;;  %v387_v25 = vadd.f32 %v340_v31, %v211_v9  ;;  %v221_v9 = vmul.f32 %v734_v38, %v204_v12 }
  0xb3   :  { %v500_v46 = vrot.slane %v499_v42, 4  ;;  %v446_v4 = vrot.slane %v445_v52, 2  ;;  %v497_v27 = vrot.slane %v496_v8, 1  ;;  %v600_v29 = vunpack.c.l.b16 %v696_v59 }
  0xb4   :  { %v411_v49 = vmax.f32 %v395_v39, 0.0  ;;  %v403_v50 = vmax.f32 %v387_v25, 0.0  ;;  %v441_v33 = vrot.slane %v440_v20, 1 }
  0xb5   :  { %v376_v51 = vpop.permute.xlu1 %375  ;;  %v344_v35 = vpop.permute.xlu0 %343  ;;  %v501_v53 = vmax.f32 %v499_v42, %v500_v46  ;;  %v447_v24 = vmax.f32 %v445_v52, %v446_v4  ;;  %v491_v42 = vmax.f32 %v489_v60, %v490_v15 }
  0xb6   :  { %v396_v54 = vadd.f32 %v376_v51, %v220_v45  ;;  %v506_v57 = vsel %vm414_vm0, %v411_v49, -inf  ;;  %v450_v58 = vsel %vm414_vm0, %v403_v50, -inf  ;;  %v388_v6 = vadd.f32 %v344_v35, %v212_v26 }
  0xb7   :  { %v502_v61 = vrot.slane %v501_v53, 2  ;;  %v507_v62 = vrot.slane %v506_v57, 4  ;;  %v451_v1 = vrot.slane %v450_v58, 4  ;;  %v448_v25 = vrot.slane %v447_v24, 1 }
  0xb8   :  { %v412_v2 = vmax.f32 %v396_v54, 0.0  ;;  %v404_v22 = vmax.f32 %v388_v6, 0.0  ;;  %v435_v49 = vmax.f32 %v433_v47, %v434_v3  ;;  %v442_v52 = vmax.f32 %v440_v20, %v441_v33 }
  0xb9   :  { %v508_v5 = vmax.f32 %v506_v57, %v507_v62  ;;  %v380_v7 = vpop.permute.xlu1 %379  ;;  %v452_v10 = vmax.f32 %v450_v58, %v451_v1  ;;  %v348_v13 = vpop.permute.xlu0 %347  ;;  %v503_v16 = vmax.f32 %v501_v53, %v502_v61  ;;  %v697_v57 = vpack.c.bf16 %v491_v42, %v491_v42 }
  0xba   :  { %v513_v11 = vsel %vm414_vm0, %v412_v2, -inf  ;;  %v397_v23 = vadd.f32 %v380_v7, %v221_v9  ;;  %v389_v26 = vadd.f32 %v348_v13, %v912_v19  ;;  %v457_v12 = vsel %vm414_vm0, %v404_v22, -inf }
  0xbb   :  { %v509_v17 = vrot.slane %v508_v5, 2  ;;  %v514_v18 = vrot.slane %v513_v11, 4  ;;  %v453_v21 = vrot.slane %v452_v10, 2  ;;  %v504_v30 = vrot.slane %v503_v16, 1 }
  0xbc   :  { %v413_v38 = vmax.f32 %v397_v23, 0.0  ;;  %v458_v32 = vrot.slane %v457_v12, 4  ;;  %v405_v41 = vmax.f32 %v389_v26, 0.0  ;;  %v498_v19 = vmax.f32 %v496_v8, %v497_v27 }
  0xbd   :  { %v510_v37 = vmax.f32 %v508_v5, %v509_v17  ;;  %v515_v14 = vmax.f32 %v513_v11, %v514_v18  ;;  %v454_v28 = vmax.f32 %v452_v10, %v453_v21  ;;  %v505_v50 = vmax.f32 %v503_v16, %v504_v30 }
  0xbe   :  { %v520_v39 = vsel %vm414_vm0, %v413_v38, -inf  ;;  %v459_v44 = vmax.f32 %v457_v12, %v458_v32  ;;  %v464_v48 = vsel %vm414_vm0, %v405_v41, -inf  ;;  %v449_v58 = vmax.f32 %v447_v24, %v448_v25 }
  0xbf   :  { %v516_v31 = vrot.slane %v515_v14, 2  ;;  %v511_v34 = vrot.slane %v510_v37, 1  ;;  %v455_v45 = vrot.slane %v454_v28, 1  ;;  %v521_v46 = vrot.slane %v520_v39, 4 }
  0xc0   :  { %v460_v35 = vrot.slane %v459_v44, 2  ;;  %v465_v56 = vrot.slane %v464_v48, 4  ;;  %v698_v61 = vpack.c.bf16 %v498_v19, %v498_v19  ;;  %v599_v1 = vunpack.c.l.b16 %v695_v63 }
  0xc1   :  { %v517_v43 = vmax.f32 %v515_v14, %v516_v31  ;;  %v512_v53 = vmax.f32 %v510_v37, %v511_v34  ;;  %v522_v54 = vmax.f32 %v520_v39, %v521_v46  ;;  %v456_v62 = vmax.f32 %v454_v28, %v455_v45 }
  0xc2   :  { %v461_v60 = vmax.f32 %v459_v44, %v460_v35  ;;  %v466_v47 = vmax.f32 %v464_v48, %v465_v56  ;;  %v689_v2 = vpack.c.bf16 %v435_v49, %v435_v49  ;;  %v699_v3 = vpack.c.bf16 %v505_v50, %v505_v50 }
  0xc3   :  { %v518_v51 = vrot.slane %v517_v43, 1  ;;  %v523_v0 = vrot.slane %v522_v54, 2  ;;  %v690_v5 = vpack.c.bf16 %v442_v52, %v442_v52  ;;  %v700_v6 = vpack.c.bf16 %v512_v53, %v512_v53 }
  0xc4   :  { %v462_v4 = vrot.slane %v461_v60, 1  ;;  %v467_v8 = vrot.slane %v466_v47, 2  ;;  %v601_v9 = vunpack.c.l.b16 %v697_v57  ;;  %v691_v10 = vpack.c.bf16 %v449_v58, %v449_v58 }
  0xc5   :  { %v519_v59 = vmax.f32 %v517_v43, %v518_v51  ;;  %v524_v7 = vmax.f32 %v522_v54, %v523_v0  ;;  %v602_v15 = vunpack.c.l.b16 %v698_v61  ;;  %v692_v16 = vpack.c.bf16 %v456_v62, %v456_v62 }
  0xc6   :  { %v463_v13 = vmax.f32 %v461_v60, %v462_v4  ;;  %v468_v18 = vmax.f32 %v466_v47, %v467_v8  ;;  %v621_v20 = vsel %vm607_vm1, %v600_v29, %v599_v1  ;;  %v593_v21 = vunpack.c.l.b16 %v689_v2 }
  0xc7   :  { %v701_v11 = vpack.c.bf16 %v519_v59, %v519_v59  ;;  %v525_v17 = vrot.slane %v524_v7, 1  ;;  %v603_v40 = vunpack.c.l.b16 %v699_v3  ;;  %v594_v22 = vunpack.c.l.b16 %v690_v5 }
  0xc8   :  { %v693_v63 = vpack.c.bf16 %v463_v13, %v463_v13  ;;  %v604_v23 = vunpack.c.l.b16 %v700_v6  ;;  %v469_v37 = vrot.slane %v468_v18, 1  ;;  %v608_v14 = vsel %vm607_vm1, %v916_v36, %v921_v55 }
  0xc9   :  { %v526_v24 = vmax.f32 %v524_v7, %v525_v17  ;;  %v622_v26 = vsel %vm609_vm3, %v601_v9, %v621_v20  ;;  %v595_v27 = vunpack.c.l.b16 %v691_v10  ;;  %v605_v28 = vunpack.c.l.b16 %v701_v11 }
  0xca   :  { %v623_v12 = vsel %vm611_vm2, %v602_v15, %v622_v26  ;;  %v596_v38 = vunpack.c.l.b16 %v692_v16  ;;  %v470_v29 = vmax.f32 %v468_v18, %v469_v37  ;;  %v610_v31 = vsel %vm609_vm3, %v593_v21, %v608_v14 }
  0xcb   :  { %v702_v30 = vpack.c.bf16 %v526_v24, %v526_v24  ;;  %v624_v32 = vsel %vm613_vm5, %v603_v40, %v623_v12  ;;  %v597_v33 = vunpack.c.l.b16 %v693_v63  ;;  %v612_v34 = vsel %vm611_vm2, %v594_v22, %v610_v31 }
  0xcc   :  { %v625_v39 = vsel %vm615_vm4, %v604_v23, %v624_v32  ;;  %v694_v55 = vpack.c.bf16 %v470_v29, %v470_v29  ;;  %v614_v41 = vsel %vm613_vm5, %v595_v27, %v612_v34 }
  0xcd   :  { %v606_v36 = vunpack.c.l.b16 %v702_v30  ;;  %v626_v42 = vsel %vm617_vm6, %v605_v28, %v625_v39  ;;  %v616_v25 = vsel %vm615_vm4, %v596_v38, %v614_v41 }
  0xce   :  { %v598_v44 = vunpack.c.l.b16 %v694_v55  ;;  %v618_v19 = vsel %vm617_vm6, %v597_v33, %v616_v25 }
  0xcf   :  { %v627_v43 = vsel %vm619_vm7, %v606_v36, %v626_v42 }
  0xd0   :  { %v629_v45 = vpack.c.b16 %v627_v43, %v627_v43  ;;  %v620_v46 = vsel %vm619_vm7, %v598_v44, %v618_v19 }
  0xd1   :  { %v628_v48 = vpack.c.b16 %v620_v46, %v620_v46 }
  0xd2   :  { %634 = vst.msk [vmem:[%s958_s3 + $0x4] sm:$0xf] %vm632_vm8, %v629_v45 }
  0xd3   :  { %633 = vst.msk [vmem:[%s958_s3] sm:$0xf] %vm632_vm8, %v628_v48 }

// kernel: mri3d_autoencoder_forward.18
= control target key start
LH: loop header
LB: loop body
LE: loop exit
PB: predicated region body
PF: predicated region fallthrough
CT: control target
= control target key end

     0   :  { %v270_v0 = vmov 0.0   ;;  %vm271_vm0 = vmmov 0   ;;  %vm124_vm1 = vcmask 130048   ;;  %s368_s1 = inlined_call_operand.vmem [shape: f32[128,16], index: 1, kind: input, shape index: {}]   ;;  %s369_s0 = inlined_call_operand.vmem [shape: f32[2,128], index: 0, kind: input, shape index: {}]   ;;  %s370_s3 = inlined_call_operand.vmem [shape: f32[16,128], index: 3, kind: input, shape index: {}]   ;;  %s371_s2 = inlined_call_operand.vmem [shape: f32[1,16], index: 2, kind: input, shape index: {}]   ;;  %s372_s4 = inlined_call_operand.vmem [shape: f32[1,128], index: 4, kind: input, shape index: {}]   ;;  %s373_s5 = inlined_call_operand.vmem [shape: f32[2,128], index: 5, kind: output, shape index: {}]  }
   0x1   :  { %226 = vmatprep.subr.mxu0 %v270_v0  ;;  %v36_v1 = vld [vmem:[%s368_s1 + $0x78] sm:$0xff]  ;;  %v35_v2 = vld [vmem:[%s368_s1 + $0x70] sm:$0xff]  ;;  %258 = vmatprep.mubr.msk.f32.mxu0 %vm271_vm0, %v270_v0  ;;  %v34_v3 = vld [vmem:[%s368_s1 + $0x68] sm:$0xff] }
   0x2   :  { %227 = vmatpush3.msra.mxu0 %v36_v1  ;;  %261 = vmatprep.subr.mxu1 %v270_v0  ;;  %v33_v4 = vld [vmem:[%s368_s1 + $0x60] sm:$0xff]  ;;  %v32_v5 = vld [vmem:[%s368_s1 + $0x58] sm:$0xff]  ;;  %v31_v6 = vld [vmem:[%s368_s1 + $0x50] sm:$0xff] }
   0x3   :  { %228 = vmatprep.subr.mxu0 %v270_v0  ;;  %265 = vmatprep.mubr.msk.f32.mxu1 %vm271_vm0, %v270_v0  ;;  %v30_v7 = vld [vmem:[%s368_s1 + $0x48] sm:$0xff]  ;;  %v29_v8 = vld [vmem:[%s368_s1 + $0x40] sm:$0xff]  ;;  %v28_v9 = vld [vmem:[%s368_s1 + $0x38] sm:$0xff] }
   0x4   :  { %229 = vmatpush3.msra.mxu0 %v35_v2  ;;  %v27_v10 = vld [vmem:[%s368_s1 + $0x30] sm:$0xff]  ;;  %v26_v11 = vld [vmem:[%s368_s1 + $0x28] sm:$0xff]  ;;  %v25_v12 = vld [vmem:[%s368_s1 + $0x20] sm:$0xff] }
   0x5   :  { %230 = vmatprep.subr.mxu0 %v270_v0  ;;  %v24_v13 = vld [vmem:[%s368_s1 + $0x18] sm:$0xff]  ;;  %v23_v14 = vld [vmem:[%s368_s1 + $0x10] sm:$0xff]  ;;  %v22_v15 = vld [vmem:[%s368_s1 + $0x8] sm:$0xff] }
   0x6   :  { %231 = vmatpush3.msra.mxu0 %v34_v3  ;;  %v21_v16 = vld [vmem:[%s368_s1] sm:$0xff]  ;;  %v116_v18 = vld [vmem:[%s370_s3 + $0x8] sm:$0xff] }
   0x7   :  { %232 = vmatprep.subr.mxu0 %v270_v0  ;;  %v20_v17 = vld [vmem:[%s369_s0] sm:$0x3]  ;;  %262 = vmatpush3.msra.mxu1 %v116_v18 }
   0x8   :  { %233 = vmatpush3.msra.mxu0 %v33_v4  ;;  %263 = vmatprep.subr.mxu1 %v270_v0  ;;  %v115_v19 = vld [vmem:[%s370_s3] sm:$0xff] }
   0x9   :  { %234 = vmatprep.subr.mxu0 %v270_v0  ;;  %264 = vmatpush3.msra.mxu1 %v115_v19  ;;  %v203_v20 = vld [vmem:[%s371_s2] ss:$0 sm:$0xff] }
   0xa   :  { %235 = vmatpush3.msra.mxu0 %v32_v5  ;;  %v204_v25 = vld [vmem:[%s372_s4] ss:$0 sm:$0xff] }
   0xb   :  { %236 = vmatprep.subr.mxu0 %v270_v0 }
   0xc   :  { %237 = vmatpush3.msra.mxu0 %v31_v6 }
   0xd   :  { %238 = vmatprep.subr.mxu0 %v270_v0 }
   0xe   :  { %239 = vmatpush3.msra.mxu0 %v30_v7 }
   0xf   :  { %240 = vmatprep.subr.mxu0 %v270_v0 }
  0x10   :  { %241 = vmatpush3.msra.mxu0 %v29_v8 }
  0x11   :  { %242 = vmatprep.subr.mxu0 %v270_v0 }
  0x12   :  { %243 = vmatpush3.msra.mxu0 %v28_v9 }
  0x13   :  { %244 = vmatprep.subr.mxu0 %v270_v0 }
  0x14   :  { %245 = vmatpush3.msra.mxu0 %v27_v10 }
  0x15   :  { %246 = vmatprep.subr.mxu0 %v270_v0 }
  0x16   :  { %247 = vmatpush3.msra.mxu0 %v26_v11 }
  0x17   :  { %248 = vmatprep.subr.mxu0 %v270_v0 }
  0x18   :  { %249 = vmatpush3.msra.mxu0 %v25_v12 }
  0x19   :  { %250 = vmatprep.subr.mxu0 %v270_v0 }
  0x1a   :  { %251 = vmatpush3.msra.mxu0 %v24_v13 }
  0x1b   :  { %252 = vmatprep.subr.mxu0 %v270_v0 }
  0x1c   :  { %253 = vmatpush3.msra.mxu0 %v23_v14 }
  0x1d   :  { %254 = vmatprep.subr.mxu0 %v270_v0 }
  0x1e   :  { %255 = vmatpush3.msra.mxu0 %v22_v15 }
  0x1f   :  { %256 = vmatprep.subr.mxu0 %v270_v0 }
  0x20   :  { %257 = vmatpush3.msra.mxu0 %v21_v16 }
  0x21   :  { %259 = vmatmul.mubr.f32.vlgmr.msra.gmra.mxu0 %v20_v17 }
  0xe1   :  { %v110_v21 = vpop.f32.mrf.mxu0 }
  0xe2   :  { %v111_v22 = vadd.f32 %v203_v20, %v110_v21 }
  0xe3   :  { %v260_v23 = vpop.f32.mrf.mxu0 }
  0xe4   :  { %v114_v24 = vmax.f32 %v111_v22, 0.0 }
  0xe6   :  { %266 = vmatmul.mubr.msk.f32.vlgmr.msra.gmra.mxu1 %vm124_vm1, %v114_v24 }
 0x1a6   :  { %v194_v26 = vpop.f32.mrf.mxu1 }
 0x1a7   :  { %v195_v27 = vadd.f32 %v204_v25, %v194_v26 }
 0x1a8   :  { %v267_v28 = vpop.f32.mrf.mxu1 }
 0x1a9   :  { %198 = vst [vmem:[%s373_s5] sm:$0x3] %v195_v27 }

// kernel: mri3d_autoencoder_forward.19
= control target key start
LH: loop header
LB: loop body
LE: loop exit
PB: predicated region body
PF: predicated region fallthrough
CT: control target
= control target key end

     0   :  { %v448_v0 = vmov 0   ;;  %vm254_vm0 = vcmask 392192   ;;  %vm341_vm1 = vcmask 130048   ;;  %vm339_vm2 = vcmask 125952   ;;  %s582_s0 = inlined_call_operand.vmem [shape: bf16[432,16], index: 0, kind: input, shape index: {}]   ;;  %s583_s1 = inlined_call_operand.vmem [shape: bf16[8,432], index: 1, kind: input, shape index: {}]   ;;  %s584_s2 = inlined_call_operand.vmem [shape: f32[8,1], index: 2, kind: input, shape index: {}]   ;;  %s585_s3 = inlined_call_operand.vmem [shape: bf16[8,16], index: 3, kind: output, shape index: {0}]   ;;  %s586_s4 = inlined_call_operand.vmem [shape: f32[1,8,2], index: 4, kind: output, shape index: {1}]  }
   0x1   :  { %298 = vmatprep.subr.bf16.mxu1 %v448_v0  ;;  %v417_v1 = vld [vmem:[%s582_s0 + $0x78] sm:$0xff]   ;;  %416 = vset.pattern.permute.xlu0 %v448_v0  ;;  %v420_v4 = vld [vmem:[%s582_s0 + $0x70] sm:$0xff]   ;;  %v423_v7 = vld [vmem:[%s582_s0 + $0x68] sm:$0xff]   ;;  %vm349_vm3 = vcmask 7168   ;;  %vm351_vm4 = vcmask 15360  }
   0x2   :  { %v418_v2 = vld [vmem:[%s582_s0 + $0xb8] sm:$0xff]   ;;  %393 = vmatprep.subr.bf16.mxu0 %v417_v1  ;;  %v421_v5 = vld [vmem:[%s582_s0 + $0xb0] sm:$0xff]   ;;  %v424_v8 = vld [vmem:[%s582_s0 + $0xa8] sm:$0xff]  }
   0x3   :  { %v419_v3 = vld [vmem:[%s582_s0 + $0x38] sm:$0xff]   ;;  %299 = vmatpush1.bf16.msra.mxu1 %v418_v2  ;;  %v422_v6 = vld [vmem:[%s582_s0 + $0x30] sm:$0xff]   ;;  %v425_v9 = vld [vmem:[%s582_s0 + $0x28] sm:$0xff]  }
   0x4   :  { %394 = vmatpush3.bf16.msra.mxu0 %v419_v3  ;;  %300 = vmatprep.subr.bf16.mxu1 %v448_v0  ;;  %v426_v10 = vld [vmem:[%s582_s0 + $0x60] sm:$0xff]   ;;  %v429_v13 = vld [vmem:[%s582_s0 + $0x58] sm:$0xff]   ;;  %v432_v16 = vld [vmem:[%s582_s0 + $0x50] sm:$0xff]  }
   0x5   :  { %395 = vmatprep.subr.bf16.mxu0 %v420_v4  ;;  %v427_v11 = vld [vmem:[%s582_s0 + $0xa0] sm:$0xff]   ;;  %v430_v14 = vld [vmem:[%s582_s0 + $0x98] sm:$0xff]   ;;  %v433_v17 = vld [vmem:[%s582_s0 + $0x90] sm:$0xff]  }
   0x6   :  { %v428_v12 = vld [vmem:[%s582_s0 + $0x20] sm:$0xff]   ;;  %v431_v15 = vld [vmem:[%s582_s0 + $0x18] sm:$0xff]   ;;  %v434_v18 = vld [vmem:[%s582_s0 + $0x10] sm:$0xff]  }
   0x7   :  { %301 = vmatpush1.bf16.msra.mxu1 %v421_v5  ;;  %v435_v19 = vld [vmem:[%s582_s0 + $0x48] sm:$0xff]   ;;  %v17_v22 = vld [vmem:[%s583_s1] sm:$0xff]  ;;  %v443_v31 = vld [vmem:[%s582_s0 + $0xd0] sm:$0xff]  }
   0x8   :  { %396 = vmatpush3.bf16.msra.mxu0 %v422_v6  ;;  %302 = vmatprep.subr.bf16.mxu1 %v448_v0  ;;  %v436_v20 = vld [vmem:[%s582_s0 + $0x88] sm:$0xff]   ;;  %v438_v23 = vld [vmem:[%s582_s0 + $0x40] sm:$0xff]   ;;  %v362_v24 = vcombine.high %v17_v22, %v17_v22  ;;  %v361_v30 = vcombine.low %v17_v22, %v17_v22 }
   0x9   :  { %397 = vmatprep.subr.bf16.mxu0 %v423_v7  ;;  %v437_v21 = vld [vmem:[%s582_s0 + $0x8] sm:$0xff]   ;;  %v439_v25 = vld [vmem:[%s582_s0 + $0x80] sm:$0xff]  }
   0xa   :  { %290 = vmatprep.mubr.bf16.mxu0 %v362_v24  ;;  %v18_v26 = vld [vmem:[%s583_s1 + $0x8] sm:$0xff]  ;;  %v73_v27 = vld [vmem:[%s584_s2] sm:$0xff] }
   0xb   :  { %303 = vmatpush1.bf16.msra.mxu1 %v424_v8  ;;  %v440_v28 = vld [vmem:[%s582_s0] sm:$0xff]   ;;  %v364_v29 = vcombine.high %v18_v26, %v18_v26  ;;  %76 = vperm.xlu0 %416, %v73_v27   ;;  %v444_v32 = vld [vmem:[%s582_s0 + $0xc8] sm:$0xff]   ;;  %v363_v34 = vcombine.low %v18_v26, %v18_v26 }
   0xc   :  { %398 = vmatpush3.bf16.msra.mxu0 %v425_v9  ;;  %304 = vmatprep.subr.bf16.mxu1 %v448_v0  ;;  %v445_v33 = vld [vmem:[%s582_s0 + $0xc0] sm:$0xff]  }
   0xd   :  { %399 = vmatprep.subr.bf16.mxu0 %v426_v10  ;;  %392 = vmatprep.mubr.msk.bf16.mxu1 %vm254_vm0, %v364_v29 }
   0xf   :  { %305 = vmatpush1.bf16.msra.mxu1 %v427_v11 }
  0x10   :  { %400 = vmatpush3.bf16.msra.mxu0 %v428_v12  ;;  %306 = vmatprep.subr.bf16.mxu1 %v448_v0 }
  0x11   :  { %401 = vmatprep.subr.bf16.mxu0 %v429_v13 }
  0x13   :  { %307 = vmatpush1.bf16.msra.mxu1 %v430_v14 }
  0x14   :  { %402 = vmatpush3.bf16.msra.mxu0 %v431_v15  ;;  %308 = vmatprep.subr.bf16.mxu1 %v448_v0 }
  0x15   :  { %403 = vmatprep.subr.bf16.mxu0 %v432_v16 }
  0x17   :  { %309 = vmatpush1.bf16.msra.mxu1 %v433_v17 }
  0x18   :  { %404 = vmatpush3.bf16.msra.mxu0 %v434_v18  ;;  %310 = vmatprep.subr.bf16.mxu1 %v448_v0 }
  0x19   :  { %405 = vmatprep.subr.bf16.mxu0 %v435_v19 }
  0x1b   :  { %311 = vmatpush1.bf16.msra.mxu1 %v436_v20 }
  0x1c   :  { %406 = vmatpush3.bf16.msra.mxu0 %v437_v21  ;;  %312 = vmatprep.subr.bf16.mxu1 %v448_v0 }
  0x1d   :  { %407 = vmatprep.subr.bf16.mxu0 %v438_v23 }
  0x1f   :  { %313 = vmatpush1.bf16.msra.mxu1 %v439_v25 }
  0x20   :  { %408 = vmatpush3.bf16.msra.mxu0 %v440_v28  ;;  %324 = vmatprep.subr.bf16.mxu1 %v448_v0 }
  0x23   :  { %291 = vmatmul.mubr.bf16.vlgmr.msra.gmra.mxu0 %v361_v30  ;;  %325 = vmatpush2.bf16.msra.mxu1 %v443_v31 }
  0x24   :  { %326 = vmatprep.subr.bf16.mxu1 %v448_v0 }
  0x27   :  { %327 = vmatpush2.bf16.msra.mxu1 %v444_v32 }
  0x28   :  { %328 = vmatprep.subr.bf16.mxu1 %v448_v0 }
  0x2b   :  { %329 = vmatpush2.bf16.msra.mxu1 %v445_v33 }
  0x2e   :  { %331 = vmatmul.mubr.bf16.vlgmr.msra.gmra.mxu1 %v363_v34 }
  0x86   :  { %v77_v40 = vpop.permute.xlu0 %76 }
  0xe3   :  { %v409_v35 = vpop.f32.mrf.mxu0 }
  0xe5   :  { %v410_v36 = vpop.f32.mrf.mxu0 }
  0xe6   :  { %v411_v38 = vadd.f32 %v410_v36, %v409_v35 }
  0xe7   :  { %v412_v37 = vpop.f32.mrf.mxu0 }
  0xe8   :  { %v293_v41 = vadd.f32 %v411_v38, %v77_v40 }
  0xe9   :  { %v413_v39 = vpop.f32.mrf.mxu0 }
  0xee   :  { %v332_v42 = vpop.f32.mrf.mxu1 }
  0xef   :  { %v333_v43 = vadd.f32 %v332_v42, %v293_v41 }
  0xf0   :  { %v334_v44 = vpop.f32.mrf.mxu1 }
  0xf1   :  { %v338_v45 = vpack.c.bf16 %v333_v43, %v333_v43  ;;  %v342_v46 = vsel %vm341_vm1, %v333_v43, 0.0  ;;  %v345_v47 = vmul.f32 %v333_v43, %v333_v43 }
  0xf2   :  { %v335_v48 = vpop.f32.mrf.mxu1  ;;  %343 = vadd.xlane.f32.xlu0 %v342_v46 }
  0xf3   :  { %340 = vst.msk [vmem:[%s585_s3] sm:$0xf] %vm339_vm2, %v338_v45  ;;  %v346_v49 = vsel %vm341_vm1, %v345_v47, 0.0 }
  0xf4   :  { %v336_v50 = vpop.f32.mrf.mxu1  ;;  %347 = vadd.xlane.f32.xlu1 %v346_v49 }
 0x17b   :  { %v344_v51 = vpop.xlane.xlu0 %343 }
 0x17d   :  { %v348_v52 = vpop.xlane.xlu1 %347 }
 0x17e   :  { %v350_v53 = vsel %vm349_vm3, %v344_v51, %v348_v52 }
 0x17f   :  { %352 = vst.msk [vmem:[%s586_s4] sm:$0xff] %vm351_vm4, %v350_v53 }

// kernel: mri3d_autoencoder_forward.20
= control target key start
LH: loop header
LB: loop body
LE: loop exit
PB: predicated region body
PF: predicated region fallthrough
CT: control target
= control target key end

     0   :  { %v302_v0 = vmov 0   ;;  %v43_v17 = vlaneseq  ;;  %vm255_vm0 = vcmask 1041409   ;;  %vm258_vm1 = vcmask 1042434   ;;  %s417_s1 = inlined_call_operand.vmem [shape: f32[8,1,1], index: 1, kind: input, shape index: {}]   ;;  %s418_s2 = inlined_call_operand.vmem [shape: f32[8,1,1], index: 2, kind: input, shape index: {}]   ;;  %s419_s0 = inlined_call_operand.vmem [shape: bf16[8,1,16], index: 0, kind: input, shape index: {}]   ;;  %s420_s3 = inlined_call_operand.vmem [shape: bf16[8,16], index: 3, kind: output, shape index: {}]  }
   0x1   :  { %301 = vset.pattern.permute.xlu1 %v302_v0  ;;  %300 = vset.pattern.permute.xlu0 %v302_v0  ;;  %v31_v1 = vld [vmem:[%s417_s1 + $0x1] sm:$0x1]  ;;  %v30_v2 = vld [vmem:[%s417_s1] sm:$0x1]  ;;  %v32_v3 = vld [vmem:[%s417_s1 + $0x2] sm:$0x1] }
   0x2   :  { %49 = vperm.xlu0 %300, %v31_v1   ;;  %40 = vperm.xlu1 %301, %v30_v2   ;;  %v33_v4 = vld [vmem:[%s417_s1 + $0x3] sm:$0x1]  ;;  %v119_v5 = vld [vmem:[%s418_s2 + $0x1] sm:$0x1]  ;;  %v34_v6 = vld [vmem:[%s417_s1 + $0x4] sm:$0x1] }
   0x3   :  { %v120_v7 = vld [vmem:[%s418_s2 + $0x2] sm:$0x1]  ;;  %v35_v8 = vld [vmem:[%s417_s1 + $0x5] sm:$0x1]  ;;  %v118_v9 = vld [vmem:[%s418_s2] sm:$0x1] }
   0x4   :  { %v121_v10 = vld [vmem:[%s418_s2 + $0x3] sm:$0x1]  ;;  %v36_v11 = vld [vmem:[%s417_s1 + $0x6] sm:$0x1]  ;;  %v122_v12 = vld [vmem:[%s418_s2 + $0x4] sm:$0x1] }
   0x5   :  { %v37_v13 = vld [vmem:[%s417_s1 + $0x7] sm:$0x1]  ;;  %v123_v14 = vld [vmem:[%s418_s2 + $0x5] sm:$0x1]  ;;  %v124_v15 = vld [vmem:[%s418_s2 + $0x6] sm:$0x1] }
   0x6   :  { %58 = vperm.xlu0 %300, %v32_v3   ;;  %67 = vperm.xlu1 %301, %v33_v4   ;;  %v125_v16 = vld [vmem:[%s418_s2 + $0x7] sm:$0x1]  ;;  %v44_v18 = vshrl.u32 %v43_v17, 7  ;;  %v15_v24 = vld [vmem:[%s419_s0 + $0x1] sm:$0x1]  ;;  %vm261_vm2 = vcmask 1043459  }
   0x7   :  { %v16_v25 = vld [vmem:[%s419_s0 + $0x2] sm:$0x1]  ;;  %v23_v26 = vunpack.c.l.bf16 %v15_v24  ;;  %v14_v30 = vld [vmem:[%s419_s0] sm:$0x1]  ;;  %v17_v33 = vld [vmem:[%s419_s0 + $0x3] sm:$0x1] }
   0x8   :  { %v371_v21 = vsub.s32 0, %v44_v18  ;;  %v24_v31 = vunpack.c.l.bf16 %v16_v25  ;;  %v22_v36 = vunpack.c.l.bf16 %v14_v30  ;;  %v25_v40 = vunpack.c.l.bf16 %v17_v33  ;;  %v18_v45 = vld [vmem:[%s419_s0 + $0x4] sm:$0x1]  ;;  %v19_v56 = vld [vmem:[%s419_s0 + $0x5] sm:$0x1] }
   0x9   :  { %v26_v54 = vunpack.c.l.bf16 %v18_v45  ;;  %v20_v61 = vld [vmem:[%s419_s0 + $0x6] sm:$0x1]  ;;  %v27_v63 = vunpack.c.l.bf16 %v19_v56  ;;  %vm264_vm3 = vcmask 1044484   ;;  %vm267_vm4 = vcmask 1045509  }
   0xa   :  { %137 = vperm.xlu0 %300, %v119_v5   ;;  %76 = vperm.xlu1 %301, %v34_v6   ;;  %v21_v6 = vld [vmem:[%s419_s0 + $0x7] sm:$0x1]  ;;  %vm270_vm5 = vcmask 1046534   ;;  %vm273_vm6 = vcmask 1047559   ;;  %vm277_vm7 = vcmask 125952  }
   0xe   :  { %146 = vperm.xlu0 %300, %v120_v7   ;;  %85 = vperm.xlu1 %301, %v35_v8   ;;  %v28_v7 = vunpack.c.l.bf16 %v20_v61 }
  0x12   :  { %128 = vperm.xlu0 %300, %v118_v9   ;;  %155 = vperm.xlu1 %301, %v121_v10  }
  0x16   :  { %94 = vperm.xlu0 %300, %v36_v11   ;;  %164 = vperm.xlu1 %301, %v122_v12  }
  0x1a   :  { %103 = vperm.xlu0 %300, %v37_v13   ;;  %173 = vperm.xlu1 %301, %v123_v14  }
  0x1e   :  { %182 = vperm.xlu0 %300, %v124_v15   ;;  %191 = vperm.xlu1 %301, %v125_v16   ;;  %v29_v15 = vunpack.c.l.bf16 %v21_v6 }
  0x7d   :  { %v50_v19 = vpop.permute.xlu0 %49  ;;  %v41_v20 = vpop.permute.xlu1 %40 }
  0x7e   :  { %v55_v27 = vrot.slane %v50_v19, %v371_v21  ;;  %v46_v39 = vrot.slane %v41_v20, %v371_v21 }
  0x80   :  { %v111_v35 = vmul.f32 %v55_v27, %v23_v26  ;;  %v110_v49 = vmul.f32 %v46_v39, %v22_v36 }
  0x81   :  { %v59_v22 = vpop.permute.xlu0 %58  ;;  %v68_v23 = vpop.permute.xlu1 %67 }
  0x82   :  { %v64_v32 = vrot.slane %v59_v22, %v371_v21  ;;  %v73_v41 = vrot.slane %v68_v23, %v371_v21 }
  0x84   :  { %v112_v43 = vmul.f32 %v64_v32, %v24_v31  ;;  %v113_v50 = vmul.f32 %v73_v41, %v25_v40 }
  0x85   :  { %v138_v28 = vpop.permute.xlu0 %137  ;;  %v77_v29 = vpop.permute.xlu1 %76 }
  0x86   :  { %v143_v34 = vrot.slane %v138_v28, %v371_v21  ;;  %v82_v55 = vrot.slane %v77_v29, %v371_v21 }
  0x88   :  { %v199_v44 = vadd.f32 %v143_v34, %v111_v35  ;;  %v114_v3 = vmul.f32 %v82_v55, %v26_v54 }
  0x89   :  { %v147_v37 = vpop.permute.xlu0 %146  ;;  %v86_v38 = vpop.permute.xlu1 %85 }
  0x8a   :  { %v152_v42 = vrot.slane %v147_v37, %v371_v21  ;;  %v207_v53 = vmax.f32 %v199_v44, 0.0  ;;  %v91_v0 = vrot.slane %v86_v38, %v371_v21 }
  0x8c   :  { %v200_v46 = vadd.f32 %v152_v42, %v112_v43  ;;  %v292_v2 = vpack.c.bf16 %v207_v53, %v207_v53  ;;  %v115_v14 = vmul.f32 %v91_v0, %v27_v63 }
  0x8d   :  { %v129_v47 = vpop.permute.xlu0 %128  ;;  %v156_v48 = vpop.permute.xlu1 %155 }
  0x8e   :  { %v134_v51 = vrot.slane %v129_v47, %v371_v21  ;;  %v161_v52 = vrot.slane %v156_v48, %v371_v21  ;;  %v208_v59 = vmax.f32 %v200_v46, 0.0  ;;  %v247_v18 = vunpack.c.l.b16 %v292_v2 }
  0x90   :  { %v198_v57 = vadd.f32 %v134_v51, %v110_v49  ;;  %v201_v58 = vadd.f32 %v161_v52, %v113_v50  ;;  %v293_v8 = vpack.c.bf16 %v208_v59, %v208_v59  ;;  %v254_v33 = vrot.slane %v247_v18, 7 }
  0x91   :  { %v95_v60 = vpop.permute.xlu0 %94  ;;  %v165_v62 = vpop.permute.xlu1 %164 }
  0x92   :  { %v206_v1 = vmax.f32 %v198_v57, 0.0  ;;  %v209_v4 = vmax.f32 %v201_v58, 0.0  ;;  %v170_v5 = vrot.slane %v165_v62, %v371_v21  ;;  %v100_v10 = vrot.slane %v95_v60, %v371_v21 }
  0x93   :  { %v248_v23 = vunpack.c.l.b16 %v293_v8 }
  0x94   :  { %v291_v9 = vpack.c.bf16 %v206_v1, %v206_v1  ;;  %v202_v11 = vadd.f32 %v170_v5, %v114_v3  ;;  %v294_v19 = vpack.c.bf16 %v209_v4, %v209_v4  ;;  %v116_v25 = vmul.f32 %v100_v10, %v28_v7 }
  0x95   :  { %v104_v12 = vpop.permute.xlu0 %103  ;;  %v174_v13 = vpop.permute.xlu1 %173  ;;  %v257_v40 = vrot.slane %v248_v23, 6 }
  0x96   :  { %v109_v16 = vrot.slane %v104_v12, %v371_v21  ;;  %v179_v17 = vrot.slane %v174_v13, %v371_v21  ;;  %v210_v20 = vmax.f32 %v202_v11, 0.0  ;;  %v246_v24 = vunpack.c.l.b16 %v291_v9 }
  0x97   :  { %v249_v34 = vunpack.c.l.b16 %v294_v19 }
  0x98   :  { %v203_v22 = vadd.f32 %v179_v17, %v115_v14  ;;  %v295_v26 = vpack.c.bf16 %v210_v20, %v210_v20  ;;  %v117_v29 = vmul.f32 %v109_v16, %v29_v15  ;;  %v256_v39 = vsel %vm255_vm0, %v254_v33, %v246_v24 }
  0x99   :  { %v183_v27 = vpop.permute.xlu0 %182  ;;  %v192_v28 = vpop.permute.xlu1 %191  ;;  %v260_v44 = vrot.slane %v249_v34, 5  ;;  %v259_v45 = vsel %vm258_vm1, %v257_v40, %v256_v39 }
  0x9a   :  { %v211_v30 = vmax.f32 %v203_v22, 0.0  ;;  %v188_v31 = vrot.slane %v183_v27, %v371_v21  ;;  %v197_v32 = vrot.slane %v192_v28, %v371_v21  ;;  %v250_v35 = vunpack.c.l.b16 %v295_v26 }
  0x9b   :  { %v262_v51 = vsel %vm261_vm2, %v260_v44, %v259_v45 }
  0x9c   :  { %v296_v36 = vpack.c.bf16 %v211_v30, %v211_v30  ;;  %v204_v37 = vadd.f32 %v188_v31, %v116_v25  ;;  %v205_v38 = vadd.f32 %v197_v32, %v117_v29  ;;  %v263_v46 = vrot.slane %v250_v35, 4 }
  0x9e   :  { %v251_v41 = vunpack.c.l.b16 %v296_v36  ;;  %v212_v42 = vmax.f32 %v204_v37, 0.0  ;;  %v213_v43 = vmax.f32 %v205_v38, 0.0  ;;  %v265_v52 = vsel %vm264_vm3, %v263_v46, %v262_v51 }
  0xa0   :  { %v297_v47 = vpack.c.bf16 %v212_v42, %v212_v42  ;;  %v298_v48 = vpack.c.bf16 %v213_v43, %v213_v43  ;;  %v266_v21 = vrot.slane %v251_v41, 3 }
  0xa2   :  { %v252_v49 = vunpack.c.l.b16 %v297_v47  ;;  %v253_v50 = vunpack.c.l.b16 %v298_v48  ;;  %v268_v55 = vsel %vm267_vm4, %v266_v21, %v265_v52 }
  0xa4   :  { %v269_v53 = vrot.slane %v252_v49, 2  ;;  %v272_v54 = vrot.slane %v253_v50, 1 }
  0xa6   :  { %v271_v56 = vsel %vm270_vm5, %v269_v53, %v268_v55 }
  0xa7   :  { %v274_v57 = vsel %vm273_vm6, %v272_v54, %v271_v56 }
  0xa8   :  { %v275_v58 = vpack.c.b16 %v274_v57, %v274_v57 }
  0xaa   :  { %278 = vst.msk [vmem:[%s420_s3] sm:$0xf] %vm277_vm7, %v275_v58 }

// kernel: mri3d_autoencoder_forward.21
= control target key start
LH: loop header
LB: loop body
LE: loop exit
PB: predicated region body
PF: predicated region fallthrough
CT: control target
= control target key end

     0   :  { %v243_v0 = vmov 0   ;;  %vm142_vm0 = vcmask 719872   ;;  %vm146_vm1 = vcmask 1043456   ;;  %vm199_vm2 = vcmask 7168   ;;  %s326_s0 = inlined_call_operand.vmem [shape: bf16[216,128], index: 0, kind: input, shape index: {}]   ;;  %s327_s2 = inlined_call_operand.vmem [shape: f32[4,1], index: 2, kind: input, shape index: {}]   ;;  %s328_s1 = inlined_call_operand.vmem [shape: bf16[4,216], index: 1, kind: input, shape index: {}]   ;;  %s329_s3 = inlined_call_operand.vmem [shape: bf16[4,128], index: 3, kind: output, shape index: {0}]   ;;  %s330_s4 = inlined_call_operand.vmem [shape: f32[1,4,2], index: 4, kind: output, shape index: {1}]  }
   0x1   :  { %150 = vmatprep.subr.bf16.mxu0 %v243_v0  ;;  %v229_v1 = vld [vmem:[%s326_s0 + $0x38] sm:$0xff]   ;;  %228 = vset.pattern.permute.xlu0 %v243_v0  ;;  %v230_v2 = vld [vmem:[%s326_s0 + $0x30] sm:$0xff]   ;;  %v231_v3 = vld [vmem:[%s326_s0 + $0x28] sm:$0xff]   ;;  %vm201_vm3 = vcmask 11264  }
   0x2   :  { %151 = vmatpush1.bf16.msra.mxu0 %v229_v1  ;;  %v232_v4 = vld [vmem:[%s326_s0 + $0x20] sm:$0xff]   ;;  %v233_v6 = vld [vmem:[%s326_s0 + $0x18] sm:$0xff]   ;;  %v234_v9 = vld [vmem:[%s326_s0 + $0x10] sm:$0xff]  }
   0x3   :  { %152 = vmatprep.subr.bf16.mxu0 %v243_v0  ;;  %v45_v5 = vld [vmem:[%s327_s2] sm:$0xf]  ;;  %v235_v10 = vld [vmem:[%s326_s0 + $0x8] sm:$0xff]   ;;  %v239_v15 = vld [vmem:[%s326_s0 + $0x58] sm:$0xff]  }
   0x4   :  { %v211_v7 = vld.sshfl [vmem:[%s328_s1] sm:$0x33 pattern:$0x76325410]  ;;  %48 = vperm.xlu0 %228, %v45_v5   ;;  %v237_v12 = vld [vmem:[%s326_s0 + $0x68] ss:$0 sps:$4 sm:$0xff]  }
   0x5   :  { %v59_v8 = vcombine.high %v211_v7, %v211_v7  ;;  %v236_v11 = vld [vmem:[%s326_s0] sm:$0xff]   ;;  %v148_v13 = vsel %vm146_vm1, %v237_v12, 0  ;;  %v240_v16 = vld [vmem:[%s326_s0 + $0x50] sm:$0xff]   ;;  %v241_v17 = vld [vmem:[%s326_s0 + $0x48] sm:$0xff]  }
   0x6   :  { %153 = vmatpush1.bf16.msra.mxu0 %v230_v2  ;;  %v238_v14 = vld [vmem:[%s326_s0 + $0x60] sm:$0xff]  }
   0x7   :  { %154 = vmatprep.subr.bf16.mxu0 %v243_v0  ;;  %226 = vmatprep.mubr.msk.bf16.mxu0 %vm142_vm0, %v59_v8  ;;  %v242_v18 = vld [vmem:[%s326_s0 + $0x40] sm:$0xff]  }
   0xa   :  { %155 = vmatpush1.bf16.msra.mxu0 %v231_v3 }
   0xb   :  { %156 = vmatprep.subr.bf16.mxu0 %v243_v0 }
   0xe   :  { %157 = vmatpush1.bf16.msra.mxu0 %v232_v4 }
   0xf   :  { %158 = vmatprep.subr.bf16.mxu0 %v243_v0 }
  0x12   :  { %159 = vmatpush1.bf16.msra.mxu0 %v233_v6 }
  0x13   :  { %160 = vmatprep.subr.bf16.mxu0 %v243_v0 }
  0x16   :  { %161 = vmatpush1.bf16.msra.mxu0 %v234_v9 }
  0x17   :  { %162 = vmatprep.subr.bf16.mxu0 %v243_v0 }
  0x1a   :  { %163 = vmatpush1.bf16.msra.mxu0 %v235_v10 }
  0x1b   :  { %164 = vmatprep.subr.bf16.mxu0 %v243_v0 }
  0x1e   :  { %165 = vmatpush1.bf16.msra.mxu0 %v236_v11 }
  0x1f   :  { %170 = vmatprep.subr.bf16.mxu0 %v243_v0 }
  0x22   :  { %171 = vmatpush2.bf16.msra.mxu0 %v148_v13 }
  0x23   :  { %172 = vmatprep.subr.bf16.mxu0 %v243_v0 }
  0x26   :  { %173 = vmatpush2.bf16.msra.mxu0 %v238_v14 }
  0x27   :  { %174 = vmatprep.subr.bf16.mxu0 %v243_v0 }
  0x2a   :  { %175 = vmatpush2.bf16.msra.mxu0 %v239_v15 }
  0x2b   :  { %176 = vmatprep.subr.bf16.mxu0 %v243_v0 }
  0x2e   :  { %177 = vmatpush2.bf16.msra.mxu0 %v240_v16 }
  0x2f   :  { %178 = vmatprep.subr.bf16.mxu0 %v243_v0 }
  0x32   :  { %179 = vmatpush2.bf16.msra.mxu0 %v241_v17 }
  0x33   :  { %180 = vmatprep.subr.bf16.mxu0 %v243_v0 }
  0x36   :  { %181 = vmatpush2.bf16.msra.mxu0 %v242_v18 }
  0x39   :  { %183 = vmatmul.mubr.bf16.vlgmr.msra.gmra.mxu0 %v211_v7 }
  0x7f   :  { %v49_v19 = vpop.permute.xlu0 %48 }
  0xf9   :  { %v184_v20 = vpop.f32.mrf.mxu0 }
  0xfa   :  { %v185_v21 = vadd.f32 %v184_v20, %v49_v19 }
  0xfb   :  { %v186_v22 = vpop.f32.mrf.mxu0 }
  0xfc   :  { %v190_v23 = vpack.c.bf16 %v185_v21, %v185_v21  ;;  %v192_v24 = vsel %vm146_vm1, %v185_v21, 0.0  ;;  %v195_v25 = vmul.f32 %v185_v21, %v185_v21 }
  0xfd   :  { %v187_v26 = vpop.f32.mrf.mxu0  ;;  %193 = vadd.xlane.f32.xlu0 %v192_v24 }
  0xfe   :  { %191 = vst [vmem:[%s329_s3] sm:$0x3] %v190_v23  ;;  %v196_v27 = vsel %vm146_vm1, %v195_v25, 0.0 }
  0xff   :  { %v188_v28 = vpop.f32.mrf.mxu0  ;;  %197 = vadd.xlane.f32.xlu1 %v196_v27 }
 0x186   :  { %v194_v29 = vpop.xlane.xlu0 %193 }
 0x188   :  { %v198_v30 = vpop.xlane.xlu1 %197 }
 0x189   :  { %v200_v31 = vsel %vm199_vm2, %v194_v29, %v198_v30 }
 0x18a   :  { %202 = vst.msk [vmem:[%s330_s4] sm:$0xf] %vm201_vm3, %v200_v31 }

// kernel: mri3d_autoencoder_forward.22
= control target key start
LH: loop header
LB: loop body
LE: loop exit
PB: predicated region body
PF: predicated region fallthrough
CT: control target
= control target key end

     0   :  { %v210_v0 = vmov 0   ;;  %v31_v9 = vlaneseq  ;;  %v211_v16 = vmov 1983009808   ;;  %vm183_vm0 = vcmask 1041409   ;;  %s271_s1 = inlined_call_operand.vmem [shape: f32[4,1,1], index: 1, kind: input, shape index: {}]   ;;  %s272_s2 = inlined_call_operand.vmem [shape: f32[4,1,1], index: 2, kind: input, shape index: {}]   ;;  %s273_s0 = inlined_call_operand.vmem [shape: bf16[4,1,128], index: 0, kind: input, shape index: {}]   ;;  %s274_s3 = inlined_call_operand.vmem [shape: bf16[4,128], index: 3, kind: output, shape index: {}]  }
   0x1   :  { %209 = vset.pattern.permute.xlu1 %v210_v0  ;;  %208 = vset.pattern.permute.xlu0 %v210_v0  ;;  %v23_v1 = vld [vmem:[%s271_s1 + $0x1] sm:$0x1]  ;;  %v22_v2 = vld [vmem:[%s271_s1] sm:$0x1]  ;;  %v24_v3 = vld [vmem:[%s271_s1 + $0x2] sm:$0x1]  ;;  %v123_v17 = vunpack.c.l.s4 %v211_v16 }
   0x2   :  { %37 = vperm.xlu0 %208, %v23_v1   ;;  %28 = vperm.xlu1 %209, %v22_v2   ;;  %v25_v4 = vld [vmem:[%s271_s1 + $0x3] sm:$0x1]  ;;  %v67_v5 = vld [vmem:[%s272_s2 + $0x1] sm:$0x1]  ;;  %v68_v6 = vld [vmem:[%s272_s2 + $0x2] sm:$0x1] }
   0x3   :  { %v66_v7 = vld [vmem:[%s272_s2] sm:$0x1]  ;;  %v69_v8 = vld [vmem:[%s272_s2 + $0x3] sm:$0x1]  ;;  %v32_v10 = vshrl.u32 %v31_v9, 7  ;;  %v124_v26 = vunpack.c.0.s8 %v123_v17  ;;  %vm186_vm1 = vcmask 1042434  }
   0x4   :  { %v15_v14 = vld [vmem:[%s273_s0 + $0x1] sm:$0x1]  ;;  %v16_v15 = vld [vmem:[%s273_s0 + $0x2] sm:$0x1]  ;;  %v14_v22 = vld [vmem:[%s273_s0] sm:$0x1] }
   0x5   :  { %v33_v13 = vsub.s32 0, %v32_v10  ;;  %v19_v20 = vunpack.c.l.bf16 %v15_v14  ;;  %v20_v23 = vunpack.c.l.bf16 %v16_v15  ;;  %v17_v25 = vld [vmem:[%s273_s0 + $0x3] sm:$0x1]  ;;  %v18_v27 = vunpack.c.l.bf16 %v14_v22 }
   0x6   :  { %46 = vperm.xlu0 %208, %v24_v3   ;;  %55 = vperm.xlu1 %209, %v25_v4   ;;  %v21_v29 = vunpack.c.l.bf16 %v17_v25  ;;  %v127_v39 = vsub.s32 %v124_v26, %v32_v10  ;;  %vm189_vm2 = vcmask 1043459  }
   0xa   :  { %81 = vperm.xlu0 %208, %v67_v5   ;;  %90 = vperm.xlu1 %209, %v68_v6  }
   0xe   :  { %72 = vperm.xlu0 %208, %v66_v7   ;;  %99 = vperm.xlu1 %209, %v69_v8  }
  0x7d   :  { %v38_v11 = vpop.permute.xlu0 %37  ;;  %v29_v12 = vpop.permute.xlu1 %28 }
  0x7e   :  { %v43_v21 = vrot.slane %v38_v11, %v33_v13  ;;  %v34_v28 = vrot.slane %v29_v12, %v33_v13 }
  0x80   :  { %v63_v33 = vmul.f32 %v43_v21, %v19_v20  ;;  %v62_v40 = vmul.f32 %v34_v28, %v18_v27 }
  0x81   :  { %v47_v18 = vpop.permute.xlu0 %46  ;;  %v56_v19 = vpop.permute.xlu1 %55 }
  0x82   :  { %v52_v24 = vrot.slane %v47_v18, %v33_v13  ;;  %v61_v30 = vrot.slane %v56_v19, %v33_v13 }
  0x84   :  { %v64_v34 = vmul.f32 %v52_v24, %v20_v23  ;;  %v65_v41 = vmul.f32 %v61_v30, %v21_v29 }
  0x85   :  { %v82_v31 = vpop.permute.xlu0 %81  ;;  %v91_v32 = vpop.permute.xlu1 %90 }
  0x86   :  { %v87_v35 = vrot.slane %v82_v31, %v33_v13  ;;  %v96_v36 = vrot.slane %v91_v32, %v33_v13 }
  0x88   :  { %v107_v37 = vadd.f32 %v87_v35, %v63_v33  ;;  %v108_v38 = vadd.f32 %v96_v36, %v64_v34 }
  0x89   :  { %v73_v42 = vpop.permute.xlu0 %72  ;;  %v100_v43 = vpop.permute.xlu1 %99 }
  0x8a   :  { %v111_v44 = vmax.f32 %v107_v37, 0.0  ;;  %v112_v45 = vmax.f32 %v108_v38, 0.0  ;;  %v78_v46 = vrot.slane %v73_v42, %v33_v13  ;;  %v105_v47 = vrot.slane %v100_v43, %v33_v13 }
  0x8c   :  { %v115_v48 = vpack.c.bf16 %v111_v44, %v111_v44  ;;  %v116_v49 = vpack.c.bf16 %v112_v45, %v112_v45  ;;  %v106_v50 = vadd.f32 %v78_v46, %v62_v40  ;;  %v109_v51 = vadd.f32 %v105_v47, %v65_v41 }
  0x8e   :  { %v135_v52 = vrot.slane %v115_v48, %v127_v39  ;;  %v142_v53 = vrot.slane %v116_v49, %v127_v39  ;;  %v110_v54 = vmax.f32 %v106_v50, 0.0  ;;  %v113_v55 = vmax.f32 %v109_v51, 0.0 }
  0x90   :  { %v163_v56 = vrot.slane %v135_v52, %v127_v39  ;;  %v170_v57 = vrot.slane %v142_v53, %v127_v39  ;;  %v114_v58 = vpack.c.bf16 %v110_v54, %v110_v54  ;;  %v117_v59 = vpack.c.bf16 %v113_v55, %v113_v55 }
  0x92   :  { %v179_v60 = vunpack.c.l.b16 %v163_v56  ;;  %v128_v61 = vrot.slane %v114_v58, %v127_v39  ;;  %v149_v62 = vrot.slane %v117_v59, %v127_v39  ;;  %v180_v63 = vunpack.c.l.b16 %v170_v57 }
  0x94   :  { %v156_v0 = vrot.slane %v128_v61, %v127_v39  ;;  %v177_v1 = vrot.slane %v149_v62, %v127_v39  ;;  %v182_v2 = vrot.slane %v179_v60, 7  ;;  %v185_v5 = vrot.slane %v180_v63, 6 }
  0x96   :  { %v178_v3 = vunpack.c.l.b16 %v156_v0  ;;  %v181_v4 = vunpack.c.l.b16 %v177_v1 }
  0x98   :  { %v184_v6 = vsel %vm183_vm0, %v182_v2, %v178_v3  ;;  %v188_v7 = vrot.slane %v181_v4, 5 }
  0x99   :  { %v187_v8 = vsel %vm186_vm1, %v185_v5, %v184_v6 }
  0x9a   :  { %v190_v9 = vsel %vm189_vm2, %v188_v7, %v187_v8 }
  0x9b   :  { %v191_v10 = vpack.c.b16 %v190_v9, %v190_v9 }
  0x9d   :  { %205 = vst.sshfl [vmem:[%s274_s3] sm:$0x3 pattern:$0x76325410] %v191_v10 }

// kernel: mri3d_autoencoder_forward.23
= control target key start
LH: loop header
LB: loop body
LE: loop exit
PB: predicated region body
PF: predicated region fallthrough
CT: control target
= control target key end

     0   :  { %vm360_vm0 = vcmask 1045504   ;;  %v767_v3 = vmov 0   ;;  %vm356_vm1 = vcmask 883712   ;;  %s993_s0 = inlined_call_operand.vmem [shape: bf16[108,1024], index: 0, kind: input, shape index: {}]   ;;  %s994_s2 = inlined_call_operand.<no memory space> [shape: f32[1,1], index: 2, kind: input, shape index: {}]   ;;  %s995_s1 = inlined_call_operand.vmem [shape: bf16[1,108], index: 1, kind: input, shape index: {}]   ;;  %s996_s3 = inlined_call_operand.vmem [shape: f32[1,1024], index: 3, kind: output, shape index: {}]  }
   0x1   :  { %v66_v0 = vld [vmem:[%s993_s0 + $0x180] sm:$0xff]  ;;  %v67_v2 = vld [vmem:[%s993_s0 + $0x188] sm:$0xff]  ;;  %417 = vmatprep.mubr.bf16.mxu0 %v767_v3  ;;  %458 = vmatprep.mubr.bf16.mxu1 %v767_v3  ;;  %v8_v4 = vstv %s994_s2  ;;  %v68_v59 = vld [vmem:[%s993_s0 + $0x190] sm:$0xff] }
   0x2   :  { %v70_v1 = vld [vmem:[%s993_s0 + $0x1a0] sm:$0x33]  ;;  %v71_v6 = vld [vmem:[%s993_s0 + $0x1a8] sm:$0x33]  ;;  %734 = vset.pattern.permute.xlu0 %v767_v3  ;;  %9 = vst [vmem:[#allocation2] sm:$0x1] %v8_v4 }
   0x3   :  { %v709_v5 = vcombine.high %v66_v0, %v70_v1  ;;  %v708_v7 = vcombine.low %v66_v0, %v70_v1  ;;  %v58_v8 = vld [vmem:[%s993_s0 + $0x140] sm:$0xff]  ;;  %v711_v10 = vcombine.high %v67_v2, %v71_v6  ;;  %v710_v11 = vcombine.low %v67_v2, %v71_v6  ;;  %v59_v13 = vld [vmem:[%s993_s0 + $0x148] sm:$0xff]  ;;  %v72_v60 = vld [vmem:[%s993_s0 + $0x1b0] sm:$0x33] }
   0x4   :  { %v62_v9 = vld [vmem:[%s993_s0 + $0x160] sm:$0xff]  ;;  %v63_v14 = vld [vmem:[%s993_s0 + $0x168] sm:$0xff]  ;;  %v69_v61 = vld [vmem:[%s993_s0 + $0x198] sm:$0xff]  ;;  %v713_v1 = vcombine.high %v68_v59, %v72_v60  ;;  %v712_v2 = vcombine.low %v68_v59, %v72_v60 }
   0x5   :  { %v701_v12 = vcombine.high %v58_v8, %v62_v9  ;;  %v50_v15 = vld [vmem:[%s993_s0 + $0x100] sm:$0xff]  ;;  %716 = vmatprep.subr.msk.bf16.mxu0 %vm360_vm0, %v709_v5  ;;  %v362_v16 = vsel %vm360_vm0, %v708_v7, 0  ;;  %v703_v17 = vcombine.high %v59_v13, %v63_v14  ;;  %v51_v19 = vld [vmem:[%s993_s0 + $0x108] sm:$0xff]  ;;  %718 = vmatprep.subr.msk.bf16.mxu1 %vm360_vm0, %v711_v10  ;;  %v368_v21 = vsel %vm360_vm0, %v710_v11, 0  ;;  %v73_v62 = vld [vmem:[%s993_s0 + $0x1b8] sm:$0x33] }
   0x6   :  { %v54_v18 = vld [vmem:[%s993_s0 + $0x120] sm:$0xff]  ;;  %v55_v20 = vld [vmem:[%s993_s0 + $0x128] sm:$0xff]  ;;  %388 = vmatpush1.bf16.msra.mxu0 %v362_v16  ;;  %v700_v22 = vcombine.low %v58_v8, %v62_v9  ;;  %429 = vmatpush1.bf16.msra.mxu1 %v368_v21  ;;  %v702_v23 = vcombine.low %v59_v13, %v63_v14  ;;  %v715_v4 = vcombine.high %v69_v61, %v73_v62  ;;  %v60_v6 = vld [vmem:[%s993_s0 + $0x150] sm:$0xff]  ;;  %v374_v11 = vsel %vm360_vm0, %v712_v2, 0 }
   0x7   :  { %389 = vmatprep.subr.bf16.mxu0 %v701_v12  ;;  %v693_v24 = vcombine.high %v50_v15, %v54_v18  ;;  %430 = vmatprep.subr.bf16.mxu1 %v703_v17  ;;  %v695_v25 = vcombine.high %v51_v19, %v55_v20  ;;  %v42_v26 = vld [vmem:[%s993_s0 + $0xc0] sm:$0xff]  ;;  %v43_v28 = vld [vmem:[%s993_s0 + $0xc8] sm:$0xff]  ;;  %v692_v30 = vcombine.low %v50_v15, %v54_v18  ;;  %v64_v7 = vld [vmem:[%s993_s0 + $0x170] sm:$0xff] }
   0x8   :  { %v46_v27 = vld [vmem:[%s993_s0 + $0xe0] sm:$0xff]  ;;  %v47_v29 = vld [vmem:[%s993_s0 + $0xe8] sm:$0xff]  ;;  %v694_v31 = vcombine.low %v51_v19, %v55_v20  ;;  %v714_v5 = vcombine.low %v69_v61, %v73_v62  ;;  %v61_v8 = vld [vmem:[%s993_s0 + $0x158] sm:$0xff]  ;;  %v705_v12 = vcombine.high %v60_v6, %v64_v7  ;;  %v704_v19 = vcombine.low %v60_v6, %v64_v7 }
   0x9   :  { %v685_v32 = vcombine.high %v42_v26, %v46_v27  ;;  %v687_v33 = vcombine.high %v43_v28, %v47_v29  ;;  %v34_v34 = vld [vmem:[%s993_s0 + $0x80] sm:$0xff]  ;;  %v35_v36 = vld [vmem:[%s993_s0 + $0x88] sm:$0xff]  ;;  %v684_v38 = vcombine.low %v42_v26, %v46_v27  ;;  %v686_v39 = vcombine.low %v43_v28, %v47_v29  ;;  %v65_v9 = vld [vmem:[%s993_s0 + $0x178] sm:$0xff] }
   0xa   :  { %390 = vmatpush1.bf16.msra.mxu0 %v700_v22  ;;  %431 = vmatpush1.bf16.msra.mxu1 %v702_v23  ;;  %v38_v35 = vld [vmem:[%s993_s0 + $0xa0] sm:$0xff]  ;;  %v39_v37 = vld [vmem:[%s993_s0 + $0xa8] sm:$0xff]  ;;  %v380_v13 = vsel %vm360_vm0, %v714_v5, 0  ;;  %v707_v14 = vcombine.high %v61_v8, %v65_v9  ;;  %v52_v15 = vld [vmem:[%s993_s0 + $0x110] sm:$0xff]  ;;  %v706_v20 = vcombine.low %v61_v8, %v65_v9 }
   0xb   :  { %391 = vmatprep.subr.bf16.mxu0 %v693_v24  ;;  %432 = vmatprep.subr.bf16.mxu1 %v695_v25  ;;  %v677_v40 = vcombine.high %v34_v34, %v38_v35  ;;  %v679_v41 = vcombine.high %v35_v36, %v39_v37  ;;  %v26_v42 = vld [vmem:[%s993_s0 + $0x40] sm:$0xff]  ;;  %v27_v44 = vld [vmem:[%s993_s0 + $0x48] sm:$0xff]  ;;  %v676_v46 = vcombine.low %v34_v34, %v38_v35  ;;  %v56_v16 = vld [vmem:[%s993_s0 + $0x130] sm:$0xff] }
   0xc   :  { %v30_v43 = vld [vmem:[%s993_s0 + $0x60] sm:$0xff]  ;;  %v31_v45 = vld [vmem:[%s993_s0 + $0x68] sm:$0xff]  ;;  %v678_v47 = vcombine.low %v35_v36, %v39_v37  ;;  %v53_v17 = vld [vmem:[%s993_s0 + $0x118] sm:$0xff]  ;;  %v697_v21 = vcombine.high %v52_v15, %v56_v16  ;;  %v696_v27 = vcombine.low %v52_v15, %v56_v16 }
   0xd   :  { %v669_v48 = vcombine.high %v26_v42, %v30_v43  ;;  %v671_v49 = vcombine.high %v27_v44, %v31_v45  ;;  %v18_v50 = vld [vmem:[%s993_s0] sm:$0xff]  ;;  %v19_v52 = vld [vmem:[%s993_s0 + $0x8] sm:$0xff]  ;;  %v668_v55 = vcombine.low %v26_v42, %v30_v43  ;;  %v670_v56 = vcombine.low %v27_v44, %v31_v45  ;;  %v57_v18 = vld [vmem:[%s993_s0 + $0x138] sm:$0xff] }
   0xe   :  { %392 = vmatpush1.bf16.msra.mxu0 %v692_v30  ;;  %433 = vmatpush1.bf16.msra.mxu1 %v694_v31  ;;  %v22_v51 = vld [vmem:[%s993_s0 + $0x20] sm:$0xff]  ;;  %v23_v53 = vld [vmem:[%s993_s0 + $0x28] sm:$0xff]  ;;  %v699_v22 = vcombine.high %v53_v17, %v57_v18  ;;  %v44_v23 = vld [vmem:[%s993_s0 + $0xd0] sm:$0xff]  ;;  %v698_v28 = vcombine.low %v53_v17, %v57_v18 }
   0xf   :  { %393 = vmatprep.subr.bf16.mxu0 %v685_v32  ;;  %434 = vmatprep.subr.bf16.mxu1 %v687_v33  ;;  %v74_v54 = vld [vmem:[#allocation2] sm:$0x1]  ;;  %v661_v57 = vcombine.high %v18_v50, %v22_v51  ;;  %v663_v58 = vcombine.high %v19_v52, %v23_v53  ;;  %v660_v63 = vcombine.low %v18_v50, %v22_v51  ;;  %v48_v24 = vld [vmem:[%s993_s0 + $0xf0] sm:$0xff]  ;;  %v45_v25 = vld [vmem:[%s993_s0 + $0xd8] sm:$0xff] }
  0x10   :  { %77 = vperm.xlu0 %734, %v74_v54   ;;  %v662_v0 = vcombine.low %v19_v52, %v23_v53  ;;  %v910_v10 = vld [vmem:[%s995_s1] sm:$0x1]  ;;  %v49_v26 = vld [vmem:[%s993_s0 + $0xf8] sm:$0xff]  ;;  %v689_v29 = vcombine.high %v44_v23, %v48_v24  ;;  %v36_v31 = vld [vmem:[%s993_s0 + $0x90] sm:$0xff]  ;;  %v688_v34 = vcombine.low %v44_v23, %v48_v24 }
  0x11   :  { %v691_v30 = vcombine.high %v45_v25, %v49_v26  ;;  %v40_v32 = vld [vmem:[%s993_s0 + $0xb0] sm:$0xff]  ;;  %v41_v33 = vld [vmem:[%s993_s0 + $0xb8] sm:$0xff]  ;;  %v690_v35 = vcombine.low %v45_v25, %v49_v26 }
  0x12   :  { %394 = vmatpush1.bf16.msra.mxu0 %v684_v38  ;;  %435 = vmatpush1.bf16.msra.mxu1 %v686_v39  ;;  %v681_v36 = vcombine.high %v36_v31, %v40_v32  ;;  %v28_v38 = vld [vmem:[%s993_s0 + $0x50] sm:$0xff]  ;;  %v680_v42 = vcombine.low %v36_v31, %v40_v32 }
  0x13   :  { %395 = vmatprep.subr.bf16.mxu0 %v677_v40  ;;  %436 = vmatprep.subr.bf16.mxu1 %v679_v41  ;;  %v32_v39 = vld [vmem:[%s993_s0 + $0x70] sm:$0xff]  ;;  %v29_v40 = vld [vmem:[%s993_s0 + $0x58] sm:$0xff] }
  0x14   :  { %v33_v41 = vld [vmem:[%s993_s0 + $0x78] sm:$0xff]  ;;  %v673_v44 = vcombine.high %v28_v38, %v32_v39  ;;  %v672_v50 = vcombine.low %v28_v38, %v32_v39 }
  0x15   :  { %v675_v45 = vcombine.high %v29_v40, %v33_v41  ;;  %v674_v51 = vcombine.low %v29_v40, %v33_v41 }
  0x16   :  { %396 = vmatpush1.bf16.msra.mxu0 %v676_v46  ;;  %437 = vmatpush1.bf16.msra.mxu1 %v678_v47  ;;  %v20_v46 = vld [vmem:[%s993_s0 + $0x10] sm:$0xff] }
  0x17   :  { %397 = vmatprep.subr.bf16.mxu0 %v669_v48  ;;  %438 = vmatprep.subr.bf16.mxu1 %v671_v49  ;;  %v24_v47 = vld [vmem:[%s993_s0 + $0x30] sm:$0xff]  ;;  %v21_v48 = vld [vmem:[%s993_s0 + $0x18] sm:$0xff] }
  0x18   :  { %v25_v49 = vld [vmem:[%s993_s0 + $0x38] sm:$0xff]  ;;  %v665_v52 = vcombine.high %v20_v46, %v24_v47  ;;  %v664_v54 = vcombine.low %v20_v46, %v24_v47 }
  0x19   :  { %v667_v53 = vcombine.high %v21_v48, %v25_v49 }
  0x1a   :  { %398 = vmatpush1.bf16.msra.mxu0 %v668_v55  ;;  %439 = vmatpush1.bf16.msra.mxu1 %v670_v56  ;;  %v666_v55 = vcombine.low %v21_v48, %v25_v49  ;;  %v80_v56 = vlaneseq }
  0x1b   :  { %399 = vmatprep.subr.bf16.mxu0 %v661_v57  ;;  %440 = vmatprep.subr.bf16.mxu1 %v663_v58 }
  0x1c   :  { %v986_v58 = vshrl.u32 %v80_v56, 7 }
  0x1e   :  { %400 = vmatpush1.bf16.msra.mxu0 %v660_v63  ;;  %441 = vmatpush1.bf16.msra.mxu1 %v662_v0  ;;  %v82_v63 = vsub.s32 0, %v986_v58 }
  0x1f   :  { %720 = vmatprep.subr.msk.bf16.mxu0 %vm360_vm0, %v713_v1  ;;  %722 = vmatprep.subr.msk.bf16.mxu1 %vm360_vm0, %v715_v4 }
  0x21   :  { %717 = vmatmul.mubr.msk.bf16.vlgmr.msra.gmra.mxu0 %vm356_vm1, %v910_v10  ;;  %719 = vmatmul.mubr.msk.bf16.vlgmr.msra.gmra.mxu1 %vm356_vm1, %v910_v10 }
  0x22   :  { %470 = vmatpush1.bf16.msra.mxu0 %v374_v11  ;;  %511 = vmatpush1.bf16.msra.mxu1 %v380_v13 }
  0x23   :  { %471 = vmatprep.subr.bf16.mxu0 %v705_v12  ;;  %512 = vmatprep.subr.bf16.mxu1 %v707_v14 }
  0x24   :  { %499 = vmatprep.mubr.bf16.mxu0 %v767_v3  ;;  %540 = vmatprep.mubr.bf16.mxu1 %v767_v3  ;;  %v37_v3 = vld [vmem:[%s993_s0 + $0x98] sm:$0xff] }
  0x25   :  { %v683_v37 = vcombine.high %v37_v3, %v41_v33  ;;  %v682_v43 = vcombine.low %v37_v3, %v41_v33 }
  0x26   :  { %472 = vmatpush1.bf16.msra.mxu0 %v704_v19  ;;  %513 = vmatpush1.bf16.msra.mxu1 %v706_v20 }
  0x27   :  { %473 = vmatprep.subr.bf16.mxu0 %v697_v21  ;;  %514 = vmatprep.subr.bf16.mxu1 %v699_v22 }
  0x2a   :  { %474 = vmatpush1.bf16.msra.mxu0 %v696_v27  ;;  %515 = vmatpush1.bf16.msra.mxu1 %v698_v28 }
  0x2b   :  { %475 = vmatprep.subr.bf16.mxu0 %v689_v29  ;;  %516 = vmatprep.subr.bf16.mxu1 %v691_v30 }
  0x2e   :  { %476 = vmatpush1.bf16.msra.mxu0 %v688_v34  ;;  %517 = vmatpush1.bf16.msra.mxu1 %v690_v35 }
  0x2f   :  { %477 = vmatprep.subr.bf16.mxu0 %v681_v36  ;;  %518 = vmatprep.subr.bf16.mxu1 %v683_v37 }
  0x32   :  { %478 = vmatpush1.bf16.msra.mxu0 %v680_v42  ;;  %519 = vmatpush1.bf16.msra.mxu1 %v682_v43 }
  0x33   :  { %479 = vmatprep.subr.bf16.mxu0 %v673_v44  ;;  %520 = vmatprep.subr.bf16.mxu1 %v675_v45  ;;  %v768_v45 = vmov 1966171168  }
  0x34   :  { %v610_v46 = vunpack.c.l.s4 %v768_v45 }
  0x36   :  { %480 = vmatpush1.bf16.msra.mxu0 %v672_v50  ;;  %521 = vmatpush1.bf16.msra.mxu1 %v674_v51  ;;  %v611_v50 = vunpack.c.0.s8 %v610_v46 }
  0x37   :  { %481 = vmatprep.subr.bf16.mxu0 %v665_v52  ;;  %522 = vmatprep.subr.bf16.mxu1 %v667_v53 }
  0x38   :  { %v614_v52 = vsub.s32 %v611_v50, %v986_v58 }
  0x3a   :  { %482 = vmatpush1.bf16.msra.mxu0 %v664_v54  ;;  %523 = vmatpush1.bf16.msra.mxu1 %v666_v55 }
  0x3d   :  { %721 = vmatmul.mubr.msk.bf16.vlgmr.msra.gmra.mxu0 %vm356_vm1, %v910_v10  ;;  %723 = vmatmul.mubr.msk.bf16.vlgmr.msra.gmra.mxu1 %vm356_vm1, %v910_v10 }
  0x8b   :  { %v78_v1 = vpop.permute.xlu0 %77 }
  0x8c   :  { %v83_v5 = vrot.slane %v78_v1, %v82_v63 }
  0xe1   :  { %v419_v57 = vpop.f32.mrf.mxu0  ;;  %v460_v59 = vpop.f32.mrf.mxu1 }
  0xe2   :  { %v420_v6 = vadd.f32 %v419_v57, %v83_v5  ;;  %v461_v7 = vadd.f32 %v460_v59, %v83_v5 }
  0xe3   :  { %v421_v60 = vpop.f32.mrf.mxu0  ;;  %v462_v61 = vpop.f32.mrf.mxu1 }
  0xe4   :  { %v422_v8 = vadd.f32 %v421_v60, %v83_v5  ;;  %v463_v9 = vadd.f32 %v462_v61, %v83_v5  ;;  %v724_v10 = vmul.f32 -1.442695, %v420_v6  ;;  %v726_v11 = vmul.f32 -1.442695, %v461_v7 }
  0xe5   :  { %v423_v62 = vpop.f32.mrf.mxu0  ;;  %v464_v0 = vpop.f32.mrf.mxu1 }
  0xe6   :  { %v725_v12 = vmul.f32 -1.442695, %v422_v8  ;;  %v727_v13 = vmul.f32 -1.442695, %v463_v9  ;;  %735 = vpow2.f32 %v724_v10 }
  0xe7   :  { %v424_v2 = vpop.f32.mrf.mxu0  ;;  %v465_v4 = vpop.f32.mrf.mxu1  ;;  %737 = vpow2.f32 %v726_v11 }
  0xe8   :  { %739 = vpow2.f32 %v725_v12 }
  0xe9   :  { %741 = vpow2.f32 %v727_v13 }
  0xf3   :  { %v736_v27 = vpop.eup %735 }
  0xf4   :  { %v738_v30 = vpop.eup %737  ;;  %v573_v33 = vadd.f32 1.0, %v736_v27 }
  0xf5   :  { %v740_v32 = vpop.eup %739  ;;  %v575_v34 = vadd.f32 1.0, %v738_v30 }
  0xf6   :  { %v742_v3 = vpop.eup %741  ;;  %v574_v35 = vadd.f32 1.0, %v740_v32 }
  0xf7   :  { %v576_v36 = vadd.f32 1.0, %v742_v3 }
  0xfd   :  { %v501_v14 = vpop.f32.mrf.mxu0  ;;  %v542_v16 = vpop.f32.mrf.mxu1 }
  0xfe   :  { %v502_v15 = vadd.f32 %v501_v14, %v83_v5  ;;  %v543_v17 = vadd.f32 %v542_v16, %v83_v5 }
  0xff   :  { %v503_v18 = vpop.f32.mrf.mxu0  ;;  %v544_v21 = vpop.f32.mrf.mxu1 }
 0x100   :  { %v728_v19 = vmul.f32 -1.442695, %v502_v15  ;;  %v504_v20 = vadd.f32 %v503_v18, %v83_v5  ;;  %v730_v22 = vmul.f32 -1.442695, %v543_v17  ;;  %v545_v23 = vadd.f32 %v544_v21, %v83_v5 }
 0x101   :  { %v505_v24 = vpop.f32.mrf.mxu0  ;;  %v546_v26 = vpop.f32.mrf.mxu1 }
 0x102   :  { %743 = vpow2.f32 %v728_v19  ;;  %v729_v25 = vmul.f32 -1.442695, %v504_v20  ;;  %v731_v28 = vmul.f32 -1.442695, %v545_v23 }
 0x103   :  { %745 = vpow2.f32 %v730_v22  ;;  %v506_v29 = vpop.f32.mrf.mxu0  ;;  %v547_v31 = vpop.f32.mrf.mxu1 }
 0x104   :  { %747 = vpow2.f32 %v729_v25 }
 0x105   :  { %749 = vpow2.f32 %v731_v28 }
 0x106   :  { %751 = vrcp.f32 %v573_v33 }
 0x107   :  { %753 = vrcp.f32 %v575_v34 }
 0x108   :  { %755 = vrcp.f32 %v574_v35 }
 0x109   :  { %757 = vrcp.f32 %v576_v36 }
 0x10f   :  { %v744_v37 = vpop.eup %743 }
 0x110   :  { %v746_v38 = vpop.eup %745  ;;  %v577_v39 = vadd.f32 1.0, %v744_v37 }
 0x111   :  { %v748_v40 = vpop.eup %747  ;;  %v579_v41 = vadd.f32 1.0, %v746_v38 }
 0x112   :  { %v750_v42 = vpop.eup %749  ;;  %759 = vrcp.f32 %v577_v39  ;;  %v578_v43 = vadd.f32 1.0, %v748_v40 }
 0x113   :  { %761 = vrcp.f32 %v579_v41  ;;  %v580_v44 = vadd.f32 1.0, %v750_v42  ;;  %v752_v47 = vpop.eup %751 }
 0x114   :  { %763 = vrcp.f32 %v578_v43  ;;  %v754_v48 = vpop.eup %753 }
 0x115   :  { %765 = vrcp.f32 %v580_v44  ;;  %v756_v49 = vpop.eup %755 }
 0x116   :  { %v758_v51 = vpop.eup %757  ;;  %v605_v53 = vcombine.low %v752_v47, %v756_v49 }
 0x117   :  { %v606_v54 = vcombine.low %v754_v48, %v758_v51 }
 0x118   :  { %v615_v59 = vrot.slane %v605_v53, %v614_v52 }
 0x119   :  { %v622_v60 = vrot.slane %v606_v54, %v614_v52 }
 0x11b   :  { %v637_v1 = vcombine.low %v615_v59, %v622_v60 }
 0x11d   :  { %v645_v5 = vrot.slane %v637_v1, %v614_v52 }
 0x11f   :  { %v760_v55 = vpop.eup %759 }
 0x120   :  { %v762_v56 = vpop.eup %761 }
 0x121   :  { %v764_v57 = vpop.eup %763 }
 0x122   :  { %v766_v61 = vpop.eup %765  ;;  %v607_v62 = vcombine.low %v760_v55, %v764_v57 }
 0x123   :  { %v608_v63 = vcombine.low %v762_v56, %v766_v61 }
 0x124   :  { %v629_v0 = vrot.slane %v607_v62, %v614_v52 }
 0x125   :  { %v636_v2 = vrot.slane %v608_v63, %v614_v52 }
 0x127   :  { %v638_v4 = vcombine.low %v629_v0, %v636_v2 }
 0x129   :  { %v652_v6 = vrot.slane %v638_v4, %v614_v52 }
 0x12b   :  { %v653_v7 = vcombine.low %v645_v5, %v652_v6 }
 0x12d   :  { %655 = vst [vmem:[%s996_s3] sm:$0xff] %v653_v7 }

</bundles_post_ra>
